<compile_context>
chip_gen: v5e
topology: v5e:2x2
jax: 0.10.0
libtpu: 0.0.40
codegen_flags: <defaults>
</compile_context>

<pallas_src>
import numpy as np
import jax
import jax.numpy as jnp
from jax.experimental import pallas as pl
from jax.experimental.pallas import tpu as pltpu

CLASSES = 118
EPS = 1e-5

_VMEM = pl.BlockSpec(memory_space=pltpu.MemorySpace.VMEM)


# ---------------------------------------------------------------------------
# Kernel 1: conv1+BN+ReLU+pool -> conv2+BN+ReLU+pool, fused, single step.
#
#   xs4 : (B, 9, 9, 48)  space-to-depth of the zero-padded 36x36x3 image;
#         lane = u*12 + v*3 + ci for padded pixel (4U+u, 4V+v, ci).
#   w1  : (4, 48, 128)   packed conv1 weights (BN scale folded); tap (A,C) maps
#         input lanes (u,v,ci) -> output lanes (dh,dw,p,q,co) for output pixel
#         (4I+2p+dh, 4J+2q+dw).  Pool over (dh,dw) = max of 4 lane blocks of 32.
#   w2  : (9, 32, 64)    packed conv2 weights; input lanes (p,q,cin), output
#         lanes (dy,dx,co2).  Pool over (dy,dx) = max of 4 lane blocks of 16.
#   out : (B*64, 16)     rows (b, i2, j2), lanes co2  (pooled conv2 features).
# ---------------------------------------------------------------------------
def conv_stage_kernel(xs4_ref, w1_ref, s1_ref, w2_ref, s2_ref, feat_ref,
                      z1pad_ref):
    B = xs4_ref.shape[0]
    rows = B * 64

    # conv1 (5x5, pad 2) as 4 lane-dense MXU matmuls over space-to-depth taps.
    acc1 = jnp.zeros((rows, 128), jnp.float32)
    for a in range(2):
        for c in range(2):
            tap = xs4_ref[:, a:a + 8, c:c + 8, :].reshape(rows, 48)
            acc1 = acc1 + jnp.dot(tap.astype(jnp.bfloat16), w1_ref[a * 2 + c],
                                  preferred_element_type=jnp.float32)
    y1 = jnp.maximum(acc1 + s1_ref[...], 0.0)                     # BN shift + ReLU
    z1 = jnp.maximum(jnp.maximum(y1[:, 0:32], y1[:, 32:64]),      # 2x2 maxpool
                     jnp.maximum(y1[:, 64:96], y1[:, 96:128]))    # (rows, 32)

    # Zero-pad the pooled 16x16 map (kept in space-to-depth form: rows (b,I,J),
    # lanes (p,q,c)) by one (I,J) group on each side -> conv2's padding=2.
    z1pad_ref[...] = jnp.zeros(z1pad_ref.shape, jnp.float32)
    z1pad_ref[:, 1:9, 1:9, :] = z1.reshape(B, 8, 8, 32)

    # conv2 (5x5, pad 2) as 9 matmuls; pooling again fused as lane-block max.
    acc2 = jnp.zeros((rows, 64), jnp.float32)
    for a in range(3):
        for c in range(3):
            tap = z1pad_ref[:, a:a + 8, c:c + 8, :].reshape(rows, 32)
            acc2 = acc2 + jnp.dot(tap.astype(jnp.bfloat16), w2_ref[a * 3 + c],
                                  preferred_element_type=jnp.float32)
    y2 = jnp.maximum(acc2 + s2_ref[...], 0.0)
    feat = jnp.maximum(jnp.maximum(y2[:, 0:16], y2[:, 16:32]),
                       jnp.maximum(y2[:, 32:48], y2[:, 48:64]))   # (rows, 16)
    feat_ref[...] = feat.astype(feat_ref.dtype)


# ---------------------------------------------------------------------------
# Kernel 2: fc1 -> ReLU -> (dropout = identity) -> fc2, bf16 weights, f32 accum.
# ---------------------------------------------------------------------------
def mlp_kernel(x_ref, w1_ref, b1_ref, w2_ref, b2_ref, o_ref):
    h = jnp.dot(x_ref[...], w1_ref[...], preferred_element_type=jnp.float32)
    h = jnp.maximum(h + b1_ref[...], 0.0)
    # TODO(synk): training-mode dropout (p=0.5) omitted; identity here.
    out = jnp.dot(h.astype(jnp.bfloat16), w2_ref[...],
                  preferred_element_type=jnp.float32)
    o_ref[...] = (out + b2_ref[...]).astype(o_ref.dtype)


# ---------------------------------------------------------------------------
# pallas_call wrappers (no grid -> one step, whole problem in VMEM)
# ---------------------------------------------------------------------------
def conv_stage(xs4, w1, s1, w2, s2):
    B = xs4.shape[0]
    return pl.pallas_call(
        conv_stage_kernel,
        out_shape=jax.ShapeDtypeStruct((B * 64, 16), jnp.bfloat16),
        in_specs=[_VMEM] * 5,
        out_specs=_VMEM,
        scratch_shapes=[pltpu.VMEM((B, 10, 10, 32), jnp.float32)],
    )(xs4, w1, s1, w2, s2)


def mlp(x, w1, b1, w2, b2):
    B = x.shape[0]
    return pl.pallas_call(
        mlp_kernel,
        out_shape=jax.ShapeDtypeStruct((B, w2.shape[1]), jnp.float32),
        in_specs=[_VMEM] * 5,
        out_specs=_VMEM,
    )(x, w1, b1, w2, b2)


# ---------------------------------------------------------------------------
# Host-side weight packing (runs once at init; folds BN scale, builds the
# tap-matrices that implement conv+pool in the grouped lane layout).
# ---------------------------------------------------------------------------
def _fold_bn(conv_b, gamma, beta, mean, var):
    scale = gamma / np.sqrt(var + EPS)
    shift = (conv_b - mean) * scale + beta
    return scale, shift


def _pack_conv1(w, scale):
    # w: (co=8, ci=3, kh, kw) torch layout -> (4, 48, 128) tap matrices.
    ws = w * scale[:, None, None, None]
    packed = np.zeros((4, 48, 128), np.float32)
    for A in range(2):
        for C in range(2):
            t = A * 2 + C
            for u in range(4):
                for v in range(4):
                    for dh in range(2):
                        for dw in range(2):
                            for p in range(2):
                                for q in range(2):
                                    kh = 4 * A + u - 2 * p - dh
                                    kw = 4 * C + v - 2 * q - dw
                                    if 0 <= kh < 5 and 0 <= kw < 5:
                                        r0 = u * 12 + v * 3
                                        c0 = dh * 64 + dw * 32 + p * 16 + q * 8
                                        packed[t, r0:r0 + 3, c0:c0 + 8] = \
                                            ws[:, :, kh, kw].T
    return packed


def _pack_conv2(w, scale):
    # w: (co=16, ci=8, ky, kx) torch layout -> (9, 32, 64) tap matrices.
    ws = w * scale[:, None, None, None]
    packed = np.zeros((9, 32, 64), np.float32)
    for A in range(3):
        for C in range(3):
            t = A * 3 + C
            for p in range(2):
                for q in range(2):
                    for dy in range(2):
                        for dx in range(2):
                            ky = 2 * A + p - dy
                            kx = 2 * C + q - dx
                            if 0 <= ky < 5 and 0 <= kx < 5:
                                r0 = p * 16 + q * 8
                                c0 = dy * 32 + dx * 16
                                packed[t, r0:r0 + 8, c0:c0 + 16] = \
                                    ws[:, :, ky, kx].T
    return packed


def init_params(key):
    ks = jax.random.split(key, 16)
    f32 = jnp.float32

    # conv1: Conv2d(3, 8, k=5, pad=2)   (torch weight layout [Cout, Cin, KH, KW])
    c1_w = 0.1 * jax.random.normal(ks[0], (8, 3, 5, 5), f32)
    c1_b = 0.1 * jax.random.normal(ks[1], (8,), f32)
    bn1_g = 1.0 + 0.1 * jax.random.normal(ks[2], (8,), f32)
    bn1_b = 0.1 * jax.random.normal(ks[3], (8,), f32)
    bn1_m = 0.1 * jax.random.normal(ks[4], (8,), f32)
    bn1_v = 0.5 + jnp.abs(jax.random.normal(ks[5], (8,), f32))

    # conv2: Conv2d(8, 16, k=5, pad=2)
    c2_w = 0.1 * jax.random.normal(ks[6], (16, 8, 5, 5), f32)
    c2_b = 0.1 * jax.random.normal(ks[7], (16,), f32)
    bn2_g = 1.0 + 0.1 * jax.random.normal(ks[8], (16,), f32)
    bn2_b = 0.1 * jax.random.normal(ks[9], (16,), f32)
    bn2_m = 0.1 * jax.random.normal(ks[10], (16,), f32)
    bn2_v = 0.5 + jnp.abs(jax.random.normal(ks[11], (16,), f32))

    # fc1: Linear(8*8*16, 300), fc2: Linear(300, 118)
    # (created directly as [in, out] with `in` in (h, w, c) flatten order;
    #  equivalent to a permuted PyTorch weight since parameters are synthetic)
    fc1_w = 0.05 * jax.random.normal(ks[12], (8 * 8 * 16, 300), f32)
    fc1_b = 0.05 * jax.random.normal(ks[13], (300,), f32)
    fc2_w = 0.05 * jax.random.normal(ks[14], (300, CLASSES), f32)
    fc2_b = 0.05 * jax.random.normal(ks[15], (CLASSES,), f32)

    # fold eval-mode BN: scale into the conv weights, shift applied in-kernel.
    scale1, shift1 = _fold_bn(np.asarray(c1_b), np.asarray(bn1_g),
                              np.asarray(bn1_b), np.asarray(bn1_m),
                              np.asarray(bn1_v))
    scale2, shift2 = _fold_bn(np.asarray(c2_b), np.asarray(bn2_g),
                              np.asarray(bn2_b), np.asarray(bn2_m),
                              np.asarray(bn2_v))

    w1_big = _pack_conv1(np.asarray(c1_w), scale1)
    w2_big = _pack_conv2(np.asarray(c2_w), scale2)
    s1 = np.tile(shift1, 16)[None, :].astype(np.float32)   # (1, 128)
    s2 = np.tile(shift2, 4)[None, :].astype(np.float32)    # (1, 64)

    # pad fc dims to lane-friendly sizes: hidden 300 -> 384, classes 118 -> 128
    fc1_w_p = np.zeros((1024, 384), np.float32)
    fc1_w_p[:, :300] = np.asarray(fc1_w)
    fc1_b_p = np.zeros((1, 384), np.float32)
    fc1_b_p[0, :300] = np.asarray(fc1_b)
    fc2_w_p = np.zeros((384, 128), np.float32)
    fc2_w_p[:300, :CLASSES] = np.asarray(fc2_w)
    fc2_b_p = np.zeros((1, 128), np.float32)
    fc2_b_p[0, :CLASSES] = np.asarray(fc2_b)

    return dict(
        w1=jnp.asarray(w1_big, jnp.bfloat16),
        s1=jnp.asarray(s1, jnp.float32),
        w2=jnp.asarray(w2_big, jnp.bfloat16),
        s2=jnp.asarray(s2, jnp.float32),
        fc1_w=jnp.asarray(fc1_w_p, jnp.bfloat16),
        fc1_b=jnp.asarray(fc1_b_p, jnp.float32),
        fc2_w=jnp.asarray(fc2_w_p, jnp.bfloat16),
        fc2_b=jnp.asarray(fc2_b_p, jnp.float32),
    )


# ---------------------------------------------------------------------------
# Forward pass (mirrors Model.forward)
# ---------------------------------------------------------------------------
@jax.jit
def forward(x_nchw, params):
    B, C, H, W = x_nchw.shape
    assert (C, H, W) == (3, 32, 32), "model geometry requires 3x32x32 inputs"
    x = jnp.transpose(x_nchw, (0, 2, 3, 1)).astype(jnp.float32)   # NCHW -> NHWC
    xp = jnp.pad(x, ((0, 0), (2, 2), (2, 2), (0, 0)))             # (B, 36, 36, 3)
    # cheap space-to-depth (granularity 4) so conv taps are contiguous slices.
    xs4 = xp.reshape(B, 9, 4, 9, 4, 3).transpose(0, 1, 3, 2, 4, 5)
    xs4 = xs4.reshape(B, 9, 9, 48)

    # conv1+BN+ReLU+pool+conv2+BN+ReLU+pool, one fused kernel in VMEM.
    feat = conv_stage(xs4, params["w1"], params["s1"],
                      params["w2"], params["s2"])                 # (B*64, 16)
    flat = feat.reshape(B, 8 * 8 * 16)                            # (h, w, c) order

    # fc1 -> relu -> (dropout identity) -> fc2 (padded to 384/128 lanes).
    logits = mlp(flat, params["fc1_w"], params["fc1_b"],
                 params["fc2_w"], params["fc2_b"])                # (B, 128)
    return logits[:, :CLASSES]


if __name__ == "__main__":
    key = jax.random.PRNGKey(0)
    pkey, xkey = jax.random.split(key)
    params = init_params(pkey)
    # input shape implied by fc1 = Linear(8*8*16, 300): 32x32 RGB images, NCHW
    x = jax.random.normal(xkey, (2, 3, 32, 32), jnp.float32)
    out = forward(x, params)
    jax.block_until_ready(out)
    assert out.shape == (2, CLASSES) and out.dtype == jnp.float32
    print("KERNEL_OK")
</pallas_src>

<mosaic_0001>
module attributes {stable_mosaic.version = 11 : i64} {
  func.func @conv_stage_kernel(%arg0: memref<2x9x9x48xf32, #tpu.memory_space<vmem>>, %arg1: memref<4x48x128xbf16, #tpu.memory_space<vmem>>, %arg2: memref<1x128xf32, #tpu.memory_space<vmem>>, %arg3: memref<9x32x64xbf16, #tpu.memory_space<vmem>>, %arg4: memref<1x64xf32, #tpu.memory_space<vmem>>, %arg5: memref<128x16xbf16, #tpu.memory_space<vmem>>, %arg6: memref<2x10x10x32xf32, #tpu.memory_space<vmem>>) attributes {dimension_semantics = [], scalar_prefetch = 0 : i64, scratch_operands = 1 : i64, tpu.core_type = #tpu.core_type<tc>} {
    %cst = arith.constant 0.000000e+00 : f32
    %0 = vector.broadcast %cst : f32 to vector<128x128xf32>
    %c0 = arith.constant 0 : index
    %c0_0 = arith.constant 0 : index
    %c0_1 = arith.constant 0 : index
    %c0_2 = arith.constant 0 : index
    %1 = vector.load %arg0[%c0, %c0_0, %c0_1, %c0_2] : memref<2x9x9x48xf32, #tpu.memory_space<vmem>>, vector<2x8x8x48xf32>
    %2 = vector.shape_cast %1 : vector<2x8x8x48xf32> to vector<128x48xf32>
    %3 = arith.truncf %2 : vector<128x48xf32> to vector<128x48xbf16>
    %c0_3 = arith.constant 0 : index
    %c0_4 = arith.constant 0 : index
    %c0_5 = arith.constant 0 : index
    %4 = vector.load %arg1[%c0_3, %c0_4, %c0_5] : memref<4x48x128xbf16, #tpu.memory_space<vmem>>, vector<1x48x128xbf16>
    %5 = vector.shape_cast %4 : vector<1x48x128xbf16> to vector<48x128xbf16>
    %cst_6 = arith.constant dense<0.000000e+00> : vector<128x128xf32>
    %6 = tpu.matmul %3, %5, %cst_6 {dimension_numbers = #tpu.dot_dimension_numbers<[1], [0], [0], [1], [0, 0, 1, 1], [], []>} : vector<128x48xbf16>, vector<48x128xbf16>, vector<128x128xf32> -> vector<128x128xf32>
    %7 = arith.addf %0, %6 : vector<128x128xf32>
    %c0_7 = arith.constant 0 : index
    %c0_8 = arith.constant 0 : index
    %c1 = arith.constant 1 : index
    %c0_9 = arith.constant 0 : index
    %8 = vector.load %arg0[%c0_7, %c0_8, %c1, %c0_9] : memref<2x9x9x48xf32, #tpu.memory_space<vmem>>, vector<2x8x8x48xf32>
    %9 = vector.shape_cast %8 : vector<2x8x8x48xf32> to vector<128x48xf32>
    %10 = arith.truncf %9 : vector<128x48xf32> to vector<128x48xbf16>
    %c1_10 = arith.constant 1 : index
    %c0_11 = arith.constant 0 : index
    %c0_12 = arith.constant 0 : index
    %11 = vector.load %arg1[%c1_10, %c0_11, %c0_12] : memref<4x48x128xbf16, #tpu.memory_space<vmem>>, vector<1x48x128xbf16>
    %12 = vector.shape_cast %11 : vector<1x48x128xbf16> to vector<48x128xbf16>
    %cst_13 = arith.constant dense<0.000000e+00> : vector<128x128xf32>
    %13 = tpu.matmul %10, %12, %cst_13 {dimension_numbers = #tpu.dot_dimension_numbers<[1], [0], [0], [1], [0, 0, 1, 1], [], []>} : vector<128x48xbf16>, vector<48x128xbf16>, vector<128x128xf32> -> vector<128x128xf32>
    %14 = arith.addf %7, %13 : vector<128x128xf32>
    %c0_14 = arith.constant 0 : index
    %c1_15 = arith.constant 1 : index
    %c0_16 = arith.constant 0 : index
    %c0_17 = arith.constant 0 : index
    %15 = vector.load %arg0[%c0_14, %c1_15, %c0_16, %c0_17] : memref<2x9x9x48xf32, #tpu.memory_space<vmem>>, vector<2x8x8x48xf32>
    %16 = vector.shape_cast %15 : vector<2x8x8x48xf32> to vector<128x48xf32>
    %17 = arith.truncf %16 : vector<128x48xf32> to vector<128x48xbf16>
    %c2 = arith.constant 2 : index
    %c0_18 = arith.constant 0 : index
    %c0_19 = arith.constant 0 : index
    %18 = vector.load %arg1[%c2, %c0_18, %c0_19] : memref<4x48x128xbf16, #tpu.memory_space<vmem>>, vector<1x48x128xbf16>
    %19 = vector.shape_cast %18 : vector<1x48x128xbf16> to vector<48x128xbf16>
    %cst_20 = arith.constant dense<0.000000e+00> : vector<128x128xf32>
    %20 = tpu.matmul %17, %19, %cst_20 {dimension_numbers = #tpu.dot_dimension_numbers<[1], [0], [0], [1], [0, 0, 1, 1], [], []>} : vector<128x48xbf16>, vector<48x128xbf16>, vector<128x128xf32> -> vector<128x128xf32>
    %21 = arith.addf %14, %20 : vector<128x128xf32>
    %c0_21 = arith.constant 0 : index
    %c1_22 = arith.constant 1 : index
    %c1_23 = arith.constant 1 : index
    %c0_24 = arith.constant 0 : index
    %22 = vector.load %arg0[%c0_21, %c1_22, %c1_23, %c0_24] : memref<2x9x9x48xf32, #tpu.memory_space<vmem>>, vector<2x8x8x48xf32>
    %23 = vector.shape_cast %22 : vector<2x8x8x48xf32> to vector<128x48xf32>
    %24 = arith.truncf %23 : vector<128x48xf32> to vector<128x48xbf16>
    %c3 = arith.constant 3 : index
    %c0_25 = arith.constant 0 : index
    %c0_26 = arith.constant 0 : index
    %25 = vector.load %arg1[%c3, %c0_25, %c0_26] : memref<4x48x128xbf16, #tpu.memory_space<vmem>>, vector<1x48x128xbf16>
    %26 = vector.shape_cast %25 : vector<1x48x128xbf16> to vector<48x128xbf16>
    %cst_27 = arith.constant dense<0.000000e+00> : vector<128x128xf32>
    %27 = tpu.matmul %24, %26, %cst_27 {dimension_numbers = #tpu.dot_dimension_numbers<[1], [0], [0], [1], [0, 0, 1, 1], [], []>} : vector<128x48xbf16>, vector<48x128xbf16>, vector<128x128xf32> -> vector<128x128xf32>
    %28 = arith.addf %21, %27 : vector<128x128xf32>
    %c0_28 = arith.constant 0 : index
    %c0_29 = arith.constant 0 : index
    %29 = vector.load %arg2[%c0_28, %c0_29] : memref<1x128xf32, #tpu.memory_space<vmem>>, vector<1x128xf32>
    %30 = vector.broadcast %29 : vector<1x128xf32> to vector<128x128xf32>
    %31 = arith.addf %28, %30 : vector<128x128xf32>
    %cst_30 = arith.constant 0.000000e+00 : f32
    %32 = vector.broadcast %cst_30 : f32 to vector<128x128xf32>
    %33 = arith.maximumf %31, %32 : vector<128x128xf32>
    %34 = vector.extract_strided_slice %33 {offsets = [0, 0], sizes = [128, 32], strides = [1, 1]} : vector<128x128xf32> to vector<128x32xf32>
    %35 = vector.extract_strided_slice %33 {offsets = [0, 32], sizes = [128, 32], strides = [1, 1]} : vector<128x128xf32> to vector<128x32xf32>
    %36 = arith.maximumf %34, %35 : vector<128x32xf32>
    %37 = vector.extract_strided_slice %33 {offsets = [0, 64], sizes = [128, 32], strides = [1, 1]} : vector<128x128xf32> to vector<128x32xf32>
    %38 = vector.extract_strided_slice %33 {offsets = [0, 96], sizes = [128, 32], strides = [1, 1]} : vector<128x128xf32> to vector<128x32xf32>
    %39 = arith.maximumf %37, %38 : vector<128x32xf32>
    %40 = arith.maximumf %36, %39 : vector<128x32xf32>
    %cst_31 = arith.constant 0.000000e+00 : f32
    %41 = vector.broadcast %cst_31 : f32 to vector<2x10x10x32xf32>
    %c0_32 = arith.constant 0 : index
    %c0_33 = arith.constant 0 : index
    %c0_34 = arith.constant 0 : index
    %c0_35 = arith.constant 0 : index
    %42 = vector.load %arg6[%c0_32, %c0_33, %c0_34, %c0_35] : memref<2x10x10x32xf32, #tpu.memory_space<vmem>>, vector<2x10x10x32xf32>
    tpu.vector_store %arg6[%c0_32, %c0_33, %c0_34, %c0_35], %41 {strides = array<i32>} : memref<2x10x10x32xf32, #tpu.memory_space<vmem>>, vector<2x10x10x32xf32>,
    %43 = vector.shape_cast %40 : vector<128x32xf32> to vector<2x8x8x32xf32>
    %c0_36 = arith.constant 0 : index
    %c1_37 = arith.constant 1 : index
    %c1_38 = arith.constant 1 : index
    %c0_39 = arith.constant 0 : index
    %44 = vector.load %arg6[%c0_36, %c1_37, %c1_38, %c0_39] : memref<2x10x10x32xf32, #tpu.memory_space<vmem>>, vector<2x8x8x32xf32>
    tpu.vector_store %arg6[%c0_36, %c1_37, %c1_38, %c0_39], %43 {strides = array<i32>} : memref<2x10x10x32xf32, #tpu.memory_space<vmem>>, vector<2x8x8x32xf32>,
    %cst_40 = arith.constant 0.000000e+00 : f32
    %45 = vector.broadcast %cst_40 : f32 to vector<128x64xf32>
    %c0_41 = arith.constant 0 : index
    %c0_42 = arith.constant 0 : index
    %c0_43 = arith.constant 0 : index
    %c0_44 = arith.constant 0 : index
    %46 = vector.load %arg6[%c0_41, %c0_42, %c0_43, %c0_44] : memref<2x10x10x32xf32, #tpu.memory_space<vmem>>, vector<2x8x8x32xf32>
    %47 = vector.shape_cast %46 : vector<2x8x8x32xf32> to vector<128x32xf32>
    %48 = arith.truncf %47 : vector<128x32xf32> to vector<128x32xbf16>
    %c0_45 = arith.constant 0 : index
    %c0_46 = arith.constant 0 : index
    %c0_47 = arith.constant 0 : index
    %49 = vector.load %arg3[%c0_45, %c0_46, %c0_47] : memref<9x32x64xbf16, #tpu.memory_space<vmem>>, vector<1x32x64xbf16>
    %50 = vector.shape_cast %49 : vector<1x32x64xbf16> to vector<32x64xbf16>
    %cst_48 = arith.constant dense<0.000000e+00> : vector<128x64xf32>
    %51 = tpu.matmul %48, %50, %cst_48 {dimension_numbers = #tpu.dot_dimension_numbers<[1], [0], [0], [1], [0, 0, 1, 1], [], []>} : vector<128x32xbf16>, vector<32x64xbf16>, vector<128x64xf32> -> vector<128x64xf32>
    %52 = arith.addf %45, %51 : vector<128x64xf32>
    %c0_49 = arith.constant 0 : index
    %c0_50 = arith.constant 0 : index
    %c1_51 = arith.constant 1 : index
    %c0_52 = arith.constant 0 : index
    %53 = vector.load %arg6[%c0_49, %c0_50, %c1_51, %c0_52] : memref<2x10x10x32xf32, #tpu.memory_space<vmem>>, vector<2x8x8x32xf32>
    %54 = vector.shape_cast %53 : vector<2x8x8x32xf32> to vector<128x32xf32>
    %55 = arith.truncf %54 : vector<128x32xf32> to vector<128x32xbf16>
    %c1_53 = arith.constant 1 : index
    %c0_54 = arith.constant 0 : index
    %c0_55 = arith.constant 0 : index
    %56 = vector.load %arg3[%c1_53, %c0_54, %c0_55] : memref<9x32x64xbf16, #tpu.memory_space<vmem>>, vector<1x32x64xbf16>
    %57 = vector.shape_cast %56 : vector<1x32x64xbf16> to vector<32x64xbf16>
    %cst_56 = arith.constant dense<0.000000e+00> : vector<128x64xf32>
    %58 = tpu.matmul %55, %57, %cst_56 {dimension_numbers = #tpu.dot_dimension_numbers<[1], [0], [0], [1], [0, 0, 1, 1], [], []>} : vector<128x32xbf16>, vector<32x64xbf16>, vector<128x64xf32> -> vector<128x64xf32>
    %59 = arith.addf %52, %58 : vector<128x64xf32>
    %c0_57 = arith.constant 0 : index
    %c0_58 = arith.constant 0 : index
    %c2_59 = arith.constant 2 : index
    %c0_60 = arith.constant 0 : index
    %60 = vector.load %arg6[%c0_57, %c0_58, %c2_59, %c0_60] : memref<2x10x10x32xf32, #tpu.memory_space<vmem>>, vector<2x8x8x32xf32>
    %61 = vector.shape_cast %60 : vector<2x8x8x32xf32> to vector<128x32xf32>
    %62 = arith.truncf %61 : vector<128x32xf32> to vector<128x32xbf16>
    %c2_61 = arith.constant 2 : index
    %c0_62 = arith.constant 0 : index
    %c0_63 = arith.constant 0 : index
    %63 = vector.load %arg3[%c2_61, %c0_62, %c0_63] : memref<9x32x64xbf16, #tpu.memory_space<vmem>>, vector<1x32x64xbf16>
    %64 = vector.shape_cast %63 : vector<1x32x64xbf16> to vector<32x64xbf16>
    %cst_64 = arith.constant dense<0.000000e+00> : vector<128x64xf32>
    %65 = tpu.matmul %62, %64, %cst_64 {dimension_numbers = #tpu.dot_dimension_numbers<[1], [0], [0], [1], [0, 0, 1, 1], [], []>} : vector<128x32xbf16>, vector<32x64xbf16>, vector<128x64xf32> -> vector<128x64xf32>
    %66 = arith.addf %59, %65 : vector<128x64xf32>
    %c0_65 = arith.constant 0 : index
    %c1_66 = arith.constant 1 : index
    %c0_67 = arith.constant 0 : index
    %c0_68 = arith.constant 0 : index
    %67 = vector.load %arg6[%c0_65, %c1_66, %c0_67, %c0_68] : memref<2x10x10x32xf32, #tpu.memory_space<vmem>>, vector<2x8x8x32xf32>
    %68 = vector.shape_cast %67 : vector<2x8x8x32xf32> to vector<128x32xf32>
    %69 = arith.truncf %68 : vector<128x32xf32> to vector<128x32xbf16>
    %c3_69 = arith.constant 3 : index
    %c0_70 = arith.constant 0 : index
    %c0_71 = arith.constant 0 : index
    %70 = vector.load %arg3[%c3_69, %c0_70, %c0_71] : memref<9x32x64xbf16, #tpu.memory_space<vmem>>, vector<1x32x64xbf16>
    %71 = vector.shape_cast %70 : vector<1x32x64xbf16> to vector<32x64xbf16>
    %cst_72 = arith.constant dense<0.000000e+00> : vector<128x64xf32>
    %72 = tpu.matmul %69, %71, %cst_72 {dimension_numbers = #tpu.dot_dimension_numbers<[1], [0], [0], [1], [0, 0, 1, 1], [], []>} : vector<128x32xbf16>, vector<32x64xbf16>, vector<128x64xf32> -> vector<128x64xf32>
    %73 = arith.addf %66, %72 : vector<128x64xf32>
    %c0_73 = arith.constant 0 : index
    %c1_74 = arith.constant 1 : index
    %c1_75 = arith.constant 1 : index
    %c0_76 = arith.constant 0 : index
    %74 = vector.load %arg6[%c0_73, %c1_74, %c1_75, %c0_76] : memref<2x10x10x32xf32, #tpu.memory_space<vmem>>, vector<2x8x8x32xf32>
    %75 = vector.shape_cast %74 : vector<2x8x8x32xf32> to vector<128x32xf32>
    %76 = arith.truncf %75 : vector<128x32xf32> to vector<128x32xbf16>
    %c4 = arith.constant 4 : index
    %c0_77 = arith.constant 0 : index
    %c0_78 = arith.constant 0 : index
    %77 = vector.load %arg3[%c4, %c0_77, %c0_78] : memref<9x32x64xbf16, #tpu.memory_space<vmem>>, vector<1x32x64xbf16>
    %78 = vector.shape_cast %77 : vector<1x32x64xbf16> to vector<32x64xbf16>
    %cst_79 = arith.constant dense<0.000000e+00> : vector<128x64xf32>
    %79 = tpu.matmul %76, %78, %cst_79 {dimension_numbers = #tpu.dot_dimension_numbers<[1], [0], [0], [1], [0, 0, 1, 1], [], []>} : vector<128x32xbf16>, vector<32x64xbf16>, vector<128x64xf32> -> vector<128x64xf32>
    %80 = arith.addf %73, %79 : vector<128x64xf32>
    %c0_80 = arith.constant 0 : index
    %c1_81 = arith.constant 1 : index
    %c2_82 = arith.constant 2 : index
    %c0_83 = arith.constant 0 : index
    %81 = vector.load %arg6[%c0_80, %c1_81, %c2_82, %c0_83] : memref<2x10x10x32xf32, #tpu.memory_space<vmem>>, vector<2x8x8x32xf32>
    %82 = vector.shape_cast %81 : vector<2x8x8x32xf32> to vector<128x32xf32>
    %83 = arith.truncf %82 : vector<128x32xf32> to vector<128x32xbf16>
    %c5 = arith.constant 5 : index
    %c0_84 = arith.constant 0 : index
    %c0_85 = arith.constant 0 : index
    %84 = vector.load %arg3[%c5, %c0_84, %c0_85] : memref<9x32x64xbf16, #tpu.memory_space<vmem>>, vector<1x32x64xbf16>
    %85 = vector.shape_cast %84 : vector<1x32x64xbf16> to vector<32x64xbf16>
    %cst_86 = arith.constant dense<0.000000e+00> : vector<128x64xf32>
    %86 = tpu.matmul %83, %85, %cst_86 {dimension_numbers = #tpu.dot_dimension_numbers<[1], [0], [0], [1], [0, 0, 1, 1], [], []>} : vector<128x32xbf16>, vector<32x64xbf16>, vector<128x64xf32> -> vector<128x64xf32>
    %87 = arith.addf %80, %86 : vector<128x64xf32>
    %c0_87 = arith.constant 0 : index
    %c2_88 = arith.constant 2 : index
    %c0_89 = arith.constant 0 : index
    %c0_90 = arith.constant 0 : index
    %88 = vector.load %arg6[%c0_87, %c2_88, %c0_89, %c0_90] : memref<2x10x10x32xf32, #tpu.memory_space<vmem>>, vector<2x8x8x32xf32>
    %89 = vector.shape_cast %88 : vector<2x8x8x32xf32> to vector<128x32xf32>
    %90 = arith.truncf %89 : vector<128x32xf32> to vector<128x32xbf16>
    %c6 = arith.constant 6 : index
    %c0_91 = arith.constant 0 : index
    %c0_92 = arith.constant 0 : index
    %91 = vector.load %arg3[%c6, %c0_91, %c0_92] : memref<9x32x64xbf16, #tpu.memory_space<vmem>>, vector<1x32x64xbf16>
    %92 = vector.shape_cast %91 : vector<1x32x64xbf16> to vector<32x64xbf16>
    %cst_93 = arith.constant dense<0.000000e+00> : vector<128x64xf32>
    %93 = tpu.matmul %90, %92, %cst_93 {dimension_numbers = #tpu.dot_dimension_numbers<[1], [0], [0], [1], [0, 0, 1, 1], [], []>} : vector<128x32xbf16>, vector<32x64xbf16>, vector<128x64xf32> -> vector<128x64xf32>
    %94 = arith.addf %87, %93 : vector<128x64xf32>
    %c0_94 = arith.constant 0 : index
    %c2_95 = arith.constant 2 : index
    %c1_96 = arith.constant 1 : index
    %c0_97 = arith.constant 0 : index
    %95 = vector.load %arg6[%c0_94, %c2_95, %c1_96, %c0_97] : memref<2x10x10x32xf32, #tpu.memory_space<vmem>>, vector<2x8x8x32xf32>
    %96 = vector.shape_cast %95 : vector<2x8x8x32xf32> to vector<128x32xf32>
    %97 = arith.truncf %96 : vector<128x32xf32> to vector<128x32xbf16>
    %c7 = arith.constant 7 : index
    %c0_98 = arith.constant 0 : index
    %c0_99 = arith.constant 0 : index
    %98 = vector.load %arg3[%c7, %c0_98, %c0_99] : memref<9x32x64xbf16, #tpu.memory_space<vmem>>, vector<1x32x64xbf16>
    %99 = vector.shape_cast %98 : vector<1x32x64xbf16> to vector<32x64xbf16>
    %cst_100 = arith.constant dense<0.000000e+00> : vector<128x64xf32>
    %100 = tpu.matmul %97, %99, %cst_100 {dimension_numbers = #tpu.dot_dimension_numbers<[1], [0], [0], [1], [0, 0, 1, 1], [], []>} : vector<128x32xbf16>, vector<32x64xbf16>, vector<128x64xf32> -> vector<128x64xf32>
    %101 = arith.addf %94, %100 : vector<128x64xf32>
    %c0_101 = arith.constant 0 : index
    %c2_102 = arith.constant 2 : index
    %c2_103 = arith.constant 2 : index
    %c0_104 = arith.constant 0 : index
    %102 = vector.load %arg6[%c0_101, %c2_102, %c2_103, %c0_104] : memref<2x10x10x32xf32, #tpu.memory_space<vmem>>, vector<2x8x8x32xf32>
    %103 = vector.shape_cast %102 : vector<2x8x8x32xf32> to vector<128x32xf32>
    %104 = arith.truncf %103 : vector<128x32xf32> to vector<128x32xbf16>
    %c8 = arith.constant 8 : index
    %c0_105 = arith.constant 0 : index
    %c0_106 = arith.constant 0 : index
    %105 = vector.load %arg3[%c8, %c0_105, %c0_106] : memref<9x32x64xbf16, #tpu.memory_space<vmem>>, vector<1x32x64xbf16>
    %106 = vector.shape_cast %105 : vector<1x32x64xbf16> to vector<32x64xbf16>
    %cst_107 = arith.constant dense<0.000000e+00> : vector<128x64xf32>
    %107 = tpu.matmul %104, %106, %cst_107 {dimension_numbers = #tpu.dot_dimension_numbers<[1], [0], [0], [1], [0, 0, 1, 1], [], []>} : vector<128x32xbf16>, vector<32x64xbf16>, vector<128x64xf32> -> vector<128x64xf32>
    %108 = arith.addf %101, %107 : vector<128x64xf32>
    %c0_108 = arith.constant 0 : index
    %c0_109 = arith.constant 0 : index
    %109 = vector.load %arg4[%c0_108, %c0_109] : memref<1x64xf32, #tpu.memory_space<vmem>>, vector<1x64xf32>
    %110 = vector.broadcast %109 : vector<1x64xf32> to vector<128x64xf32>
    %111 = arith.addf %108, %110 : vector<128x64xf32>
    %cst_110 = arith.constant 0.000000e+00 : f32
    %112 = vector.broadcast %cst_110 : f32 to vector<128x64xf32>
    %113 = arith.maximumf %111, %112 : vector<128x64xf32>
    %114 = vector.extract_strided_slice %113 {offsets = [0, 0], sizes = [128, 16], strides = [1, 1]} : vector<128x64xf32> to vector<128x16xf32>
    %115 = vector.extract_strided_slice %113 {offsets = [0, 16], sizes = [128, 16], strides = [1, 1]} : vector<128x64xf32> to vector<128x16xf32>
    %116 = arith.maximumf %114, %115 : vector<128x16xf32>
    %117 = vector.extract_strided_slice %113 {offsets = [0, 32], sizes = [128, 16], strides = [1, 1]} : vector<128x64xf32> to vector<128x16xf32>
    %118 = vector.extract_strided_slice %113 {offsets = [0, 48], sizes = [128, 16], strides = [1, 1]} : vector<128x64xf32> to vector<128x16xf32>
    %119 = arith.maximumf %117, %118 : vector<128x16xf32>
    %120 = arith.maximumf %116, %119 : vector<128x16xf32>
    %121 = arith.truncf %120 : vector<128x16xf32> to vector<128x16xbf16>
    %c0_111 = arith.constant 0 : index
    %c0_112 = arith.constant 0 : index
    %122 = vector.load %arg5[%c0_111, %c0_112] : memref<128x16xbf16, #tpu.memory_space<vmem>>, vector<128x16xbf16>
    tpu.vector_store %arg5[%c0_111, %c0_112], %121 {strides = array<i32>} : memref<128x16xbf16, #tpu.memory_space<vmem>>, vector<128x16xbf16>,
    return
  }
}

module attributes {stable_mosaic.version = 11 : i64} {
  func.func @mlp_kernel(%arg0: memref<2x1024xbf16, #tpu.memory_space<vmem>>, %arg1: memref<1024x384xbf16, #tpu.memory_space<vmem>>, %arg2: memref<1x384xf32, #tpu.memory_space<vmem>>, %arg3: memref<384x128xbf16, #tpu.memory_space<vmem>>, %arg4: memref<1x128xf32, #tpu.memory_space<vmem>>, %arg5: memref<2x128xf32, #tpu.memory_space<vmem>>) attributes {dimension_semantics = [], scalar_prefetch = 0 : i64, scratch_operands = 0 : i64, tpu.core_type = #tpu.core_type<tc>} {
    %c0 = arith.constant 0 : index
    %c0_0 = arith.constant 0 : index
    %0 = vector.load %arg0[%c0, %c0_0] : memref<2x1024xbf16, #tpu.memory_space<vmem>>, vector<2x1024xbf16>
    %c0_1 = arith.constant 0 : index
    %c0_2 = arith.constant 0 : index
    %1 = vector.load %arg1[%c0_1, %c0_2] : memref<1024x384xbf16, #tpu.memory_space<vmem>>, vector<1024x384xbf16>
    %cst = arith.constant dense<0.000000e+00> : vector<2x384xf32>
    %2 = tpu.matmul %0, %1, %cst {dimension_numbers = #tpu.dot_dimension_numbers<[1], [0], [0], [1], [0, 0, 1, 1], [], []>} : vector<2x1024xbf16>, vector<1024x384xbf16>, vector<2x384xf32> -> vector<2x384xf32>
    %c0_3 = arith.constant 0 : index
    %c0_4 = arith.constant 0 : index
    %3 = vector.load %arg2[%c0_3, %c0_4] : memref<1x384xf32, #tpu.memory_space<vmem>>, vector<1x384xf32>
    %4 = vector.broadcast %3 : vector<1x384xf32> to vector<2x384xf32>
    %5 = arith.addf %2, %4 : vector<2x384xf32>
    %cst_5 = arith.constant 0.000000e+00 : f32
    %6 = vector.broadcast %cst_5 : f32 to vector<2x384xf32>
    %7 = arith.maximumf %5, %6 : vector<2x384xf32>
    %8 = arith.truncf %7 : vector<2x384xf32> to vector<2x384xbf16>
    %c0_6 = arith.constant 0 : index
    %c0_7 = arith.constant 0 : index
    %9 = vector.load %arg3[%c0_6, %c0_7] : memref<384x128xbf16, #tpu.memory_space<vmem>>, vector<384x128xbf16>
    %cst_8 = arith.constant dense<0.000000e+00> : vector<2x128xf32>
    %10 = tpu.matmul %8, %9, %cst_8 {dimension_numbers = #tpu.dot_dimension_numbers<[1], [0], [0], [1], [0, 0, 1, 1], [], []>} : vector<2x384xbf16>, vector<384x128xbf16>, vector<2x128xf32> -> vector<2x128xf32>
    %c0_9 = arith.constant 0 : index
    %c0_10 = arith.constant 0 : index
    %11 = vector.load %arg4[%c0_9, %c0_10] : memref<1x128xf32, #tpu.memory_space<vmem>>, vector<1x128xf32>
    %12 = vector.broadcast %11 : vector<1x128xf32> to vector<2x128xf32>
    %13 = arith.addf %10, %12 : vector<2x128xf32>
    %c0_11 = arith.constant 0 : index
    %c0_12 = arith.constant 0 : index
    %14 = vector.load %arg5[%c0_11, %c0_12] : memref<2x128xf32, #tpu.memory_space<vmem>>, vector<2x128xf32>
    tpu.vector_store %arg5[%c0_11, %c0_12], %13 {strides = array<i32>} : memref<2x128xf32, #tpu.memory_space<vmem>>, vector<2x128xf32>,
    return
  }
}

</mosaic_0001>

<bundles_post_ra>
// kernel: forward.2
= control target key start
LH: loop header
LB: loop body
LE: loop exit
PB: predicated region body
PF: predicated region fallthrough
CT: control target
= control target key end

     0   :  { %vm100_vm0 = vcmask 392192   ;;  %s2599_s13 = smov 96   ;;  %vm738_vm1 = vcmask 261120   ;;  %vm740_vm2 = vcmask 254976   ;;  %vm2147_vm3 = vcmask 125952   ;;  %s3980_s1 = inlined_call_operand.vmem [shape: bf16[4,48,128], index: 1, kind: input, shape index: {}]   ;;  %s3981_s0 = inlined_call_operand.vmem [shape: f32[2,9,9,48], index: 0, kind: input, shape index: {}]   ;;  %s3982_s2 = inlined_call_operand.vmem [shape: f32[1,128], index: 2, kind: input, shape index: {}]   ;;  %s3983_s3 = inlined_call_operand.vmem [shape: bf16[9,32,64], index: 3, kind: input, shape index: {}]   ;;  %s3984_s4 = inlined_call_operand.vmem [shape: f32[1,64], index: 4, kind: input, shape index: {}]   ;;  %s3985_s5 = inlined_call_operand.vmem [shape: bf16[128,16], index: 5, kind: output, shape index: {}]  }
   0x1   :  { %v2479_v0 = vld [vmem:[%s3980_s1 + $0x28] sm:$0xff]  ;;  %v2478_v1 = vld [vmem:[%s3980_s1 + $0x20] sm:$0xff]  ;;  %v2477_v2 = vld [vmem:[%s3980_s1 + $0x18] sm:$0xff] }
   0x2   :  { %2504 = vmatpush.bf16.msra.mxu1 %v2479_v0  ;;  %2505 = vmatpush.bf16.msra.mxu2 %v2479_v0  ;;  %v2645_v3 = vld [vmem:[%s3981_s0 + $0x41] sm:$0xff]  ;;  %v2650_v4 = vld [vmem:[%s3981_s0 + $0x51] sm:$0xff] }
   0x3   :  { %2506 = vmatpush.bf16.msra.mxu3 %v2479_v0  ;;  %130 = vmatpush.bf16.msra.mxu0 %v2479_v0  ;;  %v59_v5 = vld [vmem:[%s3981_s0 + $0x91] sm:$0xff]  ;;  %v2658_v6 = vld [vmem:[%s3981_s0 + $0xa1] sm:$0xff]  ;;  %v69_v12 = vpack.c.bf16 %v2650_v4, %v2645_v3 }
   0x4   :  { %v2663_v7 = vld [vmem:[%s3981_s0 + $0xd1] sm:$0xff]  ;;  %v2668_v8 = vld [vmem:[%s3981_s0 + $0xe1] sm:$0xff]  ;;  %v71_v13 = vpack.c.bf16 %v2658_v6, %v59_v5 }
   0x5   :  { %v2482_v9 = vld [vmem:[%s3980_s1 + $0x40] sm:$0xff]  ;;  %v2485_v10 = vld [vmem:[%s3980_s1 + $0x58] sm:$0xff]  ;;  %v2476_v11 = vld [vmem:[%s3980_s1 + $0x10] sm:$0xff]  ;;  %v73_v14 = vpack.c.bf16 %v2668_v8, %v2663_v7 }
   0x6   :  { %2507 = vmatpush.bf16.msra.mxu1 %v2478_v1  ;;  %2508 = vmatpush.bf16.msra.mxu2 %v2478_v1  ;;  %v51_v15 = vld [vmem:[%s3981_s0 + $0x1] sm:$0xff]  ;;  %v52_v16 = vld [vmem:[%s3981_s0 + $0x11] sm:$0xff] }
   0x7   :  { %2509 = vmatpush.bf16.msra.mxu3 %v2478_v1  ;;  %131 = vmatpush.bf16.msra.mxu0 %v2478_v1  ;;  %v2481_v17 = vld [vmem:[%s3980_s1 + $0x38] sm:$0xff]  ;;  %v2484_v18 = vld [vmem:[%s3980_s1 + $0x50] sm:$0xff]  ;;  %v2475_v19 = vld [vmem:[%s3980_s1 + $0x8] sm:$0xff]  ;;  %v67_v20 = vpack.c.bf16 %v52_v16, %v51_v15 }
   0x8   :  { %v2480_v21 = vld [vmem:[%s3980_s1 + $0x30] sm:$0xff]  ;;  %v2483_v22 = vld [vmem:[%s3980_s1 + $0x48] sm:$0xff]  ;;  %v2474_v23 = vld [vmem:[%s3980_s1] sm:$0xff] }
   0x9   :  { %v57_v24 = vld [vmem:[%s3981_s0 + $0x61] sm:$0xff]  ;;  %v58_v25 = vld [vmem:[%s3981_s0 + $0x71] sm:$0xff] }
   0xa   :  { %2510 = vmatpush.bf16.msra.mxu1 %v2477_v2  ;;  %2511 = vmatpush.bf16.msra.mxu2 %v2477_v2  ;;  %v61_v26 = vld [vmem:[%s3981_s0 + $0xb1] sm:$0xff]  ;;  %v2724_v27 = vld [vmem:[%s3981_s0 + $0xc1] sm:$0xff]  ;;  %v70_v30 = vpack.c.bf16 %v58_v25, %v57_v24  ;;  %v422_v51 = vpack.c.bf16 %v57_v24, %v2650_v4 }
   0xb   :  { %2512 = vmatpush.bf16.msra.mxu3 %v2477_v2  ;;  %132 = vmatpush.bf16.msra.mxu0 %v2477_v2  ;;  %v2729_v28 = vld [vmem:[%s3981_s0 + $0xf1] sm:$0xff]  ;;  %v2734_v29 = vld [vmem:[%s3981_s0 + $0x101] sm:$0xff]  ;;  %v72_v31 = vpack.c.bf16 %v2724_v27, %v61_v26  ;;  %v424_v63 = vpack.c.bf16 %v61_v26, %v2658_v6  ;;  %v425_v4 = vpack.c.bf16 %v2663_v7, %v2724_v27 }
   0xc   :  { %v74_v32 = vpack.c.bf16 %v2734_v29, %v2729_v28  ;;  %v54_v33 = vld [vmem:[%s3981_s0 + $0x31] sm:$0xff]  ;;  %v2257_v34 = vld [vmem:[%s3981_s0 + $0x21] sm:$0xff]  ;;  %v426_v7 = vpack.c.bf16 %v2729_v28, %v2668_v8 }
   0xd   :  { %2188 = vmatmul.msk.bf16.vlgmr.msra.gmra.mxu1 %vm100_vm0, %v69_v12  ;;  %2190 = vmatmul.msk.bf16.vlgmr.msra.gmra.mxu2 %vm100_vm0, %v71_v13  ;;  %v68_v35 = vpack.c.bf16 %v54_v33, %v2257_v34  ;;  %v21_v36 = vld [vmem:[%s3981_s0] sm:$0xff]  ;;  %v22_v37 = vld [vmem:[%s3981_s0 + $0x10] sm:$0xff]  ;;  %v420_v41 = vpack.c.bf16 %v2257_v34, %v52_v16  ;;  %v421_v46 = vpack.c.bf16 %v2645_v3, %v54_v33 }
   0xe   :  { %344 = vmatpush.bf16.msrb.mxu2 %v2482_v9  ;;  %221 = vmatpush.bf16.msrb.mxu1 %v2476_v11  ;;  %v2215_v38 = vld [vmem:[%s3981_s0 + $0x20] sm:$0xff]  ;;  %v37_v39 = vpack.c.bf16 %v22_v37, %v21_v36  ;;  %v24_v42 = vld [vmem:[%s3981_s0 + $0x30] sm:$0xff] }
   0xf   :  { %482 = vmatpush.bf16.msrb.mxu3 %v2485_v10  ;;  %2186 = vmatmul.msk.bf16.vlgmr.msra.gmra.mxu0 %vm100_vm0, %v67_v20  ;;  %v282_v40 = vpack.c.bf16 %v2215_v38, %v22_v37  ;;  %v2217_v43 = vld [vmem:[%s3981_s0 + $0x40] sm:$0xff]  ;;  %v38_v44 = vpack.c.bf16 %v24_v42, %v2215_v38  ;;  %v26_v47 = vld [vmem:[%s3981_s0 + $0x50] sm:$0xff] }
  0x10   :  { %2192 = vmatmul.msk.bf16.vlgmr.msra.gmra.mxu3 %vm100_vm0, %v73_v14  ;;  %v283_v45 = vpack.c.bf16 %v2217_v43, %v24_v42  ;;  %v2219_v48 = vld [vmem:[%s3981_s0 + $0x60] sm:$0xff]  ;;  %v39_v49 = vpack.c.bf16 %v26_v47, %v2217_v43  ;;  %v28_v52 = vld [vmem:[%s3981_s0 + $0x70] sm:$0xff] }
  0x11   :  { %v284_v50 = vpack.c.bf16 %v2219_v48, %v26_v47  ;;  %v2221_v53 = vld [vmem:[%s3981_s0 + $0x80] sm:$0xff]  ;;  %v40_v55 = vpack.c.bf16 %v28_v52, %v2219_v48  ;;  %v29_v58 = vld [vmem:[%s3981_s0 + $0x90] sm:$0xff] }
  0x12   :  { %345 = vmatpush.bf16.msrb.mxu2 %v2481_v17  ;;  %222 = vmatpush.bf16.msrb.mxu1 %v2475_v19  ;;  %v2263_v54 = vld [vmem:[%s3981_s0 + $0x81] sm:$0xff]  ;;  %v285_v56 = vpack.c.bf16 %v2221_v53, %v28_v52  ;;  %v2223_v60 = vld [vmem:[%s3981_s0 + $0xb0] sm:$0xff] }
  0x13   :  { %483 = vmatpush.bf16.msrb.mxu3 %v2484_v18  ;;  %v423_v57 = vpack.c.bf16 %v2263_v54, %v58_v25  ;;  %v30_v59 = vld [vmem:[%s3981_s0 + $0xa0] sm:$0xff]  ;;  %v2225_v1 = vld [vmem:[%s3981_s0 + $0xd0] sm:$0xff] }
  0x14   :  { %v41_v61 = vpack.c.bf16 %v30_v59, %v29_v58  ;;  %v286_v62 = vpack.c.bf16 %v2223_v60, %v30_v59  ;;  %v32_v0 = vld [vmem:[%s3981_s0 + $0xc0] sm:$0xff]  ;;  %v2227_v6 = vld [vmem:[%s3981_s0 + $0xf0] sm:$0xff] }
  0x15   :  { %v42_v2 = vpack.c.bf16 %v32_v0, %v2223_v60  ;;  %v287_v3 = vpack.c.bf16 %v2225_v1, %v32_v0  ;;  %v34_v5 = vld [vmem:[%s3981_s0 + $0xe0] sm:$0xff]  ;;  %v2229_v8 = vld [vmem:[%s3981_s0 + $0x110] sm:$0xff] }
  0x16   :  { %346 = vmatpush.bf16.msrb.mxu2 %v2480_v21  ;;  %223 = vmatpush.bf16.msrb.mxu1 %v2474_v23  ;;  %v43_v9 = vpack.c.bf16 %v34_v5, %v2225_v1  ;;  %v288_v10 = vpack.c.bf16 %v2227_v6, %v34_v5  ;;  %v36_v15 = vld [vmem:[%s3981_s0 + $0x100] sm:$0xff]  ;;  %v2271_v16 = vld [vmem:[%s3981_s0 + $0x111] sm:$0xff] }
  0x17   :  { %484 = vmatpush.bf16.msrb.mxu3 %v2483_v22  ;;  %v44_v19 = vpack.c.bf16 %v36_v15, %v2227_v6  ;;  %v289_v20 = vpack.c.bf16 %v2229_v8, %v36_v15  ;;  %v427_v22 = vpack.c.bf16 %v2271_v16, %v2734_v29 }
  0x1d   :  { %2189 = vmatmul.msk.bf16.gmra.mxu1 %vm100_vm0, %v70_v30  ;;  %2191 = vmatmul.msk.bf16.gmra.mxu2 %vm100_vm0, %v72_v31 }
  0x1f   :  { %2187 = vmatmul.msk.bf16.gmra.mxu0 %vm100_vm0, %v68_v35  ;;  %v2868_v35 = vld [vmem:[%s3982_s2] ss:$0 sm:$0xff]  ;;  %s2600_s2 = smov 64  }
  0x20   :  { %2193 = vmatmul.msk.bf16.gmra.mxu3 %vm100_vm0, %v74_v32 }
  0x2d   :  { %2206 = vmatmul.msk.bf16.vlgmr.msrb.gmra.mxu1 %vm100_vm0, %v37_v39  ;;  %2248 = vmatmul.msk.bf16.vlgmr.msrb.gmra.mxu2 %vm100_vm0, %v282_v40 }
  0x30   :  { %2290 = vmatmul.msk.bf16.vlgmr.msrb.gmra.mxu3 %vm100_vm0, %v420_v41 }
  0x3d   :  { %2207 = vmatmul.msk.bf16.gmra.mxu1 %vm100_vm0, %v38_v44  ;;  %2249 = vmatmul.msk.bf16.gmra.mxu2 %vm100_vm0, %v283_v45 }
  0x40   :  { %2291 = vmatmul.msk.bf16.gmra.mxu3 %vm100_vm0, %v421_v46 }
  0x4d   :  { %2208 = vmatmul.msk.bf16.gmra.mxu1 %vm100_vm0, %v39_v49  ;;  %2250 = vmatmul.msk.bf16.gmra.mxu2 %vm100_vm0, %v284_v50 }
  0x50   :  { %2292 = vmatmul.msk.bf16.gmra.mxu3 %vm100_vm0, %v422_v51 }
  0x5d   :  { %2209 = vmatmul.msk.bf16.gmra.mxu1 %vm100_vm0, %v40_v55  ;;  %2251 = vmatmul.msk.bf16.gmra.mxu2 %vm100_vm0, %v285_v56 }
  0x60   :  { %2293 = vmatmul.msk.bf16.gmra.mxu3 %vm100_vm0, %v423_v57 }
  0x6d   :  { %2210 = vmatmul.msk.bf16.gmra.mxu1 %vm100_vm0, %v41_v61  ;;  %2252 = vmatmul.msk.bf16.gmra.mxu2 %vm100_vm0, %v286_v62 }
  0x70   :  { %2294 = vmatmul.msk.bf16.gmra.mxu3 %vm100_vm0, %v424_v63 }
  0x7d   :  { %2211 = vmatmul.msk.bf16.gmra.mxu1 %vm100_vm0, %v42_v2  ;;  %2253 = vmatmul.msk.bf16.gmra.mxu2 %vm100_vm0, %v287_v3 }
  0x80   :  { %2295 = vmatmul.msk.bf16.gmra.mxu3 %vm100_vm0, %v425_v4 }
  0x8a   :  { %v2823_v11 = vpop.f32.mrf.mxu1 }
  0x8c   :  { %v134_v26 = vpop.f32.mrf.mxu0 }
  0x8d   :  { %2212 = vmatmul.msk.bf16.gmra.mxu1 %vm100_vm0, %v43_v9  ;;  %2254 = vmatmul.msk.bf16.gmra.mxu2 %vm100_vm0, %v288_v10 }
  0x90   :  { %2296 = vmatmul.msk.bf16.gmra.mxu3 %vm100_vm0, %v426_v7  ;;  %v2830_v12 = vpop.f32.mrf.mxu2 }
  0x92   :  { %v2834_v14 = vpop.f32.mrf.mxu1 }
  0x93   :  { %v2832_v13 = vpop.f32.mrf.mxu3 }
  0x94   :  { %v136_v32 = vpop.f32.mrf.mxu0 }
  0x98   :  { %v2845_v17 = vpop.f32.mrf.mxu2 }
  0x9a   :  { %v2849_v21 = vpop.f32.mrf.mxu1 }
  0x9b   :  { %v2847_v18 = vpop.f32.mrf.mxu3 }
  0x9c   :  { %v139_v44 = vpop.f32.mrf.mxu0 }
  0x9d   :  { %2213 = vmatmul.msk.bf16.gmra.mxu1 %vm100_vm0, %v44_v19  ;;  %2255 = vmatmul.msk.bf16.gmra.mxu2 %vm100_vm0, %v289_v20 }
  0xa0   :  { %2297 = vmatmul.msk.bf16.gmra.mxu3 %vm100_vm0, %v427_v22  ;;  %v2855_v23 = vpop.f32.mrf.mxu2 }
  0xa2   :  { %v2859_v25 = vpop.f32.mrf.mxu1 }
  0xa3   :  { %v2857_v24 = vpop.f32.mrf.mxu3 }
  0xa4   :  { %v141_v55 = vpop.f32.mrf.mxu0 }
  0xa8   :  { %v2861_v27 = vpop.f32.mrf.mxu2 }
  0xaa   :  { %v225_v30 = vpop.f32.mrf.mxu1 }
  0xab   :  { %v2863_v28 = vpop.f32.mrf.mxu3  ;;  %v226_v31 = vadd.f32 %v225_v30, %v134_v26 }
  0xb0   :  { %v348_v29 = vpop.f32.mrf.mxu2 }
  0xb1   :  { %v388_v33 = vadd.f32 %v348_v29, %v226_v31 }
  0xb2   :  { %v227_v36 = vpop.f32.mrf.mxu1 }
  0xb3   :  { %v486_v34 = vpop.f32.mrf.mxu3  ;;  %v228_v39 = vadd.f32 %v227_v36, %v136_v32 }
  0xb4   :  { %v526_v37 = vadd.f32 %v486_v34, %v388_v33 }
  0xb6   :  { %v2871_v38 = vadd.f32 %v2868_v35, %v526_v37 }
  0xb8   :  { %v562_v40 = vmax.f32 %v2871_v38, 0.0  ;;  %v350_v41 = vpop.f32.mrf.mxu2 }
  0xb9   :  { %v389_v42 = vadd.f32 %v350_v41, %v228_v39 }
  0xba   :  { %594 = vrot.lane.b32.xlu0 %v562_v40, %s2599_s13  ;;  %v230_v45 = vpop.f32.mrf.mxu1 }
  0xbb   :  { %v488_v43 = vpop.f32.mrf.mxu3  ;;  %v231_v48 = vadd.f32 %v230_v45, %v139_v44 }
  0xbc   :  { %v527_v46 = vadd.f32 %v488_v43, %v389_v42 }
  0xbe   :  { %v2878_v47 = vadd.f32 %v2868_v35, %v527_v46 }
  0xc0   :  { %v563_v49 = vmax.f32 %v2878_v47, 0.0  ;;  %v353_v50 = vpop.f32.mrf.mxu2 }
  0xc1   :  { %v390_v51 = vadd.f32 %v353_v50, %v231_v48 }
  0xc2   :  { %596 = vrot.lane.b32.xlu0 %v563_v49, %s2599_s13  ;;  %v232_v53 = vpop.f32.mrf.mxu1 }
  0xc3   :  { %v491_v52 = vpop.f32.mrf.mxu3  ;;  %v233_v57 = vadd.f32 %v232_v53, %v141_v55 }
  0xc4   :  { %v528_v54 = vadd.f32 %v491_v52, %v390_v51 }
  0xc6   :  { %v2885_v56 = vadd.f32 %v2868_v35, %v528_v54 }
  0xc8   :  { %v564_v58 = vmax.f32 %v2885_v56, 0.0  ;;  %v355_v59 = vpop.f32.mrf.mxu2 }
  0xc9   :  { %v391_v60 = vadd.f32 %v355_v59, %v233_v57 }
  0xca   :  { %598 = vrot.lane.b32.xlu1 %v564_v58, %s2599_s13  ;;  %v235_v62 = vpop.f32.mrf.mxu1 }
  0xcb   :  { %v493_v61 = vpop.f32.mrf.mxu3  ;;  %v236_v1 = vadd.f32 %v235_v62, %v2823_v11 }
  0xcc   :  { %v529_v63 = vadd.f32 %v493_v61, %v391_v60 }
  0xce   :  { %v2892_v0 = vadd.f32 %v2868_v35, %v529_v63 }
  0xd0   :  { %v565_v2 = vmax.f32 %v2892_v0, 0.0  ;;  %v358_v3 = vpop.f32.mrf.mxu2 }
  0xd1   :  { %v392_v4 = vadd.f32 %v358_v3, %v236_v1 }
  0xd2   :  { %600 = vrot.lane.b32.xlu1 %v565_v2, %s2599_s13  ;;  %v237_v6 = vpop.f32.mrf.mxu1 }
  0xd3   :  { %v496_v5 = vpop.f32.mrf.mxu3  ;;  %v238_v7 = vadd.f32 %v237_v6, %v2834_v14 }
  0xd4   :  { %v530_v9 = vadd.f32 %v496_v5, %v392_v4 }
  0xd6   :  { %v2900_v10 = vadd.f32 %v2868_v35, %v530_v9 }
  0xd8   :  { %v566_v15 = vmax.f32 %v2900_v10, 0.0  ;;  %v360_v8 = vpop.f32.mrf.mxu2 }
  0xd9   :  { %v393_v11 = vadd.f32 %v360_v8, %v238_v7 }
  0xda   :  { %602 = vrot.lane.b32.xlu2 %v566_v15, %s2599_s13  ;;  %v240_v19 = vpop.f32.mrf.mxu1 }
  0xdb   :  { %v498_v16 = vpop.f32.mrf.mxu3  ;;  %v241_v26 = vadd.f32 %v240_v19, %v2849_v21 }
  0xdc   :  { %v531_v20 = vadd.f32 %v498_v16, %v393_v11 }
  0xde   :  { %v2906_v22 = vadd.f32 %v2868_v35, %v531_v20 }
  0xe0   :  { %v567_v30 = vmax.f32 %v2906_v22, 0.0  ;;  %v363_v31 = vpop.f32.mrf.mxu2 }
  0xe1   :  { %v394_v29 = vadd.f32 %v363_v31, %v241_v26 }
  0xe2   :  { %604 = vrot.lane.b32.xlu0 %v567_v30, %s2599_s13  ;;  %v2913_v32 = vpop.f32.mrf.mxu1 }
  0xe3   :  { %v501_v14 = vpop.f32.mrf.mxu3 }
  0xe4   :  { %v532_v33 = vadd.f32 %v501_v14, %v394_v29 }
  0xe6   :  { %v2916_v34 = vadd.f32 %v2868_v35, %v532_v33 }
  0xe8   :  { %v568_v36 = vmax.f32 %v2916_v34, 0.0  ;;  %v2919_v37 = vpop.f32.mrf.mxu2 }
  0xea   :  { %606 = vrot.lane.b32.xlu1 %v568_v36, %s2599_s13  ;;  %v245_v39 = vpop.f32.mrf.mxu1 }
  0xeb   :  { %v2924_v21 = vpop.f32.mrf.mxu3  ;;  %v246_v41 = vadd.f32 %v245_v39, %v2830_v12 }
  0xf0   :  { %v368_v42 = vpop.f32.mrf.mxu2 }
  0xf1   :  { %v396_v43 = vadd.f32 %v368_v42, %v246_v41 }
  0xf2   :  { %v247_v46 = vpop.f32.mrf.mxu1 }
  0xf3   :  { %v506_v44 = vpop.f32.mrf.mxu3  ;;  %v248_v50 = vadd.f32 %v247_v46, %v2845_v17  ;;  %v2601_v46 = vmov 0.0  }
  0xf4   :  { %v534_v45 = vadd.f32 %v506_v44, %v396_v43  ;;  %742 = vst.msk [vmem:[#allocation2 + $0x10] sm:$0xff] %vm738_vm1, %v2601_v46 }
  0xf5   :  { %743 = vst.msk [vmem:[#allocation2 + $0x18] sm:$0x3] %vm740_vm2, %v2601_v46 }
  0xf6   :  { %v2928_v48 = vadd.f32 %v2868_v35, %v534_v45  ;;  %739 = vst.msk [vmem:[#allocation2] sm:$0xff] %vm738_vm1, %v2601_v46 }
  0xf7   :  { %741 = vst.msk [vmem:[#allocation2 + $0x8] sm:$0x3] %vm740_vm2, %v2601_v46 }
  0xf8   :  { %v570_v51 = vmax.f32 %v2928_v48, 0.0  ;;  %v370_v52 = vpop.f32.mrf.mxu2  ;;  %744 = vst.msk [vmem:[#allocation2 + $0x20] sm:$0xff] %vm738_vm1, %v2601_v46  ;;  %v2488_v48 = vld [vmem:[%s3983_s3 + $0x10] sm:$0xff] }
  0xf9   :  { %v397_v53 = vadd.f32 %v370_v52, %v248_v50  ;;  %745 = vst.msk [vmem:[#allocation2 + $0x28] sm:$0x3] %vm740_vm2, %v2601_v46 }
  0xfa   :  { %610 = vrot.lane.b32.xlu1 %v570_v51, %s2599_s13  ;;  %v250_v59 = vpop.f32.mrf.mxu1  ;;  %746 = vst.msk [vmem:[#allocation2 + $0x30] sm:$0xff] %vm738_vm1, %v2601_v46 }
  0xfb   :  { %v508_v54 = vpop.f32.mrf.mxu3  ;;  %v251_v6 = vadd.f32 %v250_v59, %v2855_v23  ;;  %747 = vst.msk [vmem:[#allocation2 + $0x38] sm:$0x3] %vm740_vm2, %v2601_v46 }
  0xfc   :  { %v535_v12 = vadd.f32 %v508_v54, %v397_v53  ;;  %748 = vst.msk [vmem:[#allocation2 + $0x40] sm:$0xff] %vm738_vm1, %v2601_v46 }
  0xfd   :  { %749 = vst.msk [vmem:[#allocation2 + $0x48] sm:$0x3] %vm740_vm2, %v2601_v46 }
  0xfe   :  { %v2936_v55 = vadd.f32 %v2868_v35, %v535_v12  ;;  %750 = vst.msk [vmem:[#allocation2 + $0x50] sm:$0xff] %vm738_vm1, %v2601_v46 }
  0xff   :  { %751 = vst.msk [vmem:[#allocation2 + $0x58] sm:$0x3] %vm740_vm2, %v2601_v46 }
 0x100   :  { %v571_v57 = vmax.f32 %v2936_v55, 0.0  ;;  %v373_v61 = vpop.f32.mrf.mxu2  ;;  %752 = vst.msk [vmem:[#allocation2 + $0x60] sm:$0xff] %vm738_vm1, %v2601_v46  ;;  %v2492_v55 = vld [vmem:[%s3983_s3 + $0x30] sm:$0xff] }
 0x101   :  { %v398_v9 = vadd.f32 %v373_v61, %v251_v6  ;;  %753 = vst.msk [vmem:[#allocation2 + $0x68] sm:$0x3] %vm740_vm2, %v2601_v46  ;;  %v2489_v61 = vld [vmem:[%s3983_s3 + $0x18] sm:$0xff] }
 0x102   :  { %612 = vrot.lane.b32.xlu1 %v571_v57, %s2599_s13  ;;  %v252_v3 = vpop.f32.mrf.mxu1  ;;  %754 = vst.msk [vmem:[#allocation2 + $0x70] sm:$0xff] %vm738_vm1, %v2601_v46  ;;  %896 = vmatpush.bf16.msrb.mxu0 %v2489_v61  ;;  %v2493_v6 = vld [vmem:[%s3983_s3 + $0x38] sm:$0xff] }
 0x103   :  { %v511_v62 = vpop.f32.mrf.mxu3  ;;  %v253_v56 = vadd.f32 %v252_v3, %v2861_v27  ;;  %755 = vst.msk [vmem:[#allocation2 + $0x78] sm:$0x3] %vm740_vm2, %v2601_v46  ;;  %1225 = vmatpush.bf16.msra.mxu3 %v2493_v6 }
 0x104   :  { %v536_v8 = vadd.f32 %v511_v62, %v398_v9  ;;  %756 = vst.msk [vmem:[#allocation2 + $0x80] sm:$0xff] %vm738_vm1, %v2601_v46  ;;  %v2487_v62 = vld [vmem:[%s3983_s3 + $0x8] sm:$0xff] }
 0x105   :  { %757 = vst.msk [vmem:[#allocation2 + $0x88] sm:$0x3] %vm740_vm2, %v2601_v46  ;;  %981 = vmatpush.bf16.msra.mxu1 %v2487_v62 }
 0x106   :  { %v2973_v23 = vadd.f32 %v2868_v35, %v536_v8  ;;  %758 = vst.msk [vmem:[#allocation2 + $0x90] sm:$0xff] %vm738_vm1, %v2601_v46  ;;  %897 = vmatpush.bf16.msrb.mxu0 %v2488_v48 }
 0x107   :  { %759 = vst.msk [vmem:[#allocation2 + $0x98] sm:$0x3] %vm740_vm2, %v2601_v46  ;;  %1226 = vmatpush.bf16.msra.mxu3 %v2492_v55 }
 0x108   :  { %v375_v4 = vpop.f32.mrf.mxu2  ;;  %760 = vst.msk [vmem:[#allocation2 + $0xa0] sm:$0xff] %vm738_vm1, %v2601_v46 }
 0x109   :  { %v399_v19 = vadd.f32 %v375_v4, %v253_v56  ;;  %761 = vst.msk [vmem:[#allocation2 + $0xa8] sm:$0x3] %vm740_vm2, %v2601_v46  ;;  %v2490_v4 = vld [vmem:[%s3983_s3 + $0x20] sm:$0xff] }
 0x10a   :  { %v255_v47 = vpop.f32.mrf.mxu1  ;;  %762 = vst.msk [vmem:[#allocation2 + $0xb0] sm:$0xff] %vm738_vm1, %v2601_v46 }
 0x10b   :  { %v513_v38 = vpop.f32.mrf.mxu3  ;;  %v256_v27 = vadd.f32 %v255_v47, %v2832_v13  ;;  %763 = vst.msk [vmem:[#allocation2 + $0xb8] sm:$0x3] %vm740_vm2, %v2601_v46 }
 0x10c   :  { %v537_v26 = vadd.f32 %v513_v38, %v399_v19  ;;  %764 = vst.msk [vmem:[#allocation2 + $0xc0] sm:$0xff] %vm738_vm1, %v2601_v46 }
 0x10d   :  { %765 = vst.msk [vmem:[#allocation2 + $0xc8] sm:$0x3] %vm740_vm2, %v2601_v46 }
 0x10e   :  { %v2982_v31 = vadd.f32 %v2868_v35, %v537_v26  ;;  %766 = vst.msk [vmem:[#allocation2 + $0xd0] sm:$0xff] %vm738_vm1, %v2601_v46 }
 0x10f   :  { %767 = vst.msk [vmem:[#allocation2 + $0xd8] sm:$0x3] %vm740_vm2, %v2601_v46 }
 0x110   :  { %v378_v10 = vpop.f32.mrf.mxu2  ;;  %768 = vst.msk [vmem:[#allocation2 + $0xe0] sm:$0xff] %vm738_vm1, %v2601_v46 }
 0x111   :  { %v400_v33 = vadd.f32 %v378_v10, %v256_v27  ;;  %769 = vst.msk [vmem:[#allocation2 + $0xe8] sm:$0x3] %vm740_vm2, %v2601_v46  ;;  %v797_v10 = vld [vmem:[#allocation2] sm:$0xff] }
 0x112   :  { %v257_v20 = vpop.f32.mrf.mxu1  ;;  %770 = vst.msk [vmem:[#allocation2 + $0xf0] sm:$0xff] %vm738_vm1, %v2601_v46 }
 0x113   :  { %771 = vst.msk [vmem:[#allocation2 + $0xf8] sm:$0x3] %vm740_vm2, %v2601_v46 }
 0x114   :  { %772 = vst.msk [vmem:[#allocation2 + $0x100] sm:$0xff] %vm738_vm1, %v2601_v46 }
 0x115   :  { %773 = vst.msk [vmem:[#allocation2 + $0x108] sm:$0x3] %vm740_vm2, %v2601_v46 }
 0x116   :  { %774 = vst.msk [vmem:[#allocation2 + $0x110] sm:$0xff] %vm738_vm1, %v2601_v46 }
 0x117   :  { %775 = vst.msk [vmem:[#allocation2 + $0x118] sm:$0x3] %vm740_vm2, %v2601_v46 }
 0x118   :  { %v380_v0 = vpop.f32.mrf.mxu2  ;;  %776 = vst.msk [vmem:[#allocation2 + $0x120] sm:$0xff] %vm738_vm1, %v2601_v46 }
 0x119   :  { %777 = vst.msk [vmem:[#allocation2 + $0x128] sm:$0x3] %vm740_vm2, %v2601_v46 }
 0x11a   :  { %v260_v41 = vpop.f32.mrf.mxu1  ;;  %778 = vst.msk [vmem:[#allocation2 + $0x130] sm:$0xff] %vm738_vm1, %v2601_v46 }
 0x11b   :  { %v261_v13 = vadd.f32 %v260_v41, %v2857_v24  ;;  %779 = vst.msk [vmem:[#allocation2 + $0x138] sm:$0x3] %vm740_vm2, %v2601_v46 }
 0x120   :  { %v383_v45 = vpop.f32.mrf.mxu2 }
 0x121   :  { %v402_v50 = vadd.f32 %v383_v45, %v261_v13 }
 0x12c   :  { %v595_v17 = vpop.permute.xlu0 %594 }
 0x12d   :  { %v2944_v60 = vmax.f32 %v562_v40, %v595_v17 }
 0x12f   :  { %674 = vrot.lane.b32.xlu2 %v2944_v60, %s2600_s2 }
 0x134   :  { %v597_v63 = vpop.permute.xlu0 %596 }
 0x135   :  { %v2950_v1 = vmax.f32 %v563_v49, %v597_v63  ;;  %v603_v49 = vpop.permute.xlu2 %602  ;;  %v2491_v63 = vld [vmem:[%s3983_s3 + $0x28] sm:$0xff] }
 0x136   :  { %v2961_v11 = vmax.f32 %v566_v15, %v603_v49  ;;  %v572_v15 = vmax.f32 %v2973_v23, 0.0  ;;  %1095 = vmatpush.bf16.msra.mxu2 %v2491_v63  ;;  %v825_v49 = vld [vmem:[#allocation2 + $0x1] sm:$0xff] }
 0x137   :  { %676 = vrot.lane.b32.xlu2 %v2950_v1, %s2600_s2 }
 0x13a   :  { %1096 = vmatpush.bf16.msra.mxu2 %v2490_v4 }
 0x13c   :  { %v599_v5 = vpop.permute.xlu1 %598 }
 0x13d   :  { %v2956_v40 = vmax.f32 %v564_v58, %v599_v5  ;;  %v516_v58 = vpop.f32.mrf.mxu3 }
 0x13e   :  { %v538_v44 = vadd.f32 %v516_v58, %v400_v33 }
 0x13f   :  { %678 = vrot.lane.b32.xlu0 %v2956_v40, %s2600_s2 }
 0x144   :  { %v601_v7 = vpop.permute.xlu1 %600 }
 0x145   :  { %v2965_v16 = vmax.f32 %v565_v2, %v601_v7  ;;  %v258_v2 = vadd.f32 %v257_v20, %v2847_v18  ;;  %v518_v14 = vpop.f32.mrf.mxu3  ;;  %v573_v18 = vmax.f32 %v2982_v31, 0.0  ;;  %v1024_v7 = vld [vmem:[#allocation2 + $0x2] sm:$0xff] }
 0x147   :  { %682 = vrot.lane.b32.xlu0 %v2961_v11, %s2600_s2  ;;  %680 = vrot.lane.b32.xlu2 %v2965_v16, %s2600_s2  ;;  %v401_v29 = vadd.f32 %v380_v0, %v258_v2 }
 0x149   :  { %v539_v42 = vadd.f32 %v518_v14, %v401_v29 }
 0x14b   :  { %v2998_v22 = vadd.f32 %v2868_v35, %v539_v42 }
 0x14d   :  { %v521_v52 = vpop.f32.mrf.mxu3  ;;  %v575_v54 = vmax.f32 %v2998_v22, 0.0 }
 0x14e   :  { %v540_v17 = vadd.f32 %v521_v52, %v402_v50 }
 0x14f   :  { %614 = vrot.lane.b32.xlu2 %v572_v15, %s2599_s13 }
 0x150   :  { %v3036_v34 = vadd.f32 %v2868_v35, %v540_v17 }
 0x154   :  { %v605_v39 = vpop.permute.xlu0 %604 }
 0x155   :  { %v2986_v43 = vmax.f32 %v567_v30, %v605_v39  ;;  %v3003_v30 = vadd.f32 %v2868_v35, %v538_v44 }
 0x157   :  { %616 = vrot.lane.b32.xlu2 %v573_v18, %s2599_s13  ;;  %684 = vrot.lane.b32.xlu0 %v2986_v43, %s2600_s2  ;;  %v574_v12 = vmax.f32 %v3003_v30, 0.0 }
 0x15c   :  { %v607_v24 = vpop.permute.xlu1 %606 }
 0x15d   :  { %v3013_v53 = vmax.f32 %v568_v36, %v607_v24  ;;  %v576_v36 = vmax.f32 %v3036_v34, 0.0 }
 0x15f   :  { %686 = vrot.lane.b32.xlu1 %v3013_v53, %s2600_s2  ;;  %620 = vrot.lane.b32.xlu2 %v575_v54, %s2599_s13 }
 0x160   :  { %618 = vrot.lane.b32.xlu0 %v574_v12, %s2599_s13 }
 0x168   :  { %622 = vrot.lane.b32.xlu0 %v576_v36, %s2599_s13 }
 0x16c   :  { %v611_v59 = vpop.permute.xlu1 %610 }
 0x16d   :  { %v3075_v3 = vmax.f32 %v570_v51, %v611_v59  ;;  %v2486_v51 = vld [vmem:[%s3983_s3] sm:$0xff] }
 0x16e   :  { %982 = vmatpush.bf16.msra.mxu1 %v2486_v51 }
 0x16f   :  { %690 = vrot.lane.b32.xlu1 %v3075_v3, %s2600_s2 }
 0x174   :  { %v613_v5 = vpop.permute.xlu1 %612 }
 0x175   :  { %v3106_v38 = vmax.f32 %v571_v57, %v613_v5 }
 0x177   :  { %692 = vrot.lane.b32.xlu1 %v3106_v38, %s2600_s2 }
 0x189   :  { %v675_v57 = vpop.permute.xlu2 %674 }
 0x18a   :  { %v722_v9 = vmax.f32 %v2944_v60, %v675_v57  ;;  %v243_v57 = vadd.f32 %v2913_v32, %v2859_v25 }
 0x18c   :  { %781 = vst.msk [vmem:[#allocation2 + $0x11] sm:$0xff] %vm738_vm1, %v722_v9 }
 0x191   :  { %v677_v47 = vpop.permute.xlu2 %676 }
 0x192   :  { %v723_v8 = vmax.f32 %v2950_v1, %v677_v47 }
 0x193   :  { %v3141_v56 = vld [vmem:[#allocation2 + $0x11] sm:$0xff] }
 0x194   :  { %v798_v58 = vld [vmem:[#allocation2 + $0x10] sm:$0xff]  ;;  %782 = vst.msk [vmem:[#allocation2 + $0x21] sm:$0xff] %vm738_vm1, %v723_v8  ;;  %v841_v20 = vpack.c.bf16 %v3141_v56, %v825_v49  ;;  %v262_v49 = vpop.f32.mrf.mxu1 }
 0x195   :  { %v3143_v19 = vld [vmem:[#allocation2 + $0x12] sm:$0xff]  ;;  %v813_v26 = vpack.c.bf16 %v798_v58, %v797_v10 }
 0x196   :  { %v1040_v60 = vpack.c.bf16 %v3143_v19, %v1024_v7  ;;  %2310 = vmatmul.msk.bf16.vlgmr.msrb.gmra.mxu0 %vm738_vm1, %v841_v20 }
 0x197   :  { %2326 = vmatmul.msk.bf16.vlgmr.msra.gmra.mxu1 %vm738_vm1, %v813_v26 }
 0x198   :  { %2346 = vmatmul.msk.bf16.vlgmr.msra.gmra.mxu2 %vm738_vm1, %v1040_v60 }
 0x19b   :  { %v1155_v0 = vld [vmem:[#allocation2 + $0x20] sm:$0xff] }
 0x19c   :  { %v3151_v1 = vld [vmem:[#allocation2 + $0x21] sm:$0xff]  ;;  %v1170_v27 = vpack.c.bf16 %v1155_v0, %v798_v58 }
 0x19d   :  { %v3153_v2 = vld [vmem:[#allocation2 + $0x22] sm:$0xff] }
 0x19e   :  { %2366 = vmatmul.msk.bf16.vlgmr.msra.gmra.mxu3 %vm738_vm1, %v1170_v27 }
 0x1a1   :  { %v681_v33 = vpop.permute.xlu2 %680 }
 0x1a2   :  { %v725_v39 = vmax.f32 %v2965_v16, %v681_v33 }
 0x1a4   :  { %784 = vst.msk [vmem:[#allocation2 + $0x41] sm:$0xff] %vm738_vm1, %v725_v39 }
 0x1a9   :  { %v615_v41 = vpop.permute.xlu2 %614 }
 0x1aa   :  { %v3164_v42 = vmax.f32 %v572_v15, %v615_v41 }
 0x1ab   :  { %v3200_v17 = vld [vmem:[#allocation2 + $0x42] sm:$0xff] }
 0x1ac   :  { %694 = vrot.lane.b32.xlu2 %v3164_v42, %s2600_s2 }
 0x1b1   :  { %v617_v44 = vpop.permute.xlu2 %616  ;;  %v679_v45 = vpop.permute.xlu0 %678 }
 0x1b2   :  { %v3170_v13 = vmax.f32 %v573_v18, %v617_v44  ;;  %v724_v46 = vmax.f32 %v2956_v40, %v679_v45 }
 0x1b4   :  { %783 = vst.msk [vmem:[#allocation2 + $0x31] sm:$0xff] %vm738_vm1, %v724_v46  ;;  %696 = vrot.lane.b32.xlu0 %v3170_v13, %s2600_s2 }
 0x1b9   :  { %v621_v16 = vpop.permute.xlu2 %620  ;;  %v683_v23 = vpop.permute.xlu0 %682 }
 0x1ba   :  { %v3178_v15 = vmax.f32 %v575_v54, %v621_v16  ;;  %v726_v50 = vmax.f32 %v2961_v11, %v683_v23  ;;  %v1157_v11 = vld [vmem:[#allocation2 + $0x40] sm:$0xff] }
 0x1bb   :  { %v3181_v52 = vld [vmem:[#allocation2 + $0x31] sm:$0xff]  ;;  %v3198_v54 = vld [vmem:[#allocation2 + $0x41] sm:$0xff] }
 0x1bc   :  { %v800_v31 = vld [vmem:[#allocation2 + $0x30] sm:$0xff]  ;;  %785 = vst.msk [vmem:[#allocation2 + $0x51] sm:$0xff] %vm738_vm1, %v726_v50  ;;  %700 = vrot.lane.b32.xlu2 %v3178_v15, %s2600_s2  ;;  %v3190_v40 = vpack.c.bf16 %v3181_v52, %v3151_v1 }
 0x1bd   :  { %v3183_v18 = vld [vmem:[#allocation2 + $0x32] sm:$0xff]  ;;  %v3192_v24 = vpack.c.bf16 %v800_v31, %v1155_v0  ;;  %v1171_v59 = vpack.c.bf16 %v1157_v11, %v800_v31  ;;  %v523_v0 = vpop.f32.mrf.mxu3 }
 0x1be   :  { %v3196_v22 = vpack.c.bf16 %v3183_v18, %v3153_v2  ;;  %2311 = vmatmul.msk.bf16.gmra.mxu0 %vm738_vm1, %v3190_v40 }
 0x1bf   :  { %2327 = vmatmul.msk.bf16.gmra.mxu1 %vm738_vm1, %v3192_v24  ;;  %2367 = vmatmul.msk.bf16.gmra.mxu3 %vm738_vm1, %v1171_v59 }
 0x1c0   :  { %2347 = vmatmul.msk.bf16.gmra.mxu2 %vm738_vm1, %v3196_v22 }
 0x1c3   :  { %v3213_v48 = vld [vmem:[#allocation2 + $0x51] sm:$0xff] }
 0x1c4   :  { %v802_v51 = vld [vmem:[#allocation2 + $0x50] sm:$0xff]  ;;  %v3221_v6 = vpack.c.bf16 %v3213_v48, %v3198_v54 }
 0x1c5   :  { %v3216_v5 = vld [vmem:[#allocation2 + $0x52] sm:$0xff]  ;;  %v3223_v55 = vpack.c.bf16 %v802_v51, %v1157_v11  ;;  %v833_v11 = vld [vmem:[#allocation2 + $0xa1] sm:$0xff] }
 0x1c6   :  { %v3229_v9 = vpack.c.bf16 %v3216_v5, %v3200_v17 }
 0x1c9   :  { %v685_v63 = vpop.permute.xlu0 %684 }
 0x1ca   :  { %v727_v4 = vmax.f32 %v2986_v43, %v685_v63  ;;  %v395_v43 = vadd.f32 %v2919_v37, %v243_v57  ;;  %v385_v37 = vpop.f32.mrf.mxu2  ;;  %v805_v63 = vld [vmem:[#allocation2 + $0xa0] sm:$0xff] }
 0x1cc   :  { %786 = vst.msk [vmem:[#allocation2 + $0x61] sm:$0xff] %vm738_vm1, %v727_v4  ;;  %v533_v32 = vadd.f32 %v2924_v21, %v395_v43  ;;  %v263_v21 = vadd.f32 %v262_v49, %v2863_v28 }
 0x1ce   :  { %2312 = vmatmul.msk.bf16.gmra.mxu0 %vm738_vm1, %v3221_v6  ;;  %v3258_v30 = vadd.f32 %v2868_v35, %v533_v32 }
 0x1cf   :  { %2328 = vmatmul.msk.bf16.gmra.mxu1 %vm738_vm1, %v3223_v55 }
 0x1d0   :  { %2348 = vmatmul.msk.bf16.gmra.mxu2 %vm738_vm1, %v3229_v9  ;;  %v569_v41 = vmax.f32 %v3258_v30, 0.0 }
 0x1d1   :  { %v687_v47 = vpop.permute.xlu1 %686 }
 0x1d2   :  { %v728_v10 = vmax.f32 %v3013_v53, %v687_v47  ;;  %v619_v25 = vpop.permute.xlu0 %618 }
 0x1d3   :  { %v3242_v7 = vmax.f32 %v574_v12, %v619_v25  ;;  %v1159_v8 = vld [vmem:[#allocation2 + $0x60] sm:$0xff]  ;;  %v403_v12 = vadd.f32 %v385_v37, %v263_v21 }
 0x1d4   :  { %v3244_v58 = vld [vmem:[#allocation2 + $0x61] sm:$0xff]  ;;  %787 = vst.msk [vmem:[#allocation2 + $0x71] sm:$0xff] %vm738_vm1, %v728_v10  ;;  %v1172_v26 = vpack.c.bf16 %v1159_v8, %v802_v51 }
 0x1d5   :  { %v3246_v20 = vld [vmem:[#allocation2 + $0x62] sm:$0xff]  ;;  %698 = vrot.lane.b32.xlu1 %v3242_v7, %s2600_s2  ;;  %v541_v33 = vadd.f32 %v523_v0, %v403_v12 }
 0x1d6   :  { %2368 = vmatmul.msk.bf16.gmra.mxu3 %vm738_vm1, %v1172_v26  ;;  %v1032_v51 = vld [vmem:[#allocation2 + $0xa2] sm:$0xff] }
 0x1da   :  { %v623_v27 = vpop.permute.xlu0 %622 }
 0x1db   :  { %v3262_v39 = vmax.f32 %v576_v36, %v623_v27  ;;  %v3265_v44 = vld [vmem:[#allocation2 + $0x71] sm:$0xff]  ;;  %v3292_v36 = vadd.f32 %v2868_v35, %v541_v33  ;;  %v2495_v35 = vld [vmem:[%s3983_s3 + $0x48] sm:$0xff] }
 0x1dc   :  { %v3267_v28 = vld [vmem:[#allocation2 + $0x70] sm:$0xff]  ;;  %v3273_v46 = vpack.c.bf16 %v3265_v44, %v3244_v58  ;;  %1355 = vmatpush.bf16.msra.mxu0 %v2495_v35 }
 0x1dd   :  { %v3269_v45 = vld [vmem:[#allocation2 + $0x72] sm:$0xff]  ;;  %v3276_v16 = vpack.c.bf16 %v3267_v28, %v1159_v8  ;;  %608 = vrot.lane.b32.xlu1 %v569_v41, %s2599_s13  ;;  %702 = vrot.lane.b32.xlu0 %v3262_v39, %s2600_s2  ;;  %v3986_v31 = vmax.f32 %v3292_v36, 0.0 }
 0x1de   :  { %v3280_v34 = vpack.c.bf16 %v3269_v45, %v3246_v20  ;;  %2313 = vmatmul.msk.bf16.gmra.mxu0 %vm738_vm1, %v3273_v46 }
 0x1df   :  { %2329 = vmatmul.msk.bf16.gmra.mxu1 %vm738_vm1, %v3276_v16 }
 0x1e0   :  { %2349 = vmatmul.msk.bf16.gmra.mxu2 %vm738_vm1, %v3280_v34 }
 0x1e1   :  { %v691_v23 = vpop.permute.xlu1 %690 }
 0x1e2   :  { %v730_v50 = vmax.f32 %v3075_v3, %v691_v23 }
 0x1e4   :  { %789 = vst.msk [vmem:[#allocation2 + $0xb1] sm:$0xff] %vm738_vm1, %v730_v50 }
 0x1e5   :  { %624 = vrot.lane.b32.xlu0 %v3986_v31, %s2599_s13 }
 0x1e9   :  { %v693_v59 = vpop.permute.xlu1 %692 }
 0x1ea   :  { %v731_v4 = vmax.f32 %v3106_v38, %v693_v59 }
 0x1eb   :  { %v3306_v57 = vld [vmem:[#allocation2 + $0xb1] sm:$0xff] }
 0x1ec   :  { %v3308_v3 = vld [vmem:[#allocation2 + $0xb0] sm:$0xff]  ;;  %790 = vst.msk [vmem:[#allocation2 + $0xc1] sm:$0xff] %vm738_vm1, %v731_v4  ;;  %v845_v47 = vpack.c.bf16 %v3306_v57, %v833_v11 }
 0x1ed   :  { %v3310_v43 = vld [vmem:[#allocation2 + $0xb2] sm:$0xff]  ;;  %v817_v49 = vpack.c.bf16 %v3308_v3, %v805_v63 }
 0x1ee   :  { %v1044_v10 = vpack.c.bf16 %v3310_v43, %v1032_v51  ;;  %2314 = vmatmul.msk.bf16.gmra.mxu0 %vm738_vm1, %v845_v47 }
 0x1ef   :  { %2330 = vmatmul.msk.bf16.gmra.mxu1 %vm738_vm1, %v817_v49 }
 0x1f0   :  { %2350 = vmatmul.msk.bf16.gmra.mxu2 %vm738_vm1, %v1044_v10 }
 0x1f3   :  { %v3319_v38 = vld [vmem:[#allocation2 + $0xc1] sm:$0xff] }
 0x1f4   :  { %v3321_v25 = vld [vmem:[#allocation2 + $0xc0] sm:$0xff] }
 0x1f5   :  { %v3323_v32 = vld [vmem:[#allocation2 + $0xc2] sm:$0xff] }
 0x206   :  { %v695_v21 = vpop.permute.xlu2 %694 }
 0x207   :  { %v732_v12 = vmax.f32 %v3164_v42, %v695_v21 }
 0x209   :  { %791 = vst.msk [vmem:[#allocation2 + $0xd1] sm:$0xff] %vm738_vm1, %v732_v12 }
 0x210   :  { %v3333_v0 = vld [vmem:[#allocation2 + $0xd1] sm:$0xff] }
 0x211   :  { %v3335_v27 = vld [vmem:[#allocation2 + $0xd0] sm:$0xff]  ;;  %v3341_v23 = vpack.c.bf16 %v3333_v0, %v3319_v38 }
 0x212   :  { %v3337_v33 = vld [vmem:[#allocation2 + $0xd2] sm:$0xff]  ;;  %v3345_v50 = vpack.c.bf16 %v3335_v27, %v3321_v25 }
 0x213   :  { %3993 = vst [vmem:[#allocation3_spill] sm:$0xff] %v3341_v23  ;;  %v3349_v11 = vpack.c.bf16 %v3337_v33, %v3323_v32  ;;  %v899_v42 = vpop.f32.mrf.mxu0  ;;  %2315 = vmatmul.msk.bf16.gmra.mxu0 %vm738_vm1, %v3341_v23 }
 0x214   :  { %v984_v59 = vpop.f32.mrf.mxu1  ;;  %2331 = vmatmul.msk.bf16.gmra.mxu1 %vm738_vm1, %v3345_v50 }
 0x215   :  { %3994 = vst [vmem:[#allocation4_spill] sm:$0xff] %v3349_v11  ;;  %v985_v63 = vadd.f32 %v984_v59, %v899_v42  ;;  %2351 = vmatmul.msk.bf16.gmra.mxu2 %vm738_vm1, %v3349_v11 }
 0x216   :  { %v701_v51 = vpop.permute.xlu2 %700 }
 0x217   :  { %v735_v35 = vmax.f32 %v3178_v15, %v701_v51 }
 0x219   :  { %794 = vst.msk [vmem:[#allocation2 + $0x101] sm:$0xff] %vm738_vm1, %v735_v35 }
 0x21b   :  { %v1098_v4 = vpop.f32.mrf.mxu2  ;;  %v3378_v35 = vpop.f32.mrf.mxu0 }
 0x21c   :  { %v1138_v47 = vadd.f32 %v1098_v4, %v985_v63  ;;  %3995 = vst [vmem:[#allocation5_spill] sm:$0xff] %v3378_v35  ;;  %v3380_v4 = vpop.f32.mrf.mxu1 }
 0x21d   :  { %3996 = vst [vmem:[#allocation6_spill] sm:$0xff] %v3380_v4 }
 0x221   :  { %v1228_v49 = vpop.f32.mrf.mxu3 }
 0x222   :  { %v3359_v10 = vadd.f32 %v1228_v49, %v1138_v47 }
 0x223   :  { %v3382_v47 = vpop.f32.mrf.mxu2 }
 0x224   :  { %3997 = vst [vmem:[#allocation7_spill] sm:$0xff] %v3382_v47 }
 0x226   :  { %v697_v21 = vpop.permute.xlu0 %696 }
 0x227   :  { %v733_v12 = vmax.f32 %v3170_v13, %v697_v21  ;;  %v2494_v13 = vld [vmem:[%s3983_s3 + $0x40] sm:$0xff] }
 0x228   :  { %1356 = vmatpush.bf16.msra.mxu0 %v2494_v13 }
 0x229   :  { %792 = vst.msk [vmem:[#allocation2 + $0xe1] sm:$0xff] %vm738_vm1, %v733_v12  ;;  %v3384_v12 = vpop.f32.mrf.mxu3 }
 0x22a   :  { %3998 = vst [vmem:[#allocation8_spill] sm:$0xff] %v3384_v12 }
 0x230   :  { %v3363_v26 = vld [vmem:[#allocation2 + $0xe1] sm:$0xff] }
 0x231   :  { %v3365_v42 = vld [vmem:[#allocation2 + $0xe0] sm:$0xff] }
 0x232   :  { %v3367_v59 = vld [vmem:[#allocation2 + $0xe2] sm:$0xff] }
 0x23b   :  { %v904_v49 = vpop.f32.mrf.mxu0 }
 0x23c   :  { %v989_v21 = vpop.f32.mrf.mxu1 }
 0x23d   :  { %v990_v15 = vadd.f32 %v989_v21, %v904_v49 }
 0x242   :  { %v1233_v53 = vpop.f32.mrf.mxu3 }
 0x243   :  { %v1103_v63 = vpop.f32.mrf.mxu2  ;;  %v3386_v8 = vpop.f32.mrf.mxu0 }
 0x244   :  { %v1140_v37 = vadd.f32 %v1103_v63, %v990_v15  ;;  %3999 = vst [vmem:[#allocation9_spill] sm:$0xff] %v3386_v8  ;;  %v3388_v51 = vpop.f32.mrf.mxu1  ;;  %v2497_v15 = vld [vmem:[%s3983_s3 + $0x58] sm:$0xff]  ;;  %v2499_v63 = vld [vmem:[%s3983_s3 + $0x68] sm:$0xff] }
 0x245   :  { %4000 = vst [vmem:[#allocation10_spill] sm:$0xff] %v3388_v51  ;;  %1485 = vmatpush.bf16.msrb.mxu1 %v2497_v15  ;;  %1616 = vmatpush.bf16.msrb.mxu2 %v2499_v63 }
 0x246   :  { %v3390_v60 = vadd.f32 %v1233_v53, %v1140_v37 }
 0x247   :  { %v699_v62 = vpop.permute.xlu1 %698 }
 0x248   :  { %v734_v61 = vmax.f32 %v3242_v7, %v699_v62  ;;  %v2496_v62 = vld [vmem:[%s3983_s3 + $0x50] sm:$0xff] }
 0x249   :  { %1486 = vmatpush.bf16.msrb.mxu1 %v2496_v62  ;;  %v4007_v62 = vmax.f32 %v3292_v36, 0.0 }
 0x24a   :  { %793 = vst.msk [vmem:[#allocation2 + $0xf1] sm:$0xff] %vm738_vm1, %v734_v61  ;;  %v3413_v37 = vpop.f32.mrf.mxu3 }
 0x24b   :  { %v3394_v13 = vpop.f32.mrf.mxu2  ;;  %v909_v14 = vpop.f32.mrf.mxu0  ;;  %4002 = vst [vmem:[#allocation12_spill] sm:$0xff] %v3413_v37 }
 0x24c   :  { %4001 = vst [vmem:[#allocation11_spill] sm:$0xff] %v3394_v13  ;;  %v994_v29 = vpop.f32.mrf.mxu1 }
 0x24d   :  { %v995_v31 = vadd.f32 %v994_v29, %v909_v14  ;;  %v2498_v29 = vld [vmem:[%s3983_s3 + $0x60] sm:$0xff] }
 0x24e   :  { %1617 = vmatpush.bf16.msrb.mxu2 %v2498_v29 }
 0x24f   :  { %v609_v61 = vpop.permute.xlu1 %608  ;;  %v703_v7 = vpop.permute.xlu0 %702 }
 0x250   :  { %v3410_v14 = vmax.f32 %v569_v41, %v609_v61  ;;  %v736_v53 = vmax.f32 %v3262_v39, %v703_v7  ;;  %v3436_v61 = vld [vmem:[#allocation2 + $0x101] sm:$0xff] }
 0x251   :  { %v3415_v49 = vld [vmem:[#allocation2 + $0xf1] sm:$0xff]  ;;  %v3438_v7 = vld [vmem:[#allocation2 + $0x100] sm:$0xff] }
 0x252   :  { %v3417_v21 = vld [vmem:[#allocation2 + $0xf0] sm:$0xff]  ;;  %795 = vst.msk [vmem:[#allocation2 + $0x111] sm:$0xff] %vm738_vm1, %v736_v53  ;;  %688 = vrot.lane.b32.xlu2 %v3410_v14, %s2600_s2  ;;  %v3426_v30 = vpack.c.bf16 %v3415_v49, %v3363_v26  ;;  %v3440_v53 = vld [vmem:[#allocation2 + $0x102] sm:$0xff] }
 0x253   :  { %v3419_v15 = vld [vmem:[#allocation2 + $0xf2] sm:$0xff]  ;;  %v1108_v63 = vpop.f32.mrf.mxu2  ;;  %v3430_v39 = vpack.c.bf16 %v3417_v21, %v3365_v42  ;;  %v3442_v13 = vpop.f32.mrf.mxu0 }
 0x254   :  { %4003 = vst [vmem:[#allocation13_spill] sm:$0xff] %v3426_v30  ;;  %v3434_v41 = vpack.c.bf16 %v3419_v15, %v3367_v59  ;;  %v1142_v37 = vadd.f32 %v1108_v63, %v995_v31  ;;  %v3444_v51 = vpop.f32.mrf.mxu1  ;;  %2316 = vmatmul.msk.bf16.gmra.mxu0 %vm738_vm1, %v3426_v30 }
 0x255   :  { %4005 = vst [vmem:[#allocation15_spill] sm:$0xff] %v3442_v13  ;;  %2332 = vmatmul.msk.bf16.gmra.mxu1 %vm738_vm1, %v3430_v39 }
 0x256   :  { %4004 = vst [vmem:[#allocation14_spill] sm:$0xff] %v3434_v41  ;;  %2352 = vmatmul.msk.bf16.gmra.mxu2 %vm738_vm1, %v3434_v41 }
 0x257   :  { %4006 = vst [vmem:[#allocation16_spill] sm:$0xff] %v3444_v51  ;;  %v625_v31 = vpop.permute.xlu0 %624 }
 0x258   :  { %v3460_v29 = vmax.f32 %v4007_v62, %v625_v31 }
 0x259   :  { %v1238_v63 = vpop.f32.mrf.mxu3  ;;  %v3468_v4 = vld [vmem:[#allocation2 + $0x111] sm:$0xff] }
 0x25a   :  { %v3464_v12 = vadd.f32 %v1238_v63, %v1142_v37  ;;  %704 = vrot.lane.b32.xlu1 %v3460_v29, %s2600_s2  ;;  %v3470_v35 = vld [vmem:[#allocation2 + $0x110] sm:$0xff]  ;;  %v3476_v31 = vpack.c.bf16 %v3468_v4, %v3436_v61 }
 0x25b   :  { %v3462_v8 = vpop.f32.mrf.mxu2  ;;  %v914_v47 = vpop.f32.mrf.mxu0  ;;  %v3472_v41 = vld [vmem:[#allocation2 + $0x112] sm:$0xff]  ;;  %v3480_v37 = vpack.c.bf16 %v3470_v35, %v3438_v7 }
 0x25c   :  { %4008 = vst [vmem:[#allocation17_spill] sm:$0xff] %v3462_v8  ;;  %v999_v51 = vpop.f32.mrf.mxu1 }
 0x25d   :  { %v1000_v13 = vadd.f32 %v999_v51, %v914_v47  ;;  %4009 = vst [vmem:[#allocation18_spill] sm:$0xff] %v3476_v31  ;;  %v3490_v47 = vpack.c.bf16 %v3472_v41, %v3440_v53 }
 0x25f   :  { %4012 = vst [vmem:[#allocation21_spill] sm:$0xff] %v3490_v47 }
 0x263   :  { %v1113_v36 = vpop.f32.mrf.mxu2  ;;  %v3484_v63 = vpop.f32.mrf.mxu0 }
 0x264   :  { %v3482_v62 = vadd.f32 %v1113_v36, %v1000_v13  ;;  %4010 = vst [vmem:[#allocation19_spill] sm:$0xff] %v3484_v63  ;;  %v3486_v51 = vpop.f32.mrf.mxu1  ;;  %2317 = vmatmul.msk.bf16.gmra.mxu0 %vm738_vm1, %v3476_v31  ;;  %v2501_v13 = vld [vmem:[%s3983_s3 + $0x78] sm:$0xff]  ;;  %v2503_v31 = vld [vmem:[%s3983_s3 + $0x88] sm:$0xff] }
 0x265   :  { %4011 = vst [vmem:[#allocation20_spill] sm:$0xff] %v3486_v51  ;;  %2333 = vmatmul.msk.bf16.gmra.mxu1 %vm738_vm1, %v3480_v37  ;;  %1746 = vmatpush.bf16.msrb.mxu3 %v2501_v13  ;;  %v4015_v13 = vpack.c.bf16 %v3153_v2, %v3143_v19 }
 0x266   :  { %2353 = vmatmul.msk.bf16.gmra.mxu2 %vm738_vm1, %v3490_v47  ;;  %1876 = vmatpush.bf16.msrb.mxu0 %v2503_v31  ;;  %v4014_v47 = vpack.c.bf16 %v3151_v1, %v3141_v56  ;;  %v4017_v56 = vpack.c.bf16 %v3200_v17, %v3183_v18 }
 0x26b   :  { %v3501_v36 = vpop.f32.mrf.mxu2  ;;  %v919_v8 = vpop.f32.mrf.mxu0 }
 0x26c   :  { %4013 = vst [vmem:[#allocation22_spill] sm:$0xff] %v3501_v36  ;;  %v1004_v30 = vpop.f32.mrf.mxu1 }
 0x26d   :  { %v1005_v11 = vadd.f32 %v1004_v30, %v919_v8 }
 0x273   :  { %v1118_v23 = vpop.f32.mrf.mxu2  ;;  %v921_v8 = vpop.f32.mrf.mxu0 }
 0x274   :  { %v3506_v51 = vadd.f32 %v1118_v23, %v1005_v11  ;;  %2386 = vmatmul.msk.bf16.vlgmr.msra.gmra.mxu0 %vm738_vm1, %v4014_v47  ;;  %v1006_v30 = vpop.f32.mrf.mxu1  ;;  %v4016_v11 = vpack.c.bf16 %v3198_v54, %v3181_v52  ;;  %v4019_v52 = vpack.c.bf16 %v3246_v20, %v3216_v5  ;;  %v2502_v20 = vld [vmem:[%s3983_s3 + $0x80] sm:$0xff] }
 0x275   :  { %2406 = vmatmul.msk.bf16.vlgmr.msrb.gmra.mxu1 %vm738_vm1, %v4015_v13  ;;  %v1007_v36 = vadd.f32 %v1006_v30, %v921_v8  ;;  %1877 = vmatpush.bf16.msrb.mxu0 %v2502_v20 }
 0x276   :  { %2426 = vmatmul.msk.bf16.vlgmr.msrb.gmra.mxu2 %vm738_vm1, %v3192_v24  ;;  %v4018_v24 = vpack.c.bf16 %v3244_v58, %v3213_v48  ;;  %v2500_v48 = vld [vmem:[%s3983_s3 + $0x70] sm:$0xff] }
 0x277   :  { %1747 = vmatpush.bf16.msrb.mxu3 %v2500_v48 }
 0x27b   :  { %v1120_v63 = vpop.f32.mrf.mxu2 }
 0x27c   :  { %v3518_v23 = vadd.f32 %v1120_v63, %v1007_v36 }
 0x284   :  { %2387 = vmatmul.msk.bf16.gmra.mxu0 %vm738_vm1, %v4016_v11 }
 0x285   :  { %2407 = vmatmul.msk.bf16.gmra.mxu1 %vm738_vm1, %v4017_v56 }
 0x286   :  { %2427 = vmatmul.msk.bf16.gmra.mxu2 %vm738_vm1, %v3223_v55 }
 0x290   :  { %v924_v19 = vpop.f32.mrf.mxu0 }
 0x291   :  { %v1009_v1 = vpop.f32.mrf.mxu1 }
 0x292   :  { %v1010_v2 = vadd.f32 %v1009_v1, %v924_v19  ;;  %v4020_v19 = vpack.c.bf16 %v3321_v25, %v3308_v3 }
 0x294   :  { %2388 = vmatmul.msk.bf16.gmra.mxu0 %vm738_vm1, %v4018_v24 }
 0x295   :  { %2408 = vmatmul.msk.bf16.gmra.mxu1 %vm738_vm1, %v4019_v52 }
 0x296   :  { %2428 = vmatmul.msk.bf16.gmra.mxu2 %vm738_vm1, %v3276_v16  ;;  %v1552_v16 = vld [vmem:[#allocation2 + $0x90] sm:$0xff] }
 0x298   :  { %v1123_v18 = vpop.f32.mrf.mxu2  ;;  %v926_v17 = vpop.f32.mrf.mxu0 }
 0x299   :  { %v3540_v54 = vadd.f32 %v1123_v18, %v1010_v2  ;;  %v1011_v55 = vpop.f32.mrf.mxu1 }
 0x29a   :  { %v1012_v31 = vadd.f32 %v1011_v55, %v926_v17 }
 0x2a0   :  { %v1125_v63 = vpop.f32.mrf.mxu2 }
 0x2a1   :  { %v3542_v47 = vadd.f32 %v1125_v63, %v1012_v31 }
 0x2ac   :  { %v689_v58 = vpop.permute.xlu2 %688 }
 0x2ad   :  { %v729_v5 = vmax.f32 %v3410_v14, %v689_v58 }
 0x2af   :  { %788 = vst.msk [vmem:[#allocation2 + $0x81] sm:$0xff] %vm738_vm1, %v729_v5 }
 0x2b6   :  { %v1161_v36 = vld [vmem:[#allocation2 + $0x80] sm:$0xff] }
 0x2b7   :  { %v3552_v13 = vld [vmem:[#allocation2 + $0x81] sm:$0xff]  ;;  %v1173_v30 = vpack.c.bf16 %v1161_v36, %v3267_v28  ;;  %v1564_v56 = vpack.c.bf16 %v1552_v16, %v1161_v36  ;;  %v4022_v28 = vpack.c.bf16 %v3323_v32, %v3310_v43  ;;  %v4023_v43 = vpack.c.bf16 %v3365_v42, %v3335_v27 }
 0x2b8   :  { %v3554_v8 = vld [vmem:[#allocation2 + $0x82] sm:$0xff]  ;;  %v1303_v11 = vpack.c.bf16 %v3552_v13, %v3265_v44  ;;  %v4021_v44 = vpack.c.bf16 %v3319_v38, %v3306_v57  ;;  %v4024_v32 = vpack.c.bf16 %v3363_v26, %v3333_v0  ;;  %v4026_v0 = vpack.c.bf16 %v3438_v7, %v3417_v21 }
 0x2b9   :  { %v1433_v14 = vpack.c.bf16 %v3554_v8, %v3269_v45  ;;  %2369 = vmatmul.msk.bf16.gmra.mxu3 %vm738_vm1, %v1173_v30  ;;  %2429 = vmatmul.msk.bf16.gmra.mxu2 %vm738_vm1, %v1564_v56 }
 0x2ba   :  { %2389 = vmatmul.msk.bf16.gmra.mxu0 %vm738_vm1, %v1303_v11 }
 0x2bb   :  { %2409 = vmatmul.msk.bf16.gmra.mxu1 %vm738_vm1, %v1433_v14  ;;  %v1812_v14 = vld [vmem:[#allocation2 + $0x92] sm:$0xff] }
 0x2c9   :  { %2370 = vmatmul.msk.bf16.gmra.mxu3 %vm738_vm1, %v4020_v19  ;;  %2430 = vmatmul.msk.bf16.gmra.mxu2 %vm738_vm1, %v3345_v50  ;;  %v4025_v50 = vpack.c.bf16 %v3367_v59, %v3337_v33  ;;  %v4027_v33 = vpack.c.bf16 %v3436_v61, %v3415_v49  ;;  %v4028_v59 = vpack.c.bf16 %v3440_v53, %v3419_v15  ;;  %v1560_v15 = vld [vmem:[#allocation2 + $0x130] sm:$0xff] }
 0x2ca   :  { %2390 = vmatmul.msk.bf16.gmra.mxu0 %vm738_vm1, %v4021_v44  ;;  %v4029_v44 = vld [vmem:[#allocation19_spill] sm:$0xff] }
 0x2cb   :  { %2410 = vmatmul.msk.bf16.gmra.mxu1 %vm738_vm1, %v4022_v28  ;;  %v4030_v28 = vld [vmem:[#allocation20_spill] sm:$0xff] }
 0x2cc   :  { %v705_v45 = vpop.permute.xlu1 %704 }
 0x2cd   :  { %v737_v1 = vmax.f32 %v3460_v29, %v705_v45  ;;  %v1002_v45 = vadd.f32 %v4030_v28, %v4029_v44 }
 0x2cf   :  { %796 = vst.msk [vmem:[#allocation2 + $0x121] sm:$0xff] %vm738_vm1, %v737_v1  ;;  %v4031_v1 = vld [vmem:[#allocation22_spill] sm:$0xff] }
 0x2d1   :  { %v929_v3 = vpop.f32.mrf.mxu0 }
 0x2d2   :  { %v1014_v25 = vpop.f32.mrf.mxu1 }
 0x2d3   :  { %v1015_v2 = vadd.f32 %v1014_v25, %v929_v3  ;;  %v1145_v3 = vadd.f32 %v4031_v1, %v1002_v45 }
 0x2d6   :  { %v1169_v49 = vld [vmem:[#allocation2 + $0x120] sm:$0xff] }
 0x2d7   :  { %v3620_v61 = vld [vmem:[#allocation2 + $0x121] sm:$0xff]  ;;  %v1177_v53 = vpack.c.bf16 %v1169_v49, %v3470_v35  ;;  %v1568_v36 = vpack.c.bf16 %v1560_v15, %v1169_v49 }
 0x2d8   :  { %v3622_v20 = vld [vmem:[#allocation2 + $0x122] sm:$0xff] }
 0x2d9   :  { %v1128_v24 = vpop.f32.mrf.mxu2  ;;  %v931_v38 = vpop.f32.mrf.mxu0  ;;  %2371 = vmatmul.msk.bf16.gmra.mxu3 %vm738_vm1, %v4023_v43  ;;  %2431 = vmatmul.msk.bf16.gmra.mxu2 %vm738_vm1, %v3430_v39  ;;  %v1437_v16 = vpack.c.bf16 %v3622_v20, %v3472_v41 }
 0x2da   :  { %v3581_v57 = vadd.f32 %v1128_v24, %v1015_v2  ;;  %v1016_v52 = vpop.f32.mrf.mxu1  ;;  %2391 = vmatmul.msk.bf16.gmra.mxu0 %vm738_vm1, %v4024_v32 }
 0x2db   :  { %2411 = vmatmul.msk.bf16.gmra.mxu1 %vm738_vm1, %v4025_v50  ;;  %v1017_v29 = vadd.f32 %v1016_v52, %v931_v38  ;;  %v4033_v38 = vld [vmem:[#allocation4_spill] sm:$0xff] }
 0x2e1   :  { %v1130_v18 = vpop.f32.mrf.mxu2  ;;  %v934_v27 = vpop.f32.mrf.mxu0 }
 0x2e2   :  { %v3597_v17 = vadd.f32 %v1130_v18, %v1017_v29  ;;  %v1019_v42 = vpop.f32.mrf.mxu1 }
 0x2e3   :  { %v1020_v55 = vadd.f32 %v1019_v42, %v934_v27  ;;  %v4034_v42 = vld [vmem:[#allocation13_spill] sm:$0xff] }
 0x2e9   :  { %v1133_v31 = vpop.f32.mrf.mxu2  ;;  %v936_v26 = vpop.f32.mrf.mxu0  ;;  %2372 = vmatmul.msk.bf16.gmra.mxu3 %vm738_vm1, %v4026_v0  ;;  %2432 = vmatmul.msk.bf16.gmra.mxu2 %vm738_vm1, %v3480_v37  ;;  %v1307_v37 = vpack.c.bf16 %v3620_v61, %v3468_v4 }
 0x2ea   :  { %v3599_v63 = vadd.f32 %v1133_v31, %v1020_v55  ;;  %2392 = vmatmul.msk.bf16.gmra.mxu0 %vm738_vm1, %v4027_v33  ;;  %v1021_v39 = vpop.f32.mrf.mxu1  ;;  %v4035_v55 = vld [vmem:[#allocation14_spill] sm:$0xff] }
 0x2eb   :  { %2412 = vmatmul.msk.bf16.gmra.mxu1 %vm738_vm1, %v4028_v59  ;;  %v1022_v48 = vadd.f32 %v1021_v39, %v936_v26 }
 0x2f1   :  { %v1135_v58 = vpop.f32.mrf.mxu2  ;;  %v1358_v21 = vpop.f32.mrf.mxu0 }
 0x2f2   :  { %v3615_v5 = vadd.f32 %v1135_v58, %v1022_v48  ;;  %v3618_v7 = vadd.f32 %v1358_v21, %v3359_v10  ;;  %v4036_v48 = vld [vmem:[#allocation18_spill] sm:$0xff]  ;;  %v4037_v58 = vld [vmem:[#allocation21_spill] sm:$0xff]  ;;  %v1488_v21 = vpop.f32.mrf.mxu1 }
 0x2f9   :  { %2373 = vmatmul.msk.bf16.gmra.mxu3 %vm738_vm1, %v1177_v53  ;;  %v3630_v30 = vpop.f32.mrf.mxu0  ;;  %2433 = vmatmul.msk.bf16.gmra.mxu2 %vm738_vm1, %v1568_v36 }
 0x2fa   :  { %2393 = vmatmul.msk.bf16.gmra.mxu0 %vm738_vm1, %v1307_v37 }
 0x2fb   :  { %2413 = vmatmul.msk.bf16.gmra.mxu1 %vm738_vm1, %v1437_v16  ;;  %v1490_v16 = vpop.f32.mrf.mxu1 }
 0x301   :  { %v1363_v10 = vpop.f32.mrf.mxu0 }
 0x302   :  { %v3636_v35 = vadd.f32 %v1363_v10, %v3390_v60  ;;  %v3657_v60 = vpop.f32.mrf.mxu3  ;;  %v1820_v10 = vld [vmem:[#allocation2 + $0x132] sm:$0xff] }
 0x309   :  { %v3638_v11 = vpop.f32.mrf.mxu0  ;;  %2446 = vmatmul.msk.bf16.vlgmr.msrb.gmra.mxu3 %vm738_vm1, %v3190_v40 }
 0x30a   :  { %2466 = vmatmul.msk.bf16.vlgmr.msrb.gmra.mxu0 %vm738_vm1, %v3196_v22  ;;  %v1682_v22 = vld [vmem:[#allocation2 + $0x91] sm:$0xff] }
 0x30b   :  { %v1694_v56 = vpack.c.bf16 %v1682_v22, %v3552_v13 }
 0x311   :  { %v1368_v4 = vpop.f32.mrf.mxu0 }
 0x312   :  { %v3645_v41 = vadd.f32 %v1368_v4, %v3464_v12 }
 0x319   :  { %2447 = vmatmul.msk.bf16.gmra.mxu3 %vm738_vm1, %v3221_v6  ;;  %v3655_v40 = vpop.f32.mrf.mxu0  ;;  %v1824_v6 = vpack.c.bf16 %v1812_v14, %v3554_v8  ;;  %v4032_v8 = vld [vmem:[#allocation3_spill] sm:$0xff] }
 0x31a   :  { %2467 = vmatmul.msk.bf16.gmra.mxu0 %vm738_vm1, %v3229_v9 }
 0x329   :  { %2448 = vmatmul.msk.bf16.gmra.mxu3 %vm738_vm1, %v3273_v46 }
 0x32a   :  { %2468 = vmatmul.msk.bf16.gmra.mxu0 %vm738_vm1, %v3280_v34 }
 0x337   :  { %v1373_v12 = vpop.f32.mrf.mxu0 }
 0x339   :  { %2449 = vmatmul.msk.bf16.gmra.mxu3 %vm738_vm1, %v1694_v56  ;;  %v1828_v56 = vpack.c.bf16 %v1820_v10, %v3622_v20 }
 0x33a   :  { %2469 = vmatmul.msk.bf16.gmra.mxu0 %vm738_vm1, %v1824_v6 }
 0x33c   :  { %v1243_v9 = vpop.f32.mrf.mxu3 }
 0x33d   :  { %v1274_v46 = vadd.f32 %v1243_v9, %v3482_v62 }
 0x33f   :  { %v1375_v19 = vpop.f32.mrf.mxu0  ;;  %v3664_v34 = vadd.f32 %v1373_v12, %v1274_v46  ;;  %v1493_v46 = vpop.f32.mrf.mxu1 }
 0x344   :  { %v1245_v25 = vpop.f32.mrf.mxu3 }
 0x345   :  { %v1275_v2 = vadd.f32 %v1245_v25, %v1145_v3  ;;  %v4039_v3 = vld [vmem:[#allocation6_spill] sm:$0xff] }
 0x347   :  { %v1378_v13 = vpop.f32.mrf.mxu0  ;;  %v3669_v24 = vadd.f32 %v1375_v19, %v1275_v2  ;;  %v1495_v2 = vpop.f32.mrf.mxu1 }
 0x349   :  { %2450 = vmatmul.msk.bf16.gmra.mxu3 %vm738_vm1, %v4032_v8 }
 0x34a   :  { %2470 = vmatmul.msk.bf16.gmra.mxu0 %vm738_vm1, %v4033_v38  ;;  %v4041_v38 = vld [vmem:[#allocation8_spill] sm:$0xff] }
 0x34c   :  { %v1248_v62 = vpop.f32.mrf.mxu3 }
 0x34d   :  { %v1276_v52 = vadd.f32 %v1248_v62, %v3506_v51 }
 0x34f   :  { %v1380_v43 = vpop.f32.mrf.mxu0  ;;  %v3676_v32 = vadd.f32 %v1378_v13, %v1276_v52  ;;  %v4040_v13 = vld [vmem:[#allocation7_spill] sm:$0xff] }
 0x354   :  { %v1250_v50 = vpop.f32.mrf.mxu3 }
 0x355   :  { %v1277_v29 = vadd.f32 %v1250_v50, %v3518_v23 }
 0x357   :  { %v1383_v18 = vpop.f32.mrf.mxu0  ;;  %v3679_v27 = vadd.f32 %v1380_v43, %v1277_v29 }
 0x359   :  { %2451 = vmatmul.msk.bf16.gmra.mxu3 %vm738_vm1, %v4034_v42 }
 0x35a   :  { %2471 = vmatmul.msk.bf16.gmra.mxu0 %vm738_vm1, %v4035_v55  ;;  %v1498_v55 = vpop.f32.mrf.mxu1 }
 0x35c   :  { %v1253_v31 = vpop.f32.mrf.mxu3 }
 0x35d   :  { %v1278_v26 = vadd.f32 %v1253_v31, %v3540_v54  ;;  %v1619_v54 = vpop.f32.mrf.mxu2 }
 0x35f   :  { %v1385_v0 = vpop.f32.mrf.mxu0  ;;  %v3686_v51 = vadd.f32 %v1383_v18, %v1278_v26 }
 0x364   :  { %v1255_v33 = vpop.f32.mrf.mxu3 }
 0x365   :  { %v1279_v59 = vadd.f32 %v1255_v33, %v3542_v47  ;;  %v1690_v47 = vld [vmem:[#allocation2 + $0x131] sm:$0xff]  ;;  %v1621_v6 = vpop.f32.mrf.mxu2 }
 0x366   :  { %v1698_v12 = vpack.c.bf16 %v1690_v47, %v3620_v61  ;;  %v4038_v61 = vld [vmem:[#allocation5_spill] sm:$0xff]  ;;  %v1530_v47 = vadd.f32 %v1493_v46, %v3636_v35 }
 0x367   :  { %v1388_v39 = vpop.f32.mrf.mxu0  ;;  %v3689_v23 = vadd.f32 %v1385_v0, %v1279_v59  ;;  %v987_v20 = vadd.f32 %v4039_v3, %v4038_v61  ;;  %v3720_v0 = vld [vmem:[%s3984_s4] ss:$0 sm:$0xff]  ;;  %v4042_v59 = vld [vmem:[#allocation9_spill] sm:$0xff]  ;;  %s2602_s4 = smov 112  }
 0x369   :  { %2452 = vmatmul.msk.bf16.gmra.mxu3 %vm738_vm1, %v4036_v48  ;;  %v1139_v8 = vadd.f32 %v4040_v13, %v987_v20  ;;  %v4046_v20 = vld [vmem:[#allocation15_spill] sm:$0xff] }
 0x36a   :  { %2472 = vmatmul.msk.bf16.gmra.mxu0 %vm738_vm1, %v4037_v58 }
 0x36b   :  { %v1269_v62 = vadd.f32 %v4041_v38, %v1139_v8 }
 0x36c   :  { %v1258_v49 = vpop.f32.mrf.mxu3 }
 0x36d   :  { %v1280_v15 = vadd.f32 %v1258_v49, %v3581_v57  ;;  %v1399_v29 = vadd.f32 %v3630_v30, %v1269_v62  ;;  %v4044_v49 = vld [vmem:[#allocation11_spill] sm:$0xff] }
 0x36f   :  { %v1390_v53 = vpop.f32.mrf.mxu0  ;;  %v3696_v37 = vadd.f32 %v1388_v39, %v1280_v15  ;;  %v1529_v42 = vadd.f32 %v1490_v16, %v1399_v29  ;;  %v4043_v39 = vld [vmem:[#allocation10_spill] sm:$0xff]  ;;  %v4045_v16 = vld [vmem:[#allocation12_spill] sm:$0xff] }
 0x371   :  { %v1660_v31 = vadd.f32 %v1621_v6, %v1529_v42 }
 0x374   :  { %v1260_v36 = vpop.f32.mrf.mxu3 }
 0x375   :  { %v1281_v4 = vadd.f32 %v1260_v36, %v3597_v17  ;;  %v1624_v17 = vpop.f32.mrf.mxu2 }
 0x377   :  { %v1393_v22 = vpop.f32.mrf.mxu0  ;;  %v3699_v14 = vadd.f32 %v1390_v53, %v1281_v4 }
 0x379   :  { %2453 = vmatmul.msk.bf16.gmra.mxu3 %vm738_vm1, %v1698_v12 }
 0x37a   :  { %2473 = vmatmul.msk.bf16.gmra.mxu0 %vm738_vm1, %v1828_v56  ;;  %v1661_v56 = vadd.f32 %v1624_v17, %v1530_v47 }
 0x37c   :  { %v1263_v57 = vpop.f32.mrf.mxu3 }
 0x37d   :  { %v1282_v9 = vadd.f32 %v1263_v57, %v3599_v63  ;;  %v1528_v63 = vadd.f32 %v1488_v21, %v3618_v7  ;;  %v1626_v52 = vpop.f32.mrf.mxu2  ;;  %v992_v7 = vadd.f32 %v4043_v39, %v4042_v59 }
 0x37f   :  { %v1395_v19 = vpop.f32.mrf.mxu0  ;;  %v3706_v44 = vadd.f32 %v1393_v22, %v1282_v9  ;;  %v1659_v50 = vadd.f32 %v1619_v54, %v1528_v63  ;;  %v1141_v30 = vadd.f32 %v4044_v49, %v992_v7  ;;  %v1500_v22 = vpop.f32.mrf.mxu1  ;;  %v4048_v63 = vld [vmem:[#allocation17_spill] sm:$0xff] }
 0x381   :  { %v1271_v36 = vadd.f32 %v4045_v16, %v1141_v30 }
 0x383   :  { %v1401_v6 = vadd.f32 %v3638_v11, %v1271_v36  ;;  %v4047_v11 = vld [vmem:[#allocation16_spill] sm:$0xff] }
 0x384   :  { %v1265_v28 = vpop.f32.mrf.mxu3  ;;  %v997_v13 = vadd.f32 %v4047_v11, %v4046_v20 }
 0x385   :  { %v1283_v45 = vadd.f32 %v1265_v28, %v3615_v5  ;;  %v1629_v58 = vpop.f32.mrf.mxu2  ;;  %v1531_v46 = vadd.f32 %v1495_v2, %v1401_v6 }
 0x387   :  { %v1879_v1 = vpop.f32.mrf.mxu0  ;;  %v3711_v25 = vadd.f32 %v1395_v19, %v1283_v45  ;;  %v1662_v28 = vadd.f32 %v1626_v52, %v1531_v46  ;;  %v1532_v52 = vadd.f32 %v1498_v55, %v3645_v41 }
 0x389   :  { %v1663_v42 = vadd.f32 %v1629_v58, %v1532_v52 }
 0x38c   :  { %v1749_v43 = vpop.f32.mrf.mxu3 }
 0x38d   :  { %v1789_v5 = vadd.f32 %v1749_v43, %v1659_v50  ;;  %v1631_v35 = vpop.f32.mrf.mxu2  ;;  %v1143_v43 = vadd.f32 %v4048_v63, %v997_v13 }
 0x38f   :  { %v1881_v18 = vpop.f32.mrf.mxu0  ;;  %v1919_v26 = vadd.f32 %v1879_v1, %v1789_v5  ;;  %v1503_v1 = vpop.f32.mrf.mxu1  ;;  %v1273_v2 = vadd.f32 %v3657_v60, %v1143_v43 }
 0x391   :  { %v3726_v15 = vadd.f32 %v3720_v0, %v1919_v26 }
 0x393   :  { %v1955_v10 = vmax.f32 %v3726_v15, 0.0 }
 0x394   :  { %v1751_v33 = vpop.f32.mrf.mxu3 }
 0x395   :  { %v1790_v48 = vadd.f32 %v1751_v33, %v1660_v31  ;;  %v1634_v62 = vpop.f32.mrf.mxu2  ;;  %v1403_v31 = vadd.f32 %v3655_v40, %v1273_v2 }
 0x397   :  { %v1884_v21 = vpop.f32.mrf.mxu0  ;;  %v1920_v54 = vadd.f32 %v1881_v18, %v1790_v48  ;;  %v1505_v33 = vpop.f32.mrf.mxu1  ;;  %v1533_v60 = vadd.f32 %v1500_v22, %v1403_v31 }
 0x399   :  { %v3729_v53 = vadd.f32 %v3720_v0, %v1920_v54  ;;  %v1664_v55 = vadd.f32 %v1631_v35, %v1533_v60  ;;  %v1534_v54 = vadd.f32 %v1503_v1, %v3664_v34 }
 0x39b   :  { %v1956_v4 = vmax.f32 %v3729_v53, 0.0 }
 0x39c   :  { %v1754_v12 = vpop.f32.mrf.mxu3 }
 0x39d   :  { %v2517_v57 = vpack.i.bf16 %v1956_v4, %v1955_v10  ;;  %v1791_v19 = vadd.f32 %v1754_v12, %v1661_v56  ;;  %v1636_v41 = vpop.f32.mrf.mxu2  ;;  %v1665_v56 = vadd.f32 %v1634_v62, %v1534_v54 }
 0x39f   :  { %v1886_v9 = vpop.f32.mrf.mxu0  ;;  %2518 = vrot.lane.b32.xlu2 %v2517_v57, %s2602_s4  ;;  %v1921_v45 = vadd.f32 %v1884_v21, %v1791_v19  ;;  %v1508_v30 = vpop.f32.mrf.mxu1 }
 0x3a0   :  { %v1536_v20 = vadd.f32 %v1508_v30, %v3676_v32 }
 0x3a1   :  { %v3744_v8 = vadd.f32 %v3720_v0, %v1921_v45 }
 0x3a3   :  { %v1957_v29 = vmax.f32 %v3744_v8, 0.0 }
 0x3a4   :  { %v1756_v61 = vpop.f32.mrf.mxu3 }
 0x3a5   :  { %v1792_v3 = vadd.f32 %v1756_v61, %v1662_v28  ;;  %v1639_v22 = vpop.f32.mrf.mxu2 }
 0x3a6   :  { %v1667_v63 = vadd.f32 %v1639_v22, %v1536_v20 }
 0x3a7   :  { %v1889_v17 = vpop.f32.mrf.mxu0  ;;  %v1922_v38 = vadd.f32 %v1886_v9, %v1792_v3  ;;  %v1535_v9 = vadd.f32 %v1505_v33, %v3669_v24  ;;  %v1510_v34 = vpop.f32.mrf.mxu1 }
 0x3a8   :  { %v1537_v52 = vadd.f32 %v1510_v34, %v3679_v27 }
 0x3a9   :  { %v3748_v50 = vadd.f32 %v3720_v0, %v1922_v38  ;;  %v1666_v35 = vadd.f32 %v1636_v41, %v1535_v9 }
 0x3ab   :  { %v1958_v18 = vmax.f32 %v3748_v50, 0.0 }
 0x3ac   :  { %v1759_v5 = vpop.f32.mrf.mxu3 }
 0x3ad   :  { %v2522_v26 = vpack.i.bf16 %v1958_v18, %v1957_v29  ;;  %v1793_v39 = vadd.f32 %v1759_v5, %v1663_v42  ;;  %v1641_v1 = vpop.f32.mrf.mxu2 }
 0x3ae   :  { %v1668_v42 = vadd.f32 %v1641_v1, %v1537_v52 }
 0x3af   :  { %v1891_v59 = vpop.f32.mrf.mxu0  ;;  %2523 = vrot.lane.b32.xlu0 %v2522_v26, %s2602_s4  ;;  %v1923_v7 = vadd.f32 %v1889_v17, %v1793_v39  ;;  %v1513_v38 = vpop.f32.mrf.mxu1 }
 0x3b1   :  { %v3761_v58 = vadd.f32 %v3720_v0, %v1923_v7 }
 0x3b3   :  { %v1959_v36 = vmax.f32 %v3761_v58, 0.0 }
 0x3b4   :  { %v1761_v48 = vpop.f32.mrf.mxu3 }
 0x3b5   :  { %v1794_v21 = vadd.f32 %v1761_v48, %v1664_v55  ;;  %v1644_v32 = vpop.f32.mrf.mxu2  ;;  %v1538_v55 = vadd.f32 %v1513_v38, %v3686_v51 }
 0x3b7   :  { %v1894_v49 = vpop.f32.mrf.mxu0  ;;  %v1924_v40 = vadd.f32 %v1891_v59, %v1794_v21  ;;  %v1515_v59 = vpop.f32.mrf.mxu1 }
 0x3b8   :  { %v1539_v22 = vadd.f32 %v1515_v59, %v3689_v23 }
 0x3b9   :  { %v3765_v16 = vadd.f32 %v3720_v0, %v1924_v40  ;;  %v1669_v40 = vadd.f32 %v1644_v32, %v1538_v55 }
 0x3bb   :  { %v1960_v47 = vmax.f32 %v3765_v16, 0.0 }
 0x3bc   :  { %v1764_v12 = vpop.f32.mrf.mxu3 }
 0x3bd   :  { %v2527_v6 = vpack.i.bf16 %v1960_v47, %v1959_v36  ;;  %v1795_v19 = vadd.f32 %v1764_v12, %v1665_v56  ;;  %v1646_v27 = vpop.f32.mrf.mxu2 }
 0x3be   :  { %v1670_v56 = vadd.f32 %v1646_v27, %v1539_v22 }
 0x3bf   :  { %v1896_v57 = vpop.f32.mrf.mxu0  ;;  %2528 = vrot.lane.b32.xlu1 %v2527_v6, %s2602_s4  ;;  %v1925_v46 = vadd.f32 %v1894_v49, %v1795_v19  ;;  %v1518_v51 = vpop.f32.mrf.mxu1 }
 0x3c1   :  { %v3776_v3 = vadd.f32 %v3720_v0, %v1925_v46 }
 0x3c3   :  { %v1961_v24 = vmax.f32 %v3776_v3, 0.0 }
 0x3c4   :  { %v1766_v28 = vpop.f32.mrf.mxu3 }
 0x3c5   :  { %v1796_v45 = vadd.f32 %v1766_v28, %v1666_v35  ;;  %v1540_v28 = vadd.f32 %v1518_v51, %v3696_v37 }
 0x3c7   :  { %v1899_v61 = vpop.f32.mrf.mxu0  ;;  %v1926_v17 = vadd.f32 %v1896_v57, %v1796_v45  ;;  %v1649_v57 = vpop.f32.mrf.mxu2 }
 0x3c8   :  { %v1520_v23 = vpop.f32.mrf.mxu1  ;;  %v1671_v20 = vadd.f32 %v1649_v57, %v1540_v28 }
 0x3c9   :  { %v3780_v11 = vadd.f32 %v3720_v0, %v1926_v17 }
 0x3cb   :  { %v1962_v13 = vmax.f32 %v3780_v11, 0.0 }
 0x3cc   :  { %v1769_v62 = vpop.f32.mrf.mxu3 }
 0x3cd   :  { %v2532_v43 = vpack.i.bf16 %v1962_v13, %v1961_v24  ;;  %v1797_v5 = vadd.f32 %v1769_v62, %v1667_v63  ;;  %v1541_v63 = vadd.f32 %v1520_v23, %v3699_v14 }
 0x3cf   :  { %v1901_v2 = vpop.f32.mrf.mxu0  ;;  %2533 = vrot.lane.b32.xlu2 %v2532_v43, %s2602_s4  ;;  %v1927_v31 = vadd.f32 %v1899_v61, %v1797_v5  ;;  %v1651_v62 = vpop.f32.mrf.mxu2 }
 0x3d0   :  { %v1523_v5 = vpop.f32.mrf.mxu1 }
 0x3d1   :  { %v3791_v60 = vadd.f32 %v3720_v0, %v1927_v31  ;;  %v1542_v59 = vadd.f32 %v1523_v5, %v3706_v44 }
 0x3d3   :  { %v1963_v48 = vmax.f32 %v3791_v60, 0.0 }
 0x3d4   :  { %v1771_v26 = vpop.f32.mrf.mxu3 }
 0x3d5   :  { %v1798_v33 = vadd.f32 %v1771_v26, %v1668_v42 }
 0x3d7   :  { %v1904_v39 = vpop.f32.mrf.mxu0  ;;  %v1928_v41 = vadd.f32 %v1901_v2, %v1798_v33  ;;  %v1672_v2 = vadd.f32 %v1651_v62, %v1541_v63  ;;  %v1654_v33 = vpop.f32.mrf.mxu2 }
 0x3d8   :  { %v1673_v22 = vadd.f32 %v1654_v33, %v1542_v59  ;;  %v1525_v51 = vpop.f32.mrf.mxu1 }
 0x3d9   :  { %v3795_v7 = vadd.f32 %v3720_v0, %v1928_v41 }
 0x3db   :  { %v1964_v21 = vmax.f32 %v3795_v7, 0.0 }
 0x3dc   :  { %v1774_v49 = vpop.f32.mrf.mxu3 }
 0x3dd   :  { %v2537_v30 = vpack.i.bf16 %v1964_v21, %v1963_v48  ;;  %v1799_v12 = vadd.f32 %v1774_v49, %v1669_v40 }
 0x3df   :  { %v1906_v54 = vpop.f32.mrf.mxu0  ;;  %2538 = vrot.lane.b32.xlu0 %v2537_v30, %s2602_s4  ;;  %v1929_v6 = vadd.f32 %v1904_v39, %v1799_v12  ;;  %v1656_v53 = vpop.f32.mrf.mxu2 }
 0x3e1   :  { %v3806_v34 = vadd.f32 %v3720_v0, %v1929_v6  ;;  %v1543_v6 = vadd.f32 %v1525_v51, %v3711_v25 }
 0x3e3   :  { %v1965_v1 = vmax.f32 %v3806_v34, 0.0 }
 0x3e4   :  { %v1776_v9 = vpop.f32.mrf.mxu3 }
 0x3e5   :  { %v1800_v19 = vadd.f32 %v1776_v9, %v1670_v56 }
 0x3e7   :  { %v1930_v35 = vadd.f32 %v1906_v54, %v1800_v19  ;;  %v1909_v46 = vpop.f32.mrf.mxu0 }
 0x3e9   :  { %v3810_v45 = vadd.f32 %v3720_v0, %v1930_v35 }
 0x3eb   :  { %v1966_v61 = vmax.f32 %v3810_v45, 0.0 }
 0x3ec   :  { %v1779_v17 = vpop.f32.mrf.mxu3 }
 0x3ed   :  { %v2542_v38 = vpack.i.bf16 %v1966_v61, %v1965_v1  ;;  %v1801_v43 = vadd.f32 %v1779_v17, %v1671_v20 }
 0x3ef   :  { %2543 = vrot.lane.b32.xlu1 %v2542_v38, %s2602_s4  ;;  %v1911_v37 = vpop.f32.mrf.mxu0  ;;  %v1931_v52 = vadd.f32 %v1909_v46, %v1801_v43 }
 0x3f1   :  { %v3821_v31 = vadd.f32 %v3720_v0, %v1931_v52 }
 0x3f3   :  { %v1967_v27 = vmax.f32 %v3821_v31, 0.0 }
 0x3f4   :  { %v1781_v32 = vpop.f32.mrf.mxu3 }
 0x3f5   :  { %v1802_v42 = vadd.f32 %v1781_v32, %v1672_v2 }
 0x3f7   :  { %v1932_v26 = vadd.f32 %v1911_v37, %v1802_v42  ;;  %v1914_v40 = vpop.f32.mrf.mxu0 }
 0x3f9   :  { %v3825_v39 = vadd.f32 %v3720_v0, %v1932_v26  ;;  %v2519_v14 = vpop.permute.xlu2 %2518 }
 0x3fa   :  { %v2521_v41 = vunpack.i.h.bf16 %v2519_v14  ;;  %v2520_v55 = vunpack.i.l.bf16 %v2519_v14 }
 0x3fb   :  { %v1968_v49 = vmax.f32 %v3825_v39, 0.0 }
 0x3fc   :  { %v3831_v30 = vmax.f32 %v1956_v4, %v2521_v41  ;;  %v3835_v54 = vmax.f32 %v1955_v10, %v2520_v55  ;;  %v1784_v44 = vpop.f32.mrf.mxu3  ;;  %v1674_v4 = vadd.f32 %v1656_v53, %v1543_v6 }
 0x3fd   :  { %v2547_v12 = vpack.i.bf16 %v1968_v49, %v1967_v27  ;;  %v1803_v57 = vadd.f32 %v1784_v44, %v1673_v22 }
 0x3fe   :  { %v2557_v56 = vpack.i.bf16 %v3831_v30, %v3835_v54 }
 0x3ff   :  { %2548 = vrot.lane.b32.xlu2 %v2547_v12, %s2602_s4  ;;  %v1933_v9 = vadd.f32 %v1914_v40, %v1803_v57  ;;  %v1916_v19 = vpop.f32.mrf.mxu0 }
 0x400   :  { %2558 = vrot.lane.b32.xlu1 %v2557_v56, %s2599_s13 }
 0x401   :  { %v3843_v35 = vadd.f32 %v3720_v0, %v1933_v9 }
 0x403   :  { %v1969_v25 = vmax.f32 %v3843_v35, 0.0 }
 0x404   :  { %v1786_v15 = vpop.f32.mrf.mxu3 }
 0x405   :  { %v1804_v10 = vadd.f32 %v1786_v15, %v1674_v4 }
 0x407   :  { %v1934_v46 = vadd.f32 %v1916_v19, %v1804_v10 }
 0x409   :  { %v3846_v28 = vadd.f32 %v3720_v0, %v1934_v46 }
 0x40b   :  { %v1970_v23 = vmax.f32 %v3846_v28, 0.0 }
 0x40d   :  { %v2552_v17 = vpack.i.bf16 %v1970_v23, %v1969_v25 }
 0x40f   :  { %2553 = vrot.lane.b32.xlu0 %v2552_v17, %s2602_s4 }
 0x421   :  { %v2524_v20 = vpop.permute.xlu0 %2523 }
 0x422   :  { %v2526_v38 = vunpack.i.h.bf16 %v2524_v20  ;;  %v2525_v62 = vunpack.i.l.bf16 %v2524_v20 }
 0x424   :  { %v2038_v63 = vmax.f32 %v1958_v18, %v2526_v38  ;;  %v2037_v43 = vmax.f32 %v1957_v29, %v2525_v62 }
 0x426   :  { %v2562_v0 = vpack.i.bf16 %v2038_v63, %v2037_v43 }
 0x428   :  { %2563 = vrot.lane.b32.xlu2 %v2562_v0, %s2599_s13 }
 0x429   :  { %v2534_v37 = vpop.permute.xlu2 %2533 }
 0x42a   :  { %v2536_v2 = vunpack.i.h.bf16 %v2534_v37  ;;  %v2535_v52 = vunpack.i.l.bf16 %v2534_v37 }
 0x42c   :  { %v2042_v5 = vmax.f32 %v1962_v13, %v2536_v2  ;;  %v2041_v32 = vmax.f32 %v1961_v24, %v2535_v52 }
 0x42e   :  { %v2572_v42 = vpack.i.bf16 %v2042_v5, %v2041_v32 }
 0x430   :  { %2573 = vrot.lane.b32.xlu1 %v2572_v42, %s2599_s13 }
 0x431   :  { %v2529_v50 = vpop.permute.xlu1 %2528 }
 0x432   :  { %v2531_v18 = vunpack.i.h.bf16 %v2529_v50  ;;  %v2530_v31 = vunpack.i.l.bf16 %v2529_v50 }
 0x434   :  { %v3865_v8 = vmax.f32 %v1960_v47, %v2531_v18  ;;  %v3869_v29 = vmax.f32 %v1959_v36, %v2530_v31 }
 0x436   :  { %v2567_v11 = vpack.i.bf16 %v3865_v8, %v3869_v29 }
 0x438   :  { %2568 = vrot.lane.b32.xlu0 %v2567_v11, %s2599_s13 }
 0x451   :  { %v2539_v3 = vpop.permute.xlu0 %2538 }
 0x452   :  { %v2541_v24 = vunpack.i.h.bf16 %v2539_v3  ;;  %v2540_v13 = vunpack.i.l.bf16 %v2539_v3 }
 0x454   :  { %v3876_v26 = vmax.f32 %v1964_v21, %v2541_v24  ;;  %v3880_v16 = vmax.f32 %v1963_v48, %v2540_v13 }
 0x456   :  { %v2577_v58 = vpack.i.bf16 %v3876_v26, %v3880_v16 }
 0x458   :  { %2578 = vrot.lane.b32.xlu2 %v2577_v58, %s2599_s13 }
 0x459   :  { %v2549_v36 = vpop.permute.xlu2 %2548 }
 0x45a   :  { %v2551_v47 = vunpack.i.h.bf16 %v2549_v36  ;;  %v2550_v33 = vunpack.i.l.bf16 %v2549_v36 }
 0x45c   :  { %v3885_v59 = vmax.f32 %v1968_v49, %v2551_v47  ;;  %v3887_v39 = vmax.f32 %v1967_v27, %v2550_v33 }
 0x45e   :  { %v2587_v7 = vpack.i.bf16 %v3885_v59, %v3887_v39 }
 0x460   :  { %2588 = vrot.lane.b32.xlu1 %v2587_v7, %s2599_s13 }
 0x461   :  { %v2544_v60 = vpop.permute.xlu1 %2543 }
 0x462   :  { %v2546_v48 = vunpack.i.h.bf16 %v2544_v60  ;;  %v2545_v21 = vunpack.i.l.bf16 %v2544_v60 }
 0x464   :  { %v3894_v14 = vmax.f32 %v1966_v61, %v2546_v48  ;;  %v3898_v41 = vmax.f32 %v1965_v1, %v2545_v21 }
 0x466   :  { %v2582_v55 = vpack.i.bf16 %v3894_v14, %v3898_v41 }
 0x468   :  { %2583 = vrot.lane.b32.xlu0 %v2582_v55, %s2599_s13 }
 0x472   :  { %v2559_v27 = vpop.permute.xlu1 %2558 }
 0x473   :  { %v2561_v49 = vunpack.i.h.bf16 %v2559_v27  ;;  %v2560_v40 = vunpack.i.l.bf16 %v2559_v27 }
 0x475   :  { %v2116_v44 = vmax.f32 %v3831_v30, %v2561_v49  ;;  %v2115_v22 = vmax.f32 %v3835_v54, %v2560_v40 }
 0x477   :  { %v2132_v45 = vpack.c.bf16 %v2116_v44, %v2116_v44  ;;  %v2131_v61 = vpack.c.bf16 %v2115_v22, %v2115_v22 }
 0x479   :  { %2149 = vst.msk [vmem:[%s3985_s5 + $0x4] sm:$0xf] %vm2147_vm3, %v2132_v45 }
 0x47a   :  { %2148 = vst.msk [vmem:[%s3985_s5] sm:$0xf] %vm2147_vm3, %v2131_v61 }
 0x481   :  { %v2554_v34 = vpop.permute.xlu0 %2553 }
 0x482   :  { %v2556_v1 = vunpack.i.h.bf16 %v2554_v34  ;;  %v2555_v12 = vunpack.i.l.bf16 %v2554_v34  ;;  %v2564_v51 = vpop.permute.xlu2 %2563 }
 0x483   :  { %v2566_v30 = vunpack.i.h.bf16 %v2564_v51  ;;  %v2565_v56 = vunpack.i.l.bf16 %v2564_v51 }
 0x484   :  { %v2050_v54 = vmax.f32 %v1970_v23, %v2556_v1  ;;  %v2049_v6 = vmax.f32 %v1969_v25, %v2555_v12 }
 0x485   :  { %v2118_v57 = vmax.f32 %v2038_v63, %v2566_v30  ;;  %v2117_v53 = vmax.f32 %v2037_v43, %v2565_v56 }
 0x486   :  { %v2592_v4 = vpack.i.bf16 %v2050_v54, %v2049_v6 }
 0x487   :  { %v2134_v9 = vpack.c.bf16 %v2118_v57, %v2118_v57  ;;  %v2133_v15 = vpack.c.bf16 %v2117_v53, %v2117_v53 }
 0x488   :  { %2593 = vrot.lane.b32.xlu2 %v2592_v4, %s2599_s13 }
 0x489   :  { %2151 = vst.msk [vmem:[%s3985_s5 + $0xc] sm:$0xf] %vm2147_vm3, %v2134_v9 }
 0x48a   :  { %2150 = vst.msk [vmem:[%s3985_s5 + $0x8] sm:$0xf] %vm2147_vm3, %v2133_v15 }
 0x4a2   :  { %v2574_v10 = vpop.permute.xlu1 %2573 }
 0x4a3   :  { %v2576_v19 = vunpack.i.h.bf16 %v2574_v10  ;;  %v2575_v35 = vunpack.i.l.bf16 %v2574_v10 }
 0x4a5   :  { %v2122_v46 = vmax.f32 %v2042_v5, %v2576_v19  ;;  %v2121_v28 = vmax.f32 %v2041_v32, %v2575_v35 }
 0x4a7   :  { %v2138_v25 = vpack.c.bf16 %v2122_v46, %v2122_v46  ;;  %v2137_v23 = vpack.c.bf16 %v2121_v28, %v2121_v28 }
 0x4a9   :  { %2155 = vst.msk [vmem:[%s3985_s5 + $0x1c] sm:$0xf] %vm2147_vm3, %v2138_v25 }
 0x4aa   :  { %2154 = vst.msk [vmem:[%s3985_s5 + $0x18] sm:$0xf] %vm2147_vm3, %v2137_v23  ;;  %v2569_v17 = vpop.permute.xlu0 %2568 }
 0x4ab   :  { %v2571_v20 = vunpack.i.h.bf16 %v2569_v17  ;;  %v2570_v38 = vunpack.i.l.bf16 %v2569_v17 }
 0x4ad   :  { %v2120_v62 = vmax.f32 %v3865_v8, %v2571_v20  ;;  %v2119_v63 = vmax.f32 %v3869_v29, %v2570_v38 }
 0x4af   :  { %v2136_v43 = vpack.c.bf16 %v2120_v62, %v2120_v62  ;;  %v2135_v0 = vpack.c.bf16 %v2119_v63, %v2119_v63 }
 0x4b1   :  { %2153 = vst.msk [vmem:[%s3985_s5 + $0x14] sm:$0xf] %vm2147_vm3, %v2136_v43 }
 0x4b2   :  { %2152 = vst.msk [vmem:[%s3985_s5 + $0x10] sm:$0xf] %vm2147_vm3, %v2135_v0  ;;  %v2579_v37 = vpop.permute.xlu2 %2578 }
 0x4b3   :  { %v2581_v2 = vunpack.i.h.bf16 %v2579_v37  ;;  %v2580_v52 = vunpack.i.l.bf16 %v2579_v37 }
 0x4b5   :  { %v2124_v5 = vmax.f32 %v3876_v26, %v2581_v2  ;;  %v2123_v32 = vmax.f32 %v3880_v16, %v2580_v52 }
 0x4b7   :  { %v2140_v42 = vpack.c.bf16 %v2124_v5, %v2124_v5  ;;  %v2139_v50 = vpack.c.bf16 %v2123_v32, %v2123_v32 }
 0x4b9   :  { %2157 = vst.msk [vmem:[%s3985_s5 + $0x24] sm:$0xf] %vm2147_vm3, %v2140_v42 }
 0x4ba   :  { %2156 = vst.msk [vmem:[%s3985_s5 + $0x20] sm:$0xf] %vm2147_vm3, %v2139_v50 }
 0x4d2   :  { %v2589_v18 = vpop.permute.xlu1 %2588 }
 0x4d3   :  { %v2591_v31 = vunpack.i.h.bf16 %v2589_v18  ;;  %v2590_v8 = vunpack.i.l.bf16 %v2589_v18 }
 0x4d5   :  { %v2128_v29 = vmax.f32 %v3885_v59, %v2591_v31  ;;  %v2127_v11 = vmax.f32 %v3887_v39, %v2590_v8 }
 0x4d7   :  { %v2144_v3 = vpack.c.bf16 %v2128_v29, %v2128_v29  ;;  %v2143_v24 = vpack.c.bf16 %v2127_v11, %v2127_v11 }
 0x4d9   :  { %2161 = vst.msk [vmem:[%s3985_s5 + $0x34] sm:$0xf] %vm2147_vm3, %v2144_v3 }
 0x4da   :  { %2160 = vst.msk [vmem:[%s3985_s5 + $0x30] sm:$0xf] %vm2147_vm3, %v2143_v24  ;;  %v2584_v13 = vpop.permute.xlu0 %2583 }
 0x4db   :  { %v2586_v26 = vunpack.i.h.bf16 %v2584_v13  ;;  %v2585_v16 = vunpack.i.l.bf16 %v2584_v13 }
 0x4dd   :  { %v2126_v58 = vmax.f32 %v3894_v14, %v2586_v26  ;;  %v2125_v36 = vmax.f32 %v3898_v41, %v2585_v16 }
 0x4df   :  { %v2142_v47 = vpack.c.bf16 %v2126_v58, %v2126_v58  ;;  %v2141_v33 = vpack.c.bf16 %v2125_v36, %v2125_v36 }
 0x4e1   :  { %2159 = vst.msk [vmem:[%s3985_s5 + $0x2c] sm:$0xf] %vm2147_vm3, %v2142_v47 }
 0x4e2   :  { %2158 = vst.msk [vmem:[%s3985_s5 + $0x28] sm:$0xf] %vm2147_vm3, %v2141_v33  ;;  %v2594_v59 = vpop.permute.xlu2 %2593 }
 0x4e3   :  { %v2596_v39 = vunpack.i.h.bf16 %v2594_v59  ;;  %v2595_v7 = vunpack.i.l.bf16 %v2594_v59 }
 0x4e5   :  { %v2130_v60 = vmax.f32 %v2050_v54, %v2596_v39  ;;  %v2129_v48 = vmax.f32 %v2049_v6, %v2595_v7 }
 0x4e7   :  { %v2146_v21 = vpack.c.bf16 %v2130_v60, %v2130_v60  ;;  %v2145_v14 = vpack.c.bf16 %v2129_v48, %v2129_v48 }
 0x4e9   :  { %2163 = vst.msk [vmem:[%s3985_s5 + $0x3c] sm:$0xf] %vm2147_vm3, %v2146_v21 }
 0x4ea   :  { %2162 = vst.msk [vmem:[%s3985_s5 + $0x38] sm:$0xf] %vm2147_vm3, %v2145_v14 }

// kernel: forward.3
= control target key start
LH: loop header
LB: loop body
LE: loop exit
PB: predicated region body
PF: predicated region fallthrough
CT: control target
= control target key end

     0   :  { %s4318_s0 = inlined_call_operand.vmem [shape: bf16[2,1024], index: 0, kind: input, shape index: {}]   ;;  %s4319_s1 = inlined_call_operand.vmem [shape: bf16[1024,384], index: 1, kind: input, shape index: {}]   ;;  %s4320_s2 = inlined_call_operand.vmem [shape: f32[1,384], index: 2, kind: input, shape index: {}]   ;;  %s4321_s3 = inlined_call_operand.vmem [shape: bf16[384,128], index: 3, kind: input, shape index: {}]   ;;  %s4322_s4 = inlined_call_operand.vmem [shape: f32[1,128], index: 4, kind: input, shape index: {}]   ;;  %s4323_s5 = inlined_call_operand.hbm [shape: f32[2,128], index: 5, kind: output, shape index: {}]  }
   0x1   :  { %v1984_v0 = vld [vmem:[%s4319_s1 + $0xa8] sm:$0xf]  ;;  %v2784_v1 = vld [vmem:[%s4319_s1 + $0xb0] sm:$0xf0]  ;;  %v1972_v11 = vld [vmem:[%s4319_s1 + $0x90] sm:$0xf] }
   0x2   :  { %v2080_v2 = vld [vmem:[%s4319_s1 + $0x168] sm:$0xf]  ;;  %v1985_v3 = vor.u32 %v2784_v1, %v1984_v0  ;;  %v2808_v4 = vld [vmem:[%s4319_s1 + $0x170] sm:$0xf0]  ;;  %v2781_v13 = vld [vmem:[%s4319_s1 + $0x98] sm:$0xf0] }
   0x3   :  { %v2176_v5 = vld [vmem:[%s4319_s1 + $0x228] sm:$0xf]  ;;  %v2832_v6 = vld [vmem:[%s4319_s1 + $0x230] sm:$0xf0]  ;;  %v2081_v7 = vor.u32 %v2808_v4, %v2080_v2  ;;  %v2068_v14 = vld [vmem:[%s4319_s1 + $0x150] sm:$0xf]  ;;  %v1973_v16 = vor.u32 %v2781_v13, %v1972_v11 }
   0x4   :  { %v2177_v8 = vor.u32 %v2832_v6, %v2176_v5  ;;  %v2272_v9 = vld [vmem:[%s4319_s1 + $0x2e8] sm:$0xf]  ;;  %v2856_v10 = vld [vmem:[%s4319_s1 + $0x2f0] sm:$0xf0]  ;;  %1328 = vmatpush.bf16.msra.mxu0 %v1985_v3  ;;  %v2805_v15 = vld [vmem:[%s4319_s1 + $0x158] sm:$0xf0] }
   0x5   :  { %v2273_v12 = vor.u32 %v2856_v10, %v2272_v9  ;;  %1341 = vmatpush.bf16.msra.mxu1 %v2081_v7  ;;  %v2069_v17 = vor.u32 %v2805_v15, %v2068_v14  ;;  %v2164_v18 = vld [vmem:[%s4319_s1 + $0x210] sm:$0xf]  ;;  %v2829_v19 = vld [vmem:[%s4319_s1 + $0x218] sm:$0xf0]  ;;  %v1960_v23 = vld [vmem:[%s4319_s1 + $0x78] sm:$0xf] }
   0x6   :  { %1354 = vmatpush.bf16.msra.mxu2 %v2177_v8  ;;  %v2260_v20 = vld [vmem:[%s4319_s1 + $0x2d0] sm:$0xf]  ;;  %v2165_v21 = vor.u32 %v2829_v19, %v2164_v18  ;;  %v2853_v22 = vld [vmem:[%s4319_s1 + $0x2d8] sm:$0xf0]  ;;  %v2778_v24 = vld [vmem:[%s4319_s1 + $0x80] sm:$0xf0] }
   0x7   :  { %1367 = vmatpush.bf16.msra.mxu3 %v2273_v12  ;;  %v2261_v25 = vor.u32 %v2853_v22, %v2260_v20  ;;  %v2056_v26 = vld [vmem:[%s4319_s1 + $0x138] sm:$0xf]  ;;  %v2802_v27 = vld [vmem:[%s4319_s1 + $0x140] sm:$0xf0]  ;;  %v1961_v29 = vor.u32 %v2778_v24, %v1960_v23  ;;  %v1948_v35 = vld [vmem:[%s4319_s1 + $0x60] sm:$0xf] }
   0x8   :  { %v2152_v28 = vld [vmem:[%s4319_s1 + $0x1f8] sm:$0xf]  ;;  %1329 = vmatpush.bf16.msra.mxu0 %v1973_v16  ;;  %v2826_v30 = vld [vmem:[%s4319_s1 + $0x200] sm:$0xf0]  ;;  %v2057_v33 = vor.u32 %v2802_v27, %v2056_v26  ;;  %v2775_v36 = vld [vmem:[%s4319_s1 + $0x68] sm:$0xf0] }
   0x9   :  { %v2248_v31 = vld [vmem:[%s4319_s1 + $0x2b8] sm:$0xf]  ;;  %v2850_v32 = vld [vmem:[%s4319_s1 + $0x2c0] sm:$0xf0]  ;;  %1342 = vmatpush.bf16.msra.mxu1 %v2069_v17  ;;  %v2153_v34 = vor.u32 %v2826_v30, %v2152_v28  ;;  %v2044_v37 = vld [vmem:[%s4319_s1 + $0x120] sm:$0xf]  ;;  %v1949_v44 = vor.u32 %v2775_v36, %v1948_v35 }
   0xa   :  { %1355 = vmatpush.bf16.msra.mxu2 %v2165_v21  ;;  %v2249_v38 = vor.u32 %v2850_v32, %v2248_v31  ;;  %v2799_v39 = vld [vmem:[%s4319_s1 + $0x128] sm:$0xf0]  ;;  %v2140_v40 = vld [vmem:[%s4319_s1 + $0x1e0] sm:$0xf]  ;;  %v1936_v47 = vld [vmem:[%s4319_s1 + $0x48] sm:$0xf] }
   0xb   :  { %1368 = vmatpush.bf16.msra.mxu3 %v2261_v25  ;;  %v2823_v41 = vld [vmem:[%s4319_s1 + $0x1e8] sm:$0xf0]  ;;  %v2236_v42 = vld [vmem:[%s4319_s1 + $0x2a0] sm:$0xf]  ;;  %v2045_v45 = vor.u32 %v2799_v39, %v2044_v37  ;;  %v2772_v48 = vld [vmem:[%s4319_s1 + $0x50] sm:$0xf0] }
   0xc   :  { %v2847_v43 = vld [vmem:[%s4319_s1 + $0x2a8] sm:$0xf0]  ;;  %1330 = vmatpush.bf16.msra.mxu0 %v1961_v29  ;;  %v2141_v46 = vor.u32 %v2823_v41, %v2140_v40  ;;  %v2032_v49 = vld [vmem:[%s4319_s1 + $0x108] sm:$0xf]  ;;  %v2796_v51 = vld [vmem:[%s4319_s1 + $0x110] sm:$0xf0]  ;;  %v1937_v56 = vor.u32 %v2772_v48, %v1936_v47 }
   0xd   :  { %1343 = vmatpush.bf16.msra.mxu1 %v2057_v33  ;;  %v2237_v50 = vor.u32 %v2847_v43, %v2236_v42  ;;  %v2128_v52 = vld [vmem:[%s4319_s1 + $0x1c8] sm:$0xf]  ;;  %v2820_v53 = vld [vmem:[%s4319_s1 + $0x1d0] sm:$0xf0]  ;;  %v2033_v57 = vor.u32 %v2796_v51, %v2032_v49  ;;  %v1924_v59 = vld [vmem:[%s4319_s1 + $0x30] sm:$0xf] }
   0xe   :  { %1356 = vmatpush.bf16.msra.mxu2 %v2153_v34  ;;  %v2224_v54 = vld [vmem:[%s4319_s1 + $0x288] sm:$0xf]  ;;  %v2844_v55 = vld [vmem:[%s4319_s1 + $0x290] sm:$0xf0]  ;;  %v2129_v58 = vor.u32 %v2820_v53, %v2128_v52  ;;  %v2769_v60 = vld [vmem:[%s4319_s1 + $0x38] sm:$0xf0] }
   0xf   :  { %1369 = vmatpush.bf16.msra.mxu3 %v2249_v38  ;;  %v2020_v61 = vld [vmem:[%s4319_s1 + $0xf0] sm:$0xf]  ;;  %v2225_v62 = vor.u32 %v2844_v55, %v2224_v54  ;;  %v2793_v63 = vld [vmem:[%s4319_s1 + $0xf8] sm:$0xf0]  ;;  %v1925_v4 = vor.u32 %v2769_v60, %v1924_v59  ;;  %v1912_v7 = vld [vmem:[%s4319_s1 + $0x18] sm:$0xf] }
  0x10   :  { %1331 = vmatpush.bf16.msra.mxu0 %v1949_v44  ;;  %v2116_v0 = vld [vmem:[%s4319_s1 + $0x1b0] sm:$0xf]  ;;  %v2817_v1 = vld [vmem:[%s4319_s1 + $0x1b8] sm:$0xf0]  ;;  %v2021_v5 = vor.u32 %v2793_v63, %v2020_v61  ;;  %v2766_v8 = vld [vmem:[%s4319_s1 + $0x20] sm:$0xf0] }
  0x11   :  { %1344 = vmatpush.bf16.msra.mxu1 %v2045_v45  ;;  %v2212_v2 = vld [vmem:[%s4319_s1 + $0x270] sm:$0xf]  ;;  %v2841_v3 = vld [vmem:[%s4319_s1 + $0x278] sm:$0xf0]  ;;  %v2117_v6 = vor.u32 %v2817_v1, %v2116_v0  ;;  %v2008_v9 = vld [vmem:[%s4319_s1 + $0xd8] sm:$0xf]  ;;  %v1913_v16 = vor.u32 %v2766_v8, %v1912_v7 }
  0x12   :  { %1357 = vmatpush.bf16.msra.mxu2 %v2141_v46  ;;  %v2213_v10 = vor.u32 %v2841_v3, %v2212_v2  ;;  %v2790_v11 = vld [vmem:[%s4319_s1 + $0xe0] sm:$0xf0]  ;;  %v2104_v12 = vld [vmem:[%s4319_s1 + $0x198] sm:$0xf]  ;;  %v1900_v17 = vld [vmem:[%s4319_s1] sm:$0xf] }
  0x13   :  { %1370 = vmatpush.bf16.msra.mxu3 %v2237_v50  ;;  %v2814_v13 = vld [vmem:[%s4319_s1 + $0x1a0] sm:$0xf0]  ;;  %v2200_v14 = vld [vmem:[%s4319_s1 + $0x258] sm:$0xf]  ;;  %v2763_v18 = vld [vmem:[%s4319_s1 + $0x8] sm:$0xf0]  ;;  %v2009_v19 = vor.u32 %v2790_v11, %v2008_v9 }
  0x14   :  { %1332 = vmatpush.bf16.msra.mxu0 %v1937_v56  ;;  %v2838_v15 = vld [vmem:[%s4319_s1 + $0x260] sm:$0xf0]  ;;  %v2105_v20 = vor.u32 %v2814_v13, %v2104_v12  ;;  %v1996_v21 = vld [vmem:[%s4319_s1 + $0xc0] sm:$0xf]  ;;  %v2787_v22 = vld [vmem:[%s4319_s1 + $0xc8] sm:$0xf0]  ;;  %v1901_v31 = vor.u32 %v2763_v18, %v1900_v17 }
  0x15   :  { %1345 = vmatpush.bf16.msra.mxu1 %v2033_v57  ;;  %v2092_v23 = vld [vmem:[%s4319_s1 + $0x180] sm:$0xf]  ;;  %v2201_v24 = vor.u32 %v2838_v15, %v2200_v14  ;;  %v2811_v25 = vld [vmem:[%s4319_s1 + $0x188] sm:$0xf0]  ;;  %v2368_v28 = vld [vmem:[%s4319_s1 + $0x3a8] sm:$0xf]  ;;  %v1997_v35 = vor.u32 %v2787_v22, %v1996_v21 }
  0x16   :  { %1358 = vmatpush.bf16.msra.mxu2 %v2129_v58  ;;  %v2188_v26 = vld [vmem:[%s4319_s1 + $0x240] sm:$0xf]  ;;  %v2835_v27 = vld [vmem:[%s4319_s1 + $0x248] sm:$0xf0]  ;;  %v2880_v29 = vld [vmem:[%s4319_s1 + $0x3b0] sm:$0xf0]  ;;  %v2093_v36 = vor.u32 %v2811_v25, %v2092_v23 }
  0x17   :  { %1371 = vmatpush.bf16.msra.mxu3 %v2225_v62  ;;  %v2464_v30 = vld [vmem:[%s4319_s1 + $0x468] sm:$0xf]  ;;  %v2904_v32 = vld [vmem:[%s4319_s1 + $0x470] sm:$0xf0]  ;;  %v2189_v39 = vor.u32 %v2835_v27, %v2188_v26  ;;  %v2369_v40 = vor.u32 %v2880_v29, %v2368_v28  ;;  %v2356_v43 = vld [vmem:[%s4319_s1 + $0x390] sm:$0xf] }
  0x18   :  { %1333 = vmatpush.bf16.msra.mxu0 %v1925_v4  ;;  %v2560_v33 = vld [vmem:[%s4319_s1 + $0x528] sm:$0xf]  ;;  %v2928_v34 = vld [vmem:[%s4319_s1 + $0x530] sm:$0xf0]  ;;  %v2465_v41 = vor.u32 %v2904_v32, %v2464_v30  ;;  %v2877_v44 = vld [vmem:[%s4319_s1 + $0x398] sm:$0xf0] }
  0x19   :  { %1346 = vmatpush.bf16.msra.mxu1 %v2021_v5  ;;  %v2656_v37 = vld [vmem:[%s4319_s1 + $0x5e8] sm:$0xf]  ;;  %v2952_v38 = vld [vmem:[%s4319_s1 + $0x5f0] sm:$0xf0]  ;;  %v2561_v42 = vor.u32 %v2928_v34, %v2560_v33  ;;  %v2452_v45 = vld [vmem:[%s4319_s1 + $0x450] sm:$0xf]  ;;  %v2357_v52 = vor.u32 %v2877_v44, %v2356_v43 }
  0x1a   :  { %1359 = vmatpush.bf16.msra.mxu2 %v2117_v6  ;;  %v2657_v46 = vor.u32 %v2952_v38, %v2656_v37  ;;  %v2901_v47 = vld [vmem:[%s4319_s1 + $0x458] sm:$0xf0]  ;;  %v2548_v48 = vld [vmem:[%s4319_s1 + $0x510] sm:$0xf]  ;;  %v2344_v53 = vld [vmem:[%s4319_s1 + $0x378] sm:$0xf] }
  0x1b   :  { %1372 = vmatpush.bf16.msra.mxu3 %v2213_v10  ;;  %v2925_v49 = vld [vmem:[%s4319_s1 + $0x518] sm:$0xf0]  ;;  %v2644_v50 = vld [vmem:[%s4319_s1 + $0x5d0] sm:$0xf]  ;;  %v2874_v54 = vld [vmem:[%s4319_s1 + $0x380] sm:$0xf0]  ;;  %v2453_v55 = vor.u32 %v2901_v47, %v2452_v45 }
  0x1c   :  { %1334 = vmatpush.bf16.msra.mxu0 %v1913_v16  ;;  %v2949_v51 = vld [vmem:[%s4319_s1 + $0x5d8] sm:$0xf0]  ;;  %v2549_v56 = vor.u32 %v2925_v49, %v2548_v48  ;;  %v2440_v57 = vld [vmem:[%s4319_s1 + $0x438] sm:$0xf]  ;;  %v2898_v58 = vld [vmem:[%s4319_s1 + $0x440] sm:$0xf0]  ;;  %v2345_v1 = vor.u32 %v2874_v54, %v2344_v53 }
  0x1d   :  { %1347 = vmatpush.bf16.msra.mxu1 %v2009_v19  ;;  %v21_v59 = vld [vmem:[%s4318_s0] sm:$0xff]  ;;  %v2645_v60 = vor.u32 %v2949_v51, %v2644_v50  ;;  %v2536_v61 = vld [vmem:[%s4319_s1 + $0x4f8] sm:$0xf]  ;;  %v2441_v2 = vor.u32 %v2898_v58, %v2440_v57  ;;  %v2871_v5 = vld [vmem:[%s4319_s1 + $0x368] sm:$0xf0] }
  0x1e   :  { %1360 = vmatpush.bf16.msra.mxu2 %v2105_v20  ;;  %v2922_v62 = vld [vmem:[%s4319_s1 + $0x500] sm:$0xf0]  ;;  %287 = vst [vmem:[#allocation1] ss:$9 sm:$0xff] %v21_v59  ;;  %v2632_v63 = vld [vmem:[%s4319_s1 + $0x5b8] sm:$0xf] }
  0x1f   :  { %1373 = vmatpush.bf16.msra.mxu3 %v2201_v24  ;;  %v2946_v0 = vld [vmem:[%s4319_s1 + $0x5c0] sm:$0xf0]  ;;  %v2537_v3 = vor.u32 %v2922_v62, %v2536_v61  ;;  %v2332_v4 = vld [vmem:[%s4319_s1 + $0x360] sm:$0xf]  ;;  %v2895_v8 = vld [vmem:[%s4319_s1 + $0x428] sm:$0xf0] }
  0x20   :  { %1335 = vmatpush.bf16.msra.mxu0 %v1901_v31  ;;  %v2428_v6 = vld [vmem:[%s4319_s1 + $0x420] sm:$0xf]  ;;  %v2633_v7 = vor.u32 %v2946_v0, %v2632_v63  ;;  %v2919_v10 = vld [vmem:[%s4319_s1 + $0x4e8] sm:$0xf0]  ;;  %v2320_v13 = vld [vmem:[%s4319_s1 + $0x348] sm:$0xf]  ;;  %v2333_v14 = vor.u32 %v2871_v5, %v2332_v4 }
  0x21   :  { %1348 = vmatpush.bf16.msra.mxu1 %v1997_v35  ;;  %v2524_v9 = vld [vmem:[%s4319_s1 + $0x4e0] sm:$0xf]  ;;  %v2943_v12 = vld [vmem:[%s4319_s1 + $0x5a8] sm:$0xf0]  ;;  %v2868_v15 = vld [vmem:[%s4319_s1 + $0x350] sm:$0xf0]  ;;  %v2429_v18 = vor.u32 %v2895_v8, %v2428_v6 }
  0x22   :  { %1361 = vmatpush.bf16.msra.mxu2 %v2093_v36  ;;  %v2620_v11 = vld [vmem:[%s4319_s1 + $0x5a0] sm:$0xf]  ;;  %v2416_v16 = vld [vmem:[%s4319_s1 + $0x408] sm:$0xf]  ;;  %v2892_v17 = vld [vmem:[%s4319_s1 + $0x410] sm:$0xf0]  ;;  %v2525_v19 = vor.u32 %v2919_v10, %v2524_v9  ;;  %v2321_v29 = vor.u32 %v2868_v15, %v2320_v13 }
  0x23   :  { %1374 = vmatpush.bf16.msra.mxu3 %v2189_v39  ;;  %v2621_v23 = vor.u32 %v2943_v12, %v2620_v11  ;;  %v2512_v24 = vld [vmem:[%s4319_s1 + $0x4c8] sm:$0xf]  ;;  %v2916_v25 = vld [vmem:[%s4319_s1 + $0x4d0] sm:$0xf0]  ;;  %v2417_v30 = vor.u32 %v2892_v17, %v2416_v16  ;;  %v2308_v32 = vld [vmem:[%s4319_s1 + $0x330] sm:$0xf] }
  0x24   :  { %1380 = vmatpush.bf16.msrb.mxu0 %v2369_v40  ;;  %v2608_v27 = vld [vmem:[%s4319_s1 + $0x588] sm:$0xf]  ;;  %v2940_v28 = vld [vmem:[%s4319_s1 + $0x590] sm:$0xf0]  ;;  %v2513_v31 = vor.u32 %v2916_v25, %v2512_v24  ;;  %v2865_v33 = vld [vmem:[%s4319_s1 + $0x338] sm:$0xf0] }
  0x25   :  { %1393 = vmatpush.bf16.msrb.mxu1 %v2465_v41  ;;  %v3346_v20 = vld [vmem:[#allocation1 + $0x12] sm:$0xff]  ;;  %v3348_v21 = vld [vmem:[#allocation1] sm:$0xff]  ;;  %v3359_v26 = vld [vmem:[#allocation1 + $0x9] sm:$0xff]  ;;  %v2609_v35 = vor.u32 %v2940_v28, %v2608_v27  ;;  %v2309_v41 = vor.u32 %v2865_v33, %v2308_v32 }
  0x26   :  { %1406 = vmatpush.bf16.msrb.mxu2 %v2561_v42  ;;  %v3350_v22 = vld [vmem:[#allocation1 + $0x1b] sm:$0xff]  ;;  %1336 = vmatmul.bf16.vlgmr.msra.gmra.mxu0 %v3348_v21  ;;  %v2404_v34 = vld [vmem:[%s4319_s1 + $0x3f0] sm:$0xf]  ;;  %v2862_v45 = vld [vmem:[%s4319_s1 + $0x320] sm:$0xf0] }
  0x27   :  { %1419 = vmatpush.bf16.msrb.mxu3 %v2657_v46  ;;  %1362 = vmatmul.bf16.vlgmr.msra.gmra.mxu2 %v3346_v20  ;;  %v2889_v36 = vld [vmem:[%s4319_s1 + $0x3f8] sm:$0xf0]  ;;  %v2500_v37 = vld [vmem:[%s4319_s1 + $0x4b0] sm:$0xf]  ;;  %v2296_v44 = vld [vmem:[%s4319_s1 + $0x318] sm:$0xf] }
  0x28   :  { %1381 = vmatpush.bf16.msrb.mxu0 %v2357_v52  ;;  %1375 = vmatmul.bf16.vlgmr.msra.gmra.mxu3 %v3350_v22  ;;  %v2913_v38 = vld [vmem:[%s4319_s1 + $0x4b8] sm:$0xf0]  ;;  %v2596_v39 = vld [vmem:[%s4319_s1 + $0x570] sm:$0xf]  ;;  %v2405_v42 = vor.u32 %v2889_v36, %v2404_v34  ;;  %v2392_v46 = vld [vmem:[%s4319_s1 + $0x3d8] sm:$0xf]  ;;  %v2297_v53 = vor.u32 %v2862_v45, %v2296_v44 }
  0x29   :  { %1394 = vmatpush.bf16.msrb.mxu1 %v2453_v55  ;;  %v2937_v40 = vld [vmem:[%s4319_s1 + $0x578] sm:$0xf0]  ;;  %v2501_v43 = vor.u32 %v2913_v38, %v2500_v37  ;;  %v2886_v48 = vld [vmem:[%s4319_s1 + $0x3e0] sm:$0xf0]  ;;  %v2488_v49 = vld [vmem:[%s4319_s1 + $0x498] sm:$0xf] }
  0x2a   :  { %1407 = vmatpush.bf16.msrb.mxu2 %v2549_v56  ;;  %1349 = vmatmul.bf16.vlgmr.msra.gmra.mxu1 %v3359_v26  ;;  %v2597_v47 = vor.u32 %v2937_v40, %v2596_v39  ;;  %v2910_v50 = vld [vmem:[%s4319_s1 + $0x4a0] sm:$0xf0]  ;;  %v2584_v51 = vld [vmem:[%s4319_s1 + $0x558] sm:$0xf]  ;;  %v2284_v54 = vld [vmem:[%s4319_s1 + $0x300] sm:$0xf]  ;;  %v2393_v56 = vor.u32 %v2886_v48, %v2392_v46 }
  0x2b   :  { %1420 = vmatpush.bf16.msrb.mxu3 %v2645_v60  ;;  %v2934_v52 = vld [vmem:[%s4319_s1 + $0x560] sm:$0xf0]  ;;  %v2859_v55 = vld [vmem:[%s4319_s1 + $0x308] sm:$0xf0]  ;;  %v2489_v57 = vor.u32 %v2910_v50, %v2488_v49  ;;  %v2380_v58 = vld [vmem:[%s4319_s1 + $0x3c0] sm:$0xf] }
  0x2c   :  { %1382 = vmatpush.bf16.msrb.mxu0 %v2345_v1  ;;  %v2883_v59 = vld [vmem:[%s4319_s1 + $0x3c8] sm:$0xf0]  ;;  %v2476_v60 = vld [vmem:[%s4319_s1 + $0x480] sm:$0xf]  ;;  %v2585_v61 = vor.u32 %v2934_v52, %v2584_v51  ;;  %v2285_v4 = vor.u32 %v2859_v55, %v2284_v54  ;;  %v2082_v5 = vld [vmem:[%s4319_s1 + $0x174] sm:$0xf0] }
  0x2d   :  { %1395 = vmatpush.bf16.msrb.mxu1 %v2441_v2  ;;  %v2907_v62 = vld [vmem:[%s4319_s1 + $0x488] sm:$0xf0]  ;;  %v2572_v63 = vld [vmem:[%s4319_s1 + $0x540] sm:$0xf]  ;;  %v1986_v2 = vld [vmem:[%s4319_s1 + $0xb4] sm:$0xf0]  ;;  %v2381_v8 = vor.u32 %v2883_v59, %v2380_v58 }
  0x2e   :  { %1408 = vmatpush.bf16.msrb.mxu2 %v2537_v3  ;;  %v2931_v0 = vld [vmem:[%s4319_s1 + $0x548] sm:$0xf0]  ;;  %v2477_v9 = vor.u32 %v2907_v62, %v2476_v60  ;;  %v2274_v11 = vld [vmem:[%s4319_s1 + $0x2f4] sm:$0xf0]  ;;  %v2780_v16 = vld [vmem:[%s4319_s1 + $0x94] sm:$0xf] }
  0x2f   :  { %1421 = vmatpush.bf16.msrb.mxu3 %v2633_v7  ;;  %v2783_v1 = vld [vmem:[%s4319_s1 + $0xac] sm:$0xf]  ;;  %v2178_v7 = vld [vmem:[%s4319_s1 + $0x234] sm:$0xf0]  ;;  %v2573_v12 = vor.u32 %v2931_v0, %v2572_v63  ;;  %v1974_v17 = vld [vmem:[%s4319_s1 + $0x9c] sm:$0xf0] }
  0x30   :  { %1383 = vmatpush.bf16.msrb.mxu0 %v2333_v14  ;;  %v2807_v3 = vld [vmem:[%s4319_s1 + $0x16c] sm:$0xf]  ;;  %v1989_v13 = vor.u32 %v2783_v1, %v1986_v2  ;;  %v2828_v24 = vld [vmem:[%s4319_s1 + $0x214] sm:$0xf]  ;;  %v2166_v25 = vld [vmem:[%s4319_s1 + $0x21c] sm:$0xf0] }
  0x31   :  { %1396 = vmatpush.bf16.msrb.mxu1 %v2429_v18  ;;  %v2831_v6 = vld [vmem:[%s4319_s1 + $0x22c] sm:$0xf]  ;;  %v2085_v14 = vor.u32 %v2807_v3, %v2082_v5  ;;  %v2804_v18 = vld [vmem:[%s4319_s1 + $0x154] sm:$0xf]  ;;  %v2262_v28 = vld [vmem:[%s4319_s1 + $0x2dc] sm:$0xf0] }
  0x32   :  { %1409 = vmatpush.bf16.msrb.mxu2 %v2525_v19  ;;  %v2855_v10 = vld [vmem:[%s4319_s1 + $0x2ec] sm:$0xf]  ;;  %v2181_v15 = vor.u32 %v2831_v6, %v2178_v7  ;;  %v2852_v27 = vld [vmem:[%s4319_s1 + $0x2d4] sm:$0xf]  ;;  %v3495_v32 = vld [vmem:[#allocation1 + $0x24] sm:$0xff] }
  0x33   :  { %1422 = vmatpush.bf16.msrb.mxu3 %v2621_v23  ;;  %v2277_v19 = vor.u32 %v2855_v10, %v2274_v11  ;;  %v2070_v23 = vld [vmem:[%s4319_s1 + $0x15c] sm:$0xf0]  ;;  %v1962_v36 = vld [vmem:[%s4319_s1 + $0x84] sm:$0xf0]  ;;  %v2801_v37 = vld [vmem:[%s4319_s1 + $0x13c] sm:$0xf]  ;;  %v2265_v39 = vor.u32 %v2852_v27, %v2262_v28 }
  0x34   :  { %1384 = vmatpush.bf16.msrb.mxu0 %v2321_v29  ;;  %v3490_v29 = vld [vmem:[#allocation1 + $0x36] sm:$0xff]  ;;  %v3497_v33 = vld [vmem:[#allocation1 + $0x3f] sm:$0xff]  ;;  %v2073_v34 = vor.u32 %v2804_v18, %v2070_v23  ;;  %v3505_v38 = vld [vmem:[#allocation1 + $0x2d] sm:$0xff] }
  0x35   :  { %1397 = vmatpush.bf16.msrb.mxu1 %v2417_v30  ;;  %v1977_v30 = vor.u32 %v2780_v16, %v1974_v17  ;;  %v2058_v40 = vld [vmem:[%s4319_s1 + $0x144] sm:$0xf0]  ;;  %v2774_v48 = vld [vmem:[%s4319_s1 + $0x64] sm:$0xf]  ;;  %v1950_v49 = vld [vmem:[%s4319_s1 + $0x6c] sm:$0xf0] }
  0x36   :  { %1410 = vmatpush.bf16.msrb.mxu2 %v2513_v31  ;;  %v2777_v31 = vld [vmem:[%s4319_s1 + $0x7c] sm:$0xf]  ;;  %v2250_v44 = vld [vmem:[%s4319_s1 + $0x2c4] sm:$0xf0]  ;;  %v2061_v46 = vor.u32 %v2801_v37, %v2058_v40  ;;  %v2798_v50 = vld [vmem:[%s4319_s1 + $0x124] sm:$0xf] }
  0x37   :  { %1423 = vmatpush.bf16.msrb.mxu3 %v2609_v35  ;;  %v2169_v35 = vor.u32 %v2828_v24, %v2166_v25  ;;  %v1965_v45 = vor.u32 %v2777_v31, %v1962_v36  ;;  %v2046_v52 = vld [vmem:[%s4319_s1 + $0x12c] sm:$0xf0]  ;;  %v2846_v55 = vld [vmem:[%s4319_s1 + $0x2a4] sm:$0xf]  ;;  %v2771_v60 = vld [vmem:[%s4319_s1 + $0x4c] sm:$0xf] }
  0x38   :  { %1385 = vmatpush.bf16.msrb.mxu0 %v2309_v41  ;;  %v2825_v41 = vld [vmem:[%s4319_s1 + $0x1fc] sm:$0xf]  ;;  %v2142_v54 = vld [vmem:[%s4319_s1 + $0x1ec] sm:$0xf0]  ;;  %v2049_v58 = vor.u32 %v2798_v50, %v2046_v52  ;;  %v2795_v62 = vld [vmem:[%s4319_s1 + $0x10c] sm:$0xf] }
  0x39   :  { %1398 = vmatpush.bf16.msrb.mxu1 %v2405_v42  ;;  %v2154_v42 = vld [vmem:[%s4319_s1 + $0x204] sm:$0xf0]  ;;  %v2034_v0 = vld [vmem:[%s4319_s1 + $0x114] sm:$0xf0]  ;;  %v2819_v1 = vld [vmem:[%s4319_s1 + $0x1cc] sm:$0xf] }
  0x3a   :  { %1411 = vmatpush.bf16.msrb.mxu2 %v2501_v43  ;;  %v2849_v43 = vld [vmem:[%s4319_s1 + $0x2bc] sm:$0xf]  ;;  %v2130_v2 = vld [vmem:[%s4319_s1 + $0x1d4] sm:$0xf0]  ;;  %v2843_v3 = vld [vmem:[%s4319_s1 + $0x28c] sm:$0xf]  ;;  %v2037_v6 = vor.u32 %v2795_v62, %v2034_v0 }
  0x3b   :  { %1424 = vmatpush.bf16.msrb.mxu3 %v2597_v47  ;;  %v2157_v47 = vor.u32 %v2825_v41, %v2154_v42  ;;  %v2253_v51 = vor.u32 %v2849_v43, %v2250_v44  ;;  %v2133_v7 = vor.u32 %v2819_v1, %v2130_v2  ;;  %v2792_v10 = vld [vmem:[%s4319_s1 + $0xf4] sm:$0xf]  ;;  %v2214_v16 = vld [vmem:[%s4319_s1 + $0x27c] sm:$0xf0]  ;;  %v2765_v23 = vld [vmem:[%s4319_s1 + $0x1c] sm:$0xf] }
  0x3c   :  { %1386 = vmatpush.bf16.msrb.mxu0 %v2297_v53  ;;  %v2822_v53 = vld [vmem:[%s4319_s1 + $0x1e4] sm:$0xf]  ;;  %v1914_v24 = vld [vmem:[%s4319_s1 + $0x24] sm:$0xf0]  ;;  %v2789_v25 = vld [vmem:[%s4319_s1 + $0xdc] sm:$0xf] }
  0x3d   :  { %1399 = vmatpush.bf16.msrb.mxu1 %v2393_v56  ;;  %v2238_v56 = vld [vmem:[%s4319_s1 + $0x2ac] sm:$0xf0]  ;;  %v2145_v59 = vor.u32 %v2822_v53, %v2142_v54  ;;  %v2010_v28 = vld [vmem:[%s4319_s1 + $0xe4] sm:$0xf0]  ;;  %v2762_v36 = vld [vmem:[%s4319_s1 + $0x4] sm:$0xf]  ;;  %v1917_v37 = vor.u32 %v2765_v23, %v1914_v24 }
  0x3e   :  { %1412 = vmatpush.bf16.msrb.mxu2 %v2489_v57  ;;  %v1953_v57 = vor.u32 %v2774_v48, %v1950_v49  ;;  %v2241_v63 = vor.u32 %v2846_v55, %v2238_v56  ;;  %v2106_v31 = vld [vmem:[%s4319_s1 + $0x1a4] sm:$0xf0]  ;;  %v2786_v40 = vld [vmem:[%s4319_s1 + $0xc4] sm:$0xf]  ;;  %v1998_v41 = vld [vmem:[%s4319_s1 + $0xcc] sm:$0xf0]  ;;  %v2013_v42 = vor.u32 %v2789_v25, %v2010_v28 }
  0x3f   :  { %1425 = vmatpush.bf16.msrb.mxu3 %v2585_v61  ;;  %v1938_v61 = vld [vmem:[%s4319_s1 + $0x54] sm:$0xf0]  ;;  %v2810_v44 = vld [vmem:[%s4319_s1 + $0x184] sm:$0xf]  ;;  %v2190_v48 = vld [vmem:[%s4319_s1 + $0x24c] sm:$0xf0] }
  0x40   :  { %1387 = vmatpush.bf16.msrb.mxu0 %v2285_v4  ;;  %v2226_v4 = vld [vmem:[%s4319_s1 + $0x294] sm:$0xf0]  ;;  %v1941_v5 = vor.u32 %v2771_v60, %v1938_v61  ;;  %v2879_v49 = vld [vmem:[%s4319_s1 + $0x3ac] sm:$0xf] }
  0x41   :  { %1400 = vmatpush.bf16.msrb.mxu1 %v2381_v8  ;;  %v2768_v8 = vld [vmem:[%s4319_s1 + $0x34] sm:$0xf]  ;;  %v2229_v11 = vor.u32 %v2843_v3, %v2226_v4  ;;  %v2370_v50 = vld [vmem:[%s4319_s1 + $0x3b4] sm:$0xf0] }
  0x42   :  { %1413 = vmatpush.bf16.msrb.mxu2 %v2477_v9  ;;  %v1926_v9 = vld [vmem:[%s4319_s1 + $0x3c] sm:$0xf0] }
  0x43   :  { %1426 = vmatpush.bf16.msrb.mxu3 %v2573_v12  ;;  %1388 = vmatmul.bf16.vlgmr.msrb.gmra.mxu0 %v3495_v32  ;;  %v2022_v12 = vld [vmem:[%s4319_s1 + $0xfc] sm:$0xf0]  ;;  %v1929_v17 = vor.u32 %v2768_v8, %v1926_v9 }
  0x44   :  { %1432 = vmatpush.bf16.msra.mxu0 %v1989_v13  ;;  %1401 = vmatmul.bf16.vlgmr.msrb.gmra.mxu1 %v3505_v38  ;;  %v2816_v13 = vld [vmem:[%s4319_s1 + $0x1b4] sm:$0xf]  ;;  %v2025_v18 = vor.u32 %v2792_v10, %v2022_v12 }
  0x45   :  { %1445 = vmatpush.bf16.msra.mxu1 %v2085_v14  ;;  %1414 = vmatmul.bf16.vlgmr.msrb.gmra.mxu2 %v3490_v29  ;;  %v2118_v14 = vld [vmem:[%s4319_s1 + $0x1bc] sm:$0xf0] }
  0x46   :  { %1458 = vmatpush.bf16.msra.mxu2 %v2181_v15  ;;  %1427 = vmatmul.bf16.vlgmr.msrb.gmra.mxu3 %v3497_v33  ;;  %v2840_v15 = vld [vmem:[%s4319_s1 + $0x274] sm:$0xf] }
  0x47   :  { %1471 = vmatpush.bf16.msra.mxu3 %v2277_v19  ;;  %v2121_v19 = vor.u32 %v2816_v13, %v2118_v14  ;;  %v2217_v27 = vor.u32 %v2840_v15, %v2214_v16 }
  0x48   :  { %1433 = vmatpush.bf16.msra.mxu0 %v1977_v30  ;;  %v2813_v30 = vld [vmem:[%s4319_s1 + $0x19c] sm:$0xf] }
  0x49   :  { %1446 = vmatpush.bf16.msra.mxu1 %v2073_v34  ;;  %v2837_v34 = vld [vmem:[%s4319_s1 + $0x25c] sm:$0xf]  ;;  %v2109_v43 = vor.u32 %v2813_v30, %v2106_v31 }
  0x4a   :  { %1459 = vmatpush.bf16.msra.mxu2 %v2169_v35  ;;  %v2202_v35 = vld [vmem:[%s4319_s1 + $0x264] sm:$0xf0] }
  0x4b   :  { %1472 = vmatpush.bf16.msra.mxu3 %v2265_v39  ;;  %v1902_v39 = vld [vmem:[%s4319_s1 + $0xc] sm:$0xf0] }
  0x4c   :  { %1434 = vmatpush.bf16.msra.mxu0 %v1965_v45  ;;  %v2094_v45 = vld [vmem:[%s4319_s1 + $0x18c] sm:$0xf0] }
  0x4d   :  { %1447 = vmatpush.bf16.msra.mxu1 %v2061_v46  ;;  %v2834_v46 = vld [vmem:[%s4319_s1 + $0x244] sm:$0xf] }
  0x4e   :  { %1460 = vmatpush.bf16.msra.mxu2 %v2157_v47  ;;  %v2205_v47 = vor.u32 %v2837_v34, %v2202_v35 }
  0x4f   :  { %1473 = vmatpush.bf16.msra.mxu3 %v2253_v51  ;;  %v2903_v51 = vld [vmem:[%s4319_s1 + $0x46c] sm:$0xf] }
  0x50   :  { %1435 = vmatpush.bf16.msra.mxu0 %v1953_v57 }
  0x51   :  { %1448 = vmatpush.bf16.msra.mxu1 %v2049_v58 }
  0x52   :  { %1461 = vmatpush.bf16.msra.mxu2 %v2145_v59 }
  0x53   :  { %1474 = vmatpush.bf16.msra.mxu3 %v2241_v63 }
  0x54   :  { %1436 = vmatpush.bf16.msra.mxu0 %v1941_v5 }
  0x55   :  { %1449 = vmatpush.bf16.msra.mxu1 %v2037_v6 }
  0x56   :  { %1462 = vmatpush.bf16.msra.mxu2 %v2133_v7 }
  0x57   :  { %1475 = vmatpush.bf16.msra.mxu3 %v2229_v11 }
  0x58   :  { %1437 = vmatpush.bf16.msra.mxu0 %v1929_v17 }
  0x59   :  { %1450 = vmatpush.bf16.msra.mxu1 %v2025_v18 }
  0x5a   :  { %1463 = vmatpush.bf16.msra.mxu2 %v2121_v19 }
  0x5b   :  { %1476 = vmatpush.bf16.msra.mxu3 %v2217_v27 }
  0x5c   :  { %10 = vsyncpa [#allocation3], 0  ;;  %1438 = vmatpush.bf16.msra.mxu0 %v1917_v37  ;;  %v1905_v52 = vor.u32 %v2762_v36, %v1902_v39  ;;  %v2466_v53 = vld [vmem:[%s4319_s1 + $0x474] sm:$0xf0]  ;;  %v2927_v54 = vld [vmem:[%s4319_s1 + $0x52c] sm:$0xf]  ;;  %v2001_v56 = vor.u32 %v2786_v40, %v1998_v41  ;;  %v2097_v57 = vor.u32 %v2810_v44, %v2094_v45  ;;  %v2193_v60 = vor.u32 %v2834_v46, %v2190_v48 }
  0x5d   :  { %v2562_v55 = vld [vmem:[%s4319_s1 + $0x534] sm:$0xf0]  ;;  %1451 = vmatpush.bf16.msra.mxu1 %v2013_v42  ;;  %v2951_v58 = vld [vmem:[%s4319_s1 + $0x5ec] sm:$0xf]  ;;  %v2373_v61 = vor.u32 %v2879_v49, %v2370_v50  ;;  %v2469_v62 = vor.u32 %v2903_v51, %v2466_v53  ;;  %v2876_v0 = vld [vmem:[%s4319_s1 + $0x394] sm:$0xf] }
  0x5e   :  { %1464 = vmatpush.bf16.msra.mxu2 %v2109_v43  ;;  %v2658_v59 = vld [vmem:[%s4319_s1 + $0x5f4] sm:$0xf0]  ;;  %v2565_v63 = vor.u32 %v2927_v54, %v2562_v55  ;;  %v2358_v1 = vld [vmem:[%s4319_s1 + $0x39c] sm:$0xf0]  ;;  %v2900_v2 = vld [vmem:[%s4319_s1 + $0x454] sm:$0xf] }
  0x5f   :  { %1477 = vmatpush.bf16.msra.mxu3 %v2205_v47  ;;  %v2661_v3 = vor.u32 %v2951_v58, %v2658_v59  ;;  %v2454_v4 = vld [vmem:[%s4319_s1 + $0x45c] sm:$0xf0]  ;;  %v2924_v5 = vld [vmem:[%s4319_s1 + $0x514] sm:$0xf]  ;;  %v2361_v9 = vor.u32 %v2876_v0, %v2358_v1  ;;  %v2873_v12 = vld [vmem:[%s4319_s1 + $0x37c] sm:$0xf] }
  0x60   :  { %1439 = vmatpush.bf16.msra.mxu0 %v1905_v52  ;;  %v2550_v6 = vld [vmem:[%s4319_s1 + $0x51c] sm:$0xf0]  ;;  %v2948_v7 = vld [vmem:[%s4319_s1 + $0x5d4] sm:$0xf]  ;;  %v2457_v10 = vor.u32 %v2900_v2, %v2454_v4  ;;  %v2346_v13 = vld [vmem:[%s4319_s1 + $0x384] sm:$0xf0] }
  0x61   :  { %1452 = vmatpush.bf16.msra.mxu1 %v2001_v56  ;;  %v2646_v8 = vld [vmem:[%s4319_s1 + $0x5dc] sm:$0xf0]  ;;  %v2553_v11 = vor.u32 %v2924_v5, %v2550_v6  ;;  %v2897_v14 = vld [vmem:[%s4319_s1 + $0x43c] sm:$0xf]  ;;  %v2442_v16 = vld [vmem:[%s4319_s1 + $0x444] sm:$0xf0]  ;;  %v2349_v24 = vor.u32 %v2873_v12, %v2346_v13 }
  0x62   :  { %1465 = vmatpush.bf16.msra.mxu2 %v2097_v57  ;;  %v2649_v15 = vor.u32 %v2948_v7, %v2646_v8  ;;  %v2921_v17 = vld [vmem:[%s4319_s1 + $0x4fc] sm:$0xf]  ;;  %v2538_v18 = vld [vmem:[%s4319_s1 + $0x504] sm:$0xf0]  ;;  %v2445_v25 = vor.u32 %v2897_v14, %v2442_v16  ;;  %v2870_v28 = vld [vmem:[%s4319_s1 + $0x364] sm:$0xf] }
  0x63   :  { %1478 = vmatpush.bf16.msra.mxu3 %v2193_v60  ;;  %v2945_v19 = vld [vmem:[%s4319_s1 + $0x5bc] sm:$0xf]  ;;  %v2634_v23 = vld [vmem:[%s4319_s1 + $0x5c4] sm:$0xf0]  ;;  %1440 = vmatmul.bf16.vlgmr.msra.gmra.mxu0 %v3348_v21  ;;  %v2541_v27 = vor.u32 %v2921_v17, %v2538_v18  ;;  %v2334_v30 = vld [vmem:[%s4319_s1 + $0x36c] sm:$0xf0] }
  0x64   :  { %1484 = vmatpush.bf16.msrb.mxu0 %v2373_v61  ;;  %1453 = vmatmul.bf16.vlgmr.msra.gmra.mxu1 %v3359_v26  ;;  %v2894_v21 = vld [vmem:[%s4319_s1 + $0x424] sm:$0xf]  ;;  %v2430_v31 = vld [vmem:[%s4319_s1 + $0x42c] sm:$0xf0]  ;;  %v2337_v39 = vor.u32 %v2870_v28, %v2334_v30  ;;  %v2867_v42 = vld [vmem:[%s4319_s1 + $0x34c] sm:$0xf] }
  0x65   :  { %1497 = vmatpush.bf16.msrb.mxu1 %v2469_v62  ;;  %1466 = vmatmul.bf16.vlgmr.msra.gmra.mxu2 %v3346_v20  ;;  %v2918_v34 = vld [vmem:[%s4319_s1 + $0x4e4] sm:$0xf]  ;;  %v2526_v35 = vld [vmem:[%s4319_s1 + $0x4ec] sm:$0xf0]  ;;  %v2433_v40 = vor.u32 %v2894_v21, %v2430_v31  ;;  %v2322_v43 = vld [vmem:[%s4319_s1 + $0x354] sm:$0xf0] }
  0x66   :  { %1510 = vmatpush.bf16.msrb.mxu2 %v2565_v63  ;;  %1479 = vmatmul.bf16.vlgmr.msra.gmra.mxu3 %v3350_v22  ;;  %v2637_v22 = vor.u32 %v2945_v19, %v2634_v23  ;;  %v2942_v36 = vld [vmem:[%s4319_s1 + $0x5a4] sm:$0xf]  ;;  %v2622_v37 = vld [vmem:[%s4319_s1 + $0x5ac] sm:$0xf0]  ;;  %v2529_v41 = vor.u32 %v2918_v34, %v2526_v35  ;;  %v2891_v44 = vld [vmem:[%s4319_s1 + $0x40c] sm:$0xf]  ;;  %v2325_v51 = vor.u32 %v2867_v42, %v2322_v43 }
  0x67   :  { %1523 = vmatpush.bf16.msrb.mxu3 %v2661_v3  ;;  %v2625_v45 = vor.u32 %v2942_v36, %v2622_v37  ;;  %v2418_v46 = vld [vmem:[%s4319_s1 + $0x414] sm:$0xf0]  ;;  %v2915_v47 = vld [vmem:[%s4319_s1 + $0x4cc] sm:$0xf]  ;;  %v2864_v54 = vld [vmem:[%s4319_s1 + $0x334] sm:$0xf] }
  0x68   :  { %1485 = vmatpush.bf16.msrb.mxu0 %v2361_v9  ;;  %v2514_v48 = vld [vmem:[%s4319_s1 + $0x4d4] sm:$0xf0]  ;;  %v2939_v49 = vld [vmem:[%s4319_s1 + $0x58c] sm:$0xf]  ;;  %v2421_v52 = vor.u32 %v2891_v44, %v2418_v46  ;;  %v2310_v55 = vld [vmem:[%s4319_s1 + $0x33c] sm:$0xf0] }
  0x69   :  { %1498 = vmatpush.bf16.msrb.mxu1 %v2457_v10  ;;  %v2610_v50 = vld [vmem:[%s4319_s1 + $0x594] sm:$0xf0]  ;;  %v2517_v53 = vor.u32 %v2915_v47, %v2514_v48  ;;  %v2888_v56 = vld [vmem:[%s4319_s1 + $0x3f4] sm:$0xf]  ;;  %v2406_v58 = vld [vmem:[%s4319_s1 + $0x3fc] sm:$0xf0]  ;;  %v2313_v63 = vor.u32 %v2864_v54, %v2310_v55 }
  0x6a   :  { %1511 = vmatpush.bf16.msrb.mxu2 %v2553_v11  ;;  %v2613_v57 = vor.u32 %v2939_v49, %v2610_v50  ;;  %v2912_v59 = vld [vmem:[%s4319_s1 + $0x4b4] sm:$0xf]  ;;  %v2502_v60 = vld [vmem:[%s4319_s1 + $0x4bc] sm:$0xf0]  ;;  %v2409_v0 = vor.u32 %v2888_v56, %v2406_v58  ;;  %v2861_v2 = vld [vmem:[%s4319_s1 + $0x31c] sm:$0xf] }
  0x6b   :  { %1524 = vmatpush.bf16.msrb.mxu3 %v2649_v15  ;;  %v2936_v61 = vld [vmem:[%s4319_s1 + $0x574] sm:$0xf]  ;;  %v2598_v62 = vld [vmem:[%s4319_s1 + $0x57c] sm:$0xf0]  ;;  %v2505_v1 = vor.u32 %v2912_v59, %v2502_v60  ;;  %v2298_v3 = vld [vmem:[%s4319_s1 + $0x324] sm:$0xf0] }
  0x6c   :  { %1486 = vmatpush.bf16.msrb.mxu0 %v2349_v24  ;;  %v2885_v4 = vld [vmem:[%s4319_s1 + $0x3dc] sm:$0xf]  ;;  %v2601_v5 = vor.u32 %v2936_v61, %v2598_v62  ;;  %v2394_v6 = vld [vmem:[%s4319_s1 + $0x3e4] sm:$0xf0]  ;;  %v2301_v11 = vor.u32 %v2861_v2, %v2298_v3  ;;  %v2858_v12 = vld [vmem:[%s4319_s1 + $0x304] sm:$0xf] }
  0x6d   :  { %1499 = vmatpush.bf16.msrb.mxu1 %v2445_v25  ;;  %v2909_v7 = vld [vmem:[%s4319_s1 + $0x49c] sm:$0xf]  ;;  %v2490_v8 = vld [vmem:[%s4319_s1 + $0x4a4] sm:$0xf0]  ;;  %v2286_v13 = vld [vmem:[%s4319_s1 + $0x30c] sm:$0xf0]  ;;  %v2397_v14 = vor.u32 %v2885_v4, %v2394_v6 }
  0x6e   :  { %1512 = vmatpush.bf16.msrb.mxu2 %v2541_v27  ;;  %v2933_v9 = vld [vmem:[%s4319_s1 + $0x55c] sm:$0xf]  ;;  %v2586_v10 = vld [vmem:[%s4319_s1 + $0x564] sm:$0xf0]  ;;  %v2493_v15 = vor.u32 %v2909_v7, %v2490_v8  ;;  %v2882_v16 = vld [vmem:[%s4319_s1 + $0x3c4] sm:$0xf]  ;;  %v2289_v21 = vor.u32 %v2858_v12, %v2286_v13 }
  0x6f   :  { %1525 = vmatpush.bf16.msrb.mxu3 %v2637_v22  ;;  %v2382_v17 = vld [vmem:[%s4319_s1 + $0x3cc] sm:$0xf0]  ;;  %v2906_v18 = vld [vmem:[%s4319_s1 + $0x484] sm:$0xf]  ;;  %v2589_v19 = vor.u32 %v2933_v9, %v2586_v10  ;;  %v2785_v28 = vld [vmem:[%s4319_s1 + $0xb8] sm:$0xf0] }
  0x70   :  { %1487 = vmatpush.bf16.msrb.mxu0 %v2337_v39  ;;  %v2478_v23 = vld [vmem:[%s4319_s1 + $0x48c] sm:$0xf0]  ;;  %v2930_v24 = vld [vmem:[%s4319_s1 + $0x544] sm:$0xf]  ;;  %v2809_v22 = vld [vmem:[%s4319_s1 + $0x178] sm:$0xf0]  ;;  %v2385_v35 = vor.u32 %v2882_v16, %v2382_v17 }
  0x71   :  { %1500 = vmatpush.bf16.msrb.mxu1 %v2433_v40  ;;  %v2574_v25 = vld [vmem:[%s4319_s1 + $0x54c] sm:$0xf0]  ;;  %v2833_v34 = vld [vmem:[%s4319_s1 + $0x238] sm:$0xf0]  ;;  %v2481_v36 = vor.u32 %v2906_v18, %v2478_v23  ;;  %v1980_v44 = vld [vmem:[%s4319_s1 + $0x98] sm:$0xf] }
  0x72   :  { %1513 = vmatpush.bf16.msrb.mxu2 %v2529_v41  ;;  %v1992_v27 = vld [vmem:[%s4319_s1 + $0xb0] sm:$0xf]  ;;  %v2857_v39 = vld [vmem:[%s4319_s1 + $0x2f8] sm:$0xf0]  ;;  %v2577_v40 = vor.u32 %v2930_v24, %v2574_v25  ;;  %v2076_v46 = vld [vmem:[%s4319_s1 + $0x158] sm:$0xf] }
  0x73   :  { %1526 = vmatpush.bf16.msrb.mxu3 %v2625_v45  ;;  %v2088_v30 = vld [vmem:[%s4319_s1 + $0x170] sm:$0xf]  ;;  %v1993_v41 = vor.u32 %v2785_v28, %v1992_v27  ;;  %v2782_v45 = vld [vmem:[%s4319_s1 + $0xa0] sm:$0xf0]  ;;  %v2172_v49 = vld [vmem:[%s4319_s1 + $0x218] sm:$0xf] }
  0x74   :  { %1488 = vmatpush.bf16.msrb.mxu0 %v2325_v51  ;;  %v2184_v31 = vld [vmem:[%s4319_s1 + $0x230] sm:$0xf]  ;;  %v2089_v42 = vor.u32 %v2809_v22, %v2088_v30  ;;  %v2806_v48 = vld [vmem:[%s4319_s1 + $0x160] sm:$0xf0]  ;;  %v2268_v51 = vld [vmem:[%s4319_s1 + $0x2d8] sm:$0xf] }
  0x75   :  { %1501 = vmatpush.bf16.msrb.mxu1 %v2421_v52  ;;  %v2280_v37 = vld [vmem:[%s4319_s1 + $0x2f0] sm:$0xf]  ;;  %v2185_v43 = vor.u32 %v2833_v34, %v2184_v31  ;;  %v2830_v50 = vld [vmem:[%s4319_s1 + $0x220] sm:$0xf0]  ;;  %v2077_v54 = vor.u32 %v2806_v48, %v2076_v46  ;;  %v1968_v56 = vld [vmem:[%s4319_s1 + $0x80] sm:$0xf] }
  0x76   :  { %1514 = vmatpush.bf16.msrb.mxu2 %v2517_v53  ;;  %v2281_v47 = vor.u32 %v2857_v39, %v2280_v37  ;;  %v2854_v52 = vld [vmem:[%s4319_s1 + $0x2e0] sm:$0xf0]  ;;  %v1981_v53 = vor.u32 %v2782_v45, %v1980_v44  ;;  %v2173_v55 = vor.u32 %v2830_v50, %v2172_v49  ;;  %v2064_v58 = vld [vmem:[%s4319_s1 + $0x140] sm:$0xf]  ;;  %v2803_v60 = vld [vmem:[%s4319_s1 + $0x148] sm:$0xf0] }
  0x77   :  { %1527 = vmatpush.bf16.msrb.mxu3 %v2613_v57  ;;  %v2779_v57 = vld [vmem:[%s4319_s1 + $0x88] sm:$0xf0]  ;;  %v2269_v59 = vor.u32 %v2854_v52, %v2268_v51  ;;  %v2160_v61 = vld [vmem:[%s4319_s1 + $0x200] sm:$0xf]  ;;  %v2052_v3 = vld [vmem:[%s4319_s1 + $0x128] sm:$0xf] }
  0x78   :  { %1489 = vmatpush.bf16.msrb.mxu0 %v2313_v63  ;;  %v2827_v62 = vld [vmem:[%s4319_s1 + $0x208] sm:$0xf0]  ;;  %v2824_v6 = vld [vmem:[%s4319_s1 + $0x1f0] sm:$0xf0]  ;;  %v2244_v7 = vld [vmem:[%s4319_s1 + $0x2a8] sm:$0xf] }
  0x79   :  { %1502 = vmatpush.bf16.msrb.mxu1 %v2409_v0  ;;  %v2851_v63 = vld [vmem:[%s4319_s1 + $0x2c8] sm:$0xf0]  ;;  %v1969_v0 = vor.u32 %v2779_v57, %v1968_v56  ;;  %v2161_v2 = vor.u32 %v2827_v62, %v2160_v61  ;;  %v2848_v8 = vld [vmem:[%s4319_s1 + $0x2b0] sm:$0xf0]  ;;  %v1944_v12 = vld [vmem:[%s4319_s1 + $0x50] sm:$0xf] }
  0x7a   :  { %1515 = vmatpush.bf16.msrb.mxu2 %v2505_v1  ;;  %v2065_v1 = vor.u32 %v2803_v60, %v2064_v58  ;;  %v2773_v13 = vld [vmem:[%s4319_s1 + $0x58] sm:$0xf0]  ;;  %v2136_v17 = vld [vmem:[%s4319_s1 + $0x1d0] sm:$0xf]  ;;  %v1932_v28 = vld [vmem:[%s4319_s1 + $0x38] sm:$0xf] }
  0x7b   :  { %1528 = vmatpush.bf16.msrb.mxu3 %v2601_v5  ;;  %v2148_v5 = vld [vmem:[%s4319_s1 + $0x1e8] sm:$0xf]  ;;  %v2797_v16 = vld [vmem:[%s4319_s1 + $0x118] sm:$0xf0]  ;;  %v1945_v24 = vor.u32 %v2773_v13, %v1944_v12  ;;  %v2770_v30 = vld [vmem:[%s4319_s1 + $0x40] sm:$0xf0] }
  0x7c   :  { %1490 = vmatpush.bf16.msrb.mxu0 %v2301_v11  ;;  %v2149_v11 = vor.u32 %v2824_v6, %v2148_v5  ;;  %v2821_v18 = vld [vmem:[%s4319_s1 + $0x1d8] sm:$0xf0]  ;;  %v2794_v31 = vld [vmem:[%s4319_s1 + $0x100] sm:$0xf0]  ;;  %v2124_v34 = vld [vmem:[%s4319_s1 + $0x1b8] sm:$0xf]  ;;  %v1933_v39 = vor.u32 %v2770_v30, %v1932_v28 }
  0x7d   :  { %1503 = vmatpush.bf16.msrb.mxu1 %v2397_v14  ;;  %v2040_v14 = vld [vmem:[%s4319_s1 + $0x110] sm:$0xf]  ;;  %v2845_v23 = vld [vmem:[%s4319_s1 + $0x298] sm:$0xf0]  ;;  %v2137_v27 = vor.u32 %v2821_v18, %v2136_v17  ;;  %v2842_v37 = vld [vmem:[%s4319_s1 + $0x280] sm:$0xf0] }
  0x7e   :  { %1516 = vmatpush.bf16.msrb.mxu2 %v2493_v15  ;;  %v2245_v15 = vor.u32 %v2848_v8, %v2244_v7  ;;  %v2041_v25 = vor.u32 %v2797_v16, %v2040_v14  ;;  %v2016_v44 = vld [vmem:[%s4319_s1 + $0xe0] sm:$0xf]  ;;  %v2791_v46 = vld [vmem:[%s4319_s1 + $0xe8] sm:$0xf0]  ;;  %v1908_v52 = vld [vmem:[%s4319_s1 + $0x8] sm:$0xf] }
  0x7f   :  { %1529 = vmatpush.bf16.msrb.mxu3 %v2589_v19  ;;  %v2232_v19 = vld [vmem:[%s4319_s1 + $0x290] sm:$0xf]  ;;  %v2815_v48 = vld [vmem:[%s4319_s1 + $0x1a8] sm:$0xf0]  ;;  %v2208_v49 = vld [vmem:[%s4319_s1 + $0x260] sm:$0xf] }
  0x80   :  { %1491 = vmatpush.bf16.msrb.mxu0 %v2289_v21  ;;  %v2028_v21 = vld [vmem:[%s4319_s1 + $0xf8] sm:$0xf]  ;;  %v2233_v22 = vor.u32 %v2845_v23, %v2232_v19  ;;  %v2839_v50 = vld [vmem:[%s4319_s1 + $0x268] sm:$0xf0]  ;;  %v2004_v56 = vld [vmem:[%s4319_s1 + $0xc8] sm:$0xf] }
  0x81   :  { %1504 = vmatpush.bf16.msrb.mxu1 %v2385_v35  ;;  %v2818_v35 = vld [vmem:[%s4319_s1 + $0x1c0] sm:$0xf0]  ;;  %v2788_v57 = vld [vmem:[%s4319_s1 + $0xd0] sm:$0xf0]  ;;  %v2100_v58 = vld [vmem:[%s4319_s1 + $0x188] sm:$0xf] }
  0x82   :  { %1517 = vmatpush.bf16.msrb.mxu2 %v2481_v36  ;;  %v2220_v36 = vld [vmem:[%s4319_s1 + $0x278] sm:$0xf]  ;;  %v2812_v60 = vld [vmem:[%s4319_s1 + $0x190] sm:$0xf0]  ;;  %v2196_v61 = vld [vmem:[%s4319_s1 + $0x248] sm:$0xf] }
  0x83   :  { %1530 = vmatpush.bf16.msrb.mxu3 %v2577_v40  ;;  %1492 = vmatmul.bf16.vlgmr.msrb.gmra.mxu0 %v3495_v32  ;;  %v1956_v32 = vld [vmem:[%s4319_s1 + $0x68] sm:$0xf]  ;;  %v2029_v40 = vor.u32 %v2794_v31, %v2028_v21  ;;  %v2221_v45 = vor.u32 %v2842_v37, %v2220_v36  ;;  %v2836_v62 = vld [vmem:[%s4319_s1 + $0x250] sm:$0xf0]  ;;  %v2953_v5 = vld [vmem:[%s4319_s1 + $0x5f8] sm:$0xf0] }
  0x84   :  { %1536 = vmatpush.bf16.msra.mxu0 %v1993_v41  ;;  %1505 = vmatmul.bf16.vlgmr.msrb.gmra.mxu1 %v3505_v38  ;;  %v2800_v38 = vld [vmem:[%s4319_s1 + $0x130] sm:$0xf0]  ;;  %v2125_v41 = vor.u32 %v2818_v35, %v2124_v34  ;;  %v2197_v6 = vor.u32 %v2836_v62, %v2196_v61  ;;  %v2460_v12 = vld [vmem:[%s4319_s1 + $0x458] sm:$0xf]  ;;  %v2902_v14 = vld [vmem:[%s4319_s1 + $0x460] sm:$0xf0] }
  0x85   :  { %1549 = vmatpush.bf16.msra.mxu1 %v2089_v42  ;;  %1518 = vmatmul.bf16.vlgmr.msrb.gmra.mxu2 %v3490_v29  ;;  %v2256_v29 = vld [vmem:[%s4319_s1 + $0x2c0] sm:$0xf]  ;;  %v2053_v10 = vor.u32 %v2800_v38, %v2052_v3  ;;  %v2005_v3 = vor.u32 %v2788_v57, %v2004_v56  ;;  %v2664_v38 = vld [vmem:[%s4319_s1 + $0x5f0] sm:$0xf]  ;;  %v2926_v16 = vld [vmem:[%s4319_s1 + $0x520] sm:$0xf0]  ;;  %v2461_v23 = vor.u32 %v2902_v14, %v2460_v12 }
  0x86   :  { %1562 = vmatpush.bf16.msra.mxu2 %v2185_v43  ;;  %1531 = vmatmul.bf16.vlgmr.msrb.gmra.mxu3 %v3497_v33  ;;  %v2776_v33 = vld [vmem:[%s4319_s1 + $0x70] sm:$0xf0]  ;;  %v2257_v4 = vor.u32 %v2851_v63, %v2256_v29  ;;  %v1920_v42 = vld [vmem:[%s4319_s1 + $0x20] sm:$0xf]  ;;  %v2767_v43 = vld [vmem:[%s4319_s1 + $0x28] sm:$0xf0]  ;;  %v2665_v13 = vor.u32 %v2953_v5, %v2664_v38 }
  0x87   :  { %1575 = vmatpush.bf16.msra.mxu3 %v2281_v47  ;;  %v1957_v9 = vor.u32 %v2776_v33, %v1956_v32  ;;  %v2112_v47 = vld [vmem:[%s4319_s1 + $0x1a0] sm:$0xf]  ;;  %v1921_v51 = vor.u32 %v2767_v43, %v1920_v42  ;;  %v2376_v29 = vld [vmem:[%s4319_s1 + $0x3b0] sm:$0xf]  ;;  %v2881_v63 = vld [vmem:[%s4319_s1 + $0x3b8] sm:$0xf0] }
  0x88   :  { %1537 = vmatpush.bf16.msra.mxu0 %v1981_v53  ;;  %v2764_v53 = vld [vmem:[%s4319_s1 + $0x10] sm:$0xf0]  ;;  %v2568_v32 = vld [vmem:[%s4319_s1 + $0x530] sm:$0xf]  ;;  %v2929_v33 = vld [vmem:[%s4319_s1 + $0x538] sm:$0xf0]  ;;  %v2377_v7 = vor.u32 %v2881_v63, %v2376_v29 }
  0x89   :  { %1550 = vmatpush.bf16.msra.mxu1 %v2077_v54  ;;  %v2017_v54 = vor.u32 %v2791_v46, %v2016_v44  ;;  %v2652_v17 = vld [vmem:[%s4319_s1 + $0x5d8] sm:$0xf]  ;;  %v2950_v18 = vld [vmem:[%s4319_s1 + $0x5e0] sm:$0xf0]  ;;  %v2448_v28 = vld [vmem:[%s4319_s1 + $0x440] sm:$0xf] }
  0x8a   :  { %1563 = vmatpush.bf16.msra.mxu2 %v2173_v55  ;;  %v2113_v55 = vor.u32 %v2815_v48, %v2112_v47  ;;  %v2653_v30 = vor.u32 %v2950_v18, %v2652_v17  ;;  %v2899_v21 = vld [vmem:[%s4319_s1 + $0x448] sm:$0xf0]  ;;  %v2640_v34 = vld [vmem:[%s4319_s1 + $0x5c0] sm:$0xf]  ;;  %v2872_v42 = vld [vmem:[%s4319_s1 + $0x370] sm:$0xf0] }
  0x8b   :  { %1576 = vmatpush.bf16.msra.mxu3 %v2269_v59  ;;  %v2209_v59 = vor.u32 %v2839_v50, %v2208_v49  ;;  %v2923_v31 = vld [vmem:[%s4319_s1 + $0x508] sm:$0xf0]  ;;  %v2980_v35 = vld [vmem:[#allocation1] sm:$0xff]  ;;  %v2436_v43 = vld [vmem:[%s4319_s1 + $0x428] sm:$0xf]  ;;  %s3012_s9 = smov [#allocation2]  }
  0x8c   :  { %1538 = vmatpush.bf16.msra.mxu0 %v1969_v0  ;;  %v2472_v0 = vld [vmem:[%s4319_s1 + $0x470] sm:$0xf]  ;;  %v2981_v36 = vld [vmem:[#allocation1 + $0x1b] sm:$0xff]  ;;  %v2920_v46 = vld [vmem:[%s4319_s1 + $0x4f0] sm:$0xf0]  ;;  %s1887_s10 = sshll.u32 %s3012_s9, 4  ;;  %s1888_s10 = int_to_ptr.vmem [resolvable:$true] %s1887_s10 }
  0x8d   :  { %1551 = vmatpush.bf16.msra.mxu1 %v2065_v1  ;;  %v1909_v1 = vor.u32 %v2764_v53, %v1908_v52  ;;  %v2628_v47 = vld [vmem:[%s4319_s1 + $0x5a8] sm:$0xf]  ;;  %v2944_v48 = vld [vmem:[%s4319_s1 + $0x5b0] sm:$0xf0]  ;;  %v2328_v52 = vld [vmem:[%s4319_s1 + $0x350] sm:$0xf] }
  0x8e   :  { %1564 = vmatpush.bf16.msra.mxu2 %v2161_v2  ;;  %v2905_v2 = vld [vmem:[%s4319_s1 + $0x478] sm:$0xf0]  ;;  %v2520_v57 = vld [vmem:[%s4319_s1 + $0x4d0] sm:$0xf]  ;;  %v2316_v63 = vld [vmem:[%s4319_s1 + $0x338] sm:$0xf] }
  0x8f   :  { %1577 = vmatpush.bf16.msra.mxu3 %v2257_v4  ;;  %v2101_v4 = vor.u32 %v2812_v60, %v2100_v58  ;;  %v2473_v8 = vor.u32 %v2905_v2, %v2472_v0  ;;  %v2869_v53 = vld [vmem:[%s4319_s1 + $0x358] sm:$0xf0]  ;;  %v2866_v0 = vld [vmem:[%s4319_s1 + $0x340] sm:$0xf0]  ;;  %v2400_v12 = vld [vmem:[%s4319_s1 + $0x3e0] sm:$0xf] }
  0x90   :  { %1539 = vmatpush.bf16.msra.mxu0 %v1957_v9  ;;  %v2569_v9 = vor.u32 %v2929_v33, %v2568_v32  ;;  %v2893_v56 = vld [vmem:[%s4319_s1 + $0x418] sm:$0xf0]  ;;  %v2329_v61 = vor.u32 %v2869_v53, %v2328_v52  ;;  %v2890_v32 = vld [vmem:[%s4319_s1 + $0x400] sm:$0xf0]  ;;  %v2508_v33 = vld [vmem:[%s4319_s1 + $0x4b8] sm:$0xf]  ;;  %v2317_v5 = vor.u32 %v2866_v0, %v2316_v63 }
  0x91   :  { %1552 = vmatpush.bf16.msra.mxu1 %v2053_v10  ;;  %v2364_v10 = vld [vmem:[%s4319_s1 + $0x398] sm:$0xf]  ;;  %v2917_v58 = vld [vmem:[%s4319_s1 + $0x4d8] sm:$0xf0]  ;;  %v2938_v38 = vld [vmem:[%s4319_s1 + $0x580] sm:$0xf0] }
  0x92   :  { %1565 = vmatpush.bf16.msra.mxu2 %v2149_v11  ;;  %v2878_v11 = vld [vmem:[%s4319_s1 + $0x3a0] sm:$0xf0]  ;;  %v2941_v60 = vld [vmem:[%s4319_s1 + $0x598] sm:$0xf0]  ;;  %v2521_v29 = vor.u32 %v2917_v58, %v2520_v57  ;;  %v2911_v17 = vld [vmem:[%s4319_s1 + $0x4a8] sm:$0xf0] }
  0x93   :  { %1578 = vmatpush.bf16.msra.mxu3 %v2245_v15  ;;  %v2556_v15 = vld [vmem:[%s4319_s1 + $0x518] sm:$0xf]  ;;  %v2365_v19 = vor.u32 %v2878_v11, %v2364_v10  ;;  %v2304_v10 = vld [vmem:[%s4319_s1 + $0x320] sm:$0xf]  ;;  %v2863_v11 = vld [vmem:[%s4319_s1 + $0x328] sm:$0xf0] }
  0x94   :  { %1540 = vmatpush.bf16.msra.mxu0 %v1945_v24  ;;  %v2557_v24 = vor.u32 %v2926_v16, %v2556_v15  ;;  %v2887_v15 = vld [vmem:[%s4319_s1 + $0x3e8] sm:$0xf0]  ;;  %v2496_v16 = vld [vmem:[%s4319_s1 + $0x4a0] sm:$0xf]  ;;  %v2982_v52 = vld [vmem:[#allocation1 + $0x24] sm:$0xff]  ;;  %s1889_s13 = sshll.u32 %s4323_s5, 4  ;;  %s1890_s13 = int_to_ptr.hbm [resolvable:$true] %s1889_s13 }
  0x95   :  { %1553 = vmatpush.bf16.msra.mxu1 %v2041_v25  ;;  %v2352_v25 = vld [vmem:[%s4319_s1 + $0x380] sm:$0xf]  ;;  %v2959_v57 = vld [vmem:[%s4321_s3 + $0x28] sm:$0xff]  ;;  %v2957_v0 = vld [vmem:[%s4321_s3 + $0x18] sm:$0xff] }
  0x96   :  { %1566 = vmatpush.bf16.msra.mxu2 %v2137_v27  ;;  %v2875_v27 = vld [vmem:[%s4319_s1 + $0x388] sm:$0xf0]  ;;  %v2592_v18 = vld [vmem:[%s4319_s1 + $0x560] sm:$0xf] }
  0x97   :  { %1579 = vmatpush.bf16.msra.mxu3 %v2233_v22  ;;  %v2544_v22 = vld [vmem:[%s4319_s1 + $0x500] sm:$0xf]  ;;  %v2353_v37 = vor.u32 %v2875_v27, %v2352_v25  ;;  %v2401_v25 = vor.u32 %v2887_v15, %v2400_v12  ;;  %v2497_v27 = vor.u32 %v2911_v17, %v2496_v16  ;;  %v2964_v17 = vld [vmem:[%s4321_s3 + $0x50] sm:$0xff] }
  0x98   :  { %1541 = vmatpush.bf16.msra.mxu0 %v1933_v39  ;;  %v2449_v39 = vor.u32 %v2899_v21, %v2448_v28  ;;  %v2292_v28 = vld [vmem:[%s4319_s1 + $0x308] sm:$0xf] }
  0x99   :  { %1554 = vmatpush.bf16.msra.mxu1 %v2029_v40  ;;  %v2545_v40 = vor.u32 %v2923_v31, %v2544_v22  ;;  %v2388_v21 = vld [vmem:[%s4319_s1 + $0x3c8] sm:$0xf] }
  0x9a   :  { %1567 = vmatpush.bf16.msra.mxu2 %v2125_v41  ;;  %v2340_v41 = vld [vmem:[%s4319_s1 + $0x368] sm:$0xf] }
  0x9b   :  { %1580 = vmatpush.bf16.msra.mxu3 %v2221_v45  ;;  %v2532_v45 = vld [vmem:[%s4319_s1 + $0x4e8] sm:$0xf]  ;;  %v2341_v49 = vor.u32 %v2872_v42, %v2340_v41 }
  0x9c   :  { %1542 = vmatpush.bf16.msra.mxu0 %v1921_v51  ;;  %v2533_v51 = vor.u32 %v2920_v46, %v2532_v45  ;;  %v2961_v46 = vld [vmem:[%s4321_s3 + $0x38] sm:$0xff] }
  0x9d   :  { %1555 = vmatpush.bf16.msra.mxu1 %v2017_v54  ;;  %v2424_v54 = vld [vmem:[%s4319_s1 + $0x410] sm:$0xf] }
  0x9e   :  { %1568 = vmatpush.bf16.msra.mxu2 %v2113_v55  ;;  %v2629_v55 = vor.u32 %v2944_v48, %v2628_v47  ;;  %v2425_v62 = vor.u32 %v2893_v56, %v2424_v54  ;;  %v2983_v54 = vld [vmem:[#allocation1 + $0x2d] sm:$0xff]  ;;  %v2985_v56 = vld [vmem:[#allocation1 + $0x3f] sm:$0xff] }
  0x9f   :  { %1581 = vmatpush.bf16.msra.mxu3 %v2209_v59  ;;  %v2616_v59 = vld [vmem:[%s4319_s1 + $0x590] sm:$0xf] }
  0xa0   :  { %1543 = vmatpush.bf16.msra.mxu0 %v1909_v1  ;;  %v2412_v1 = vld [vmem:[%s4319_s1 + $0x3f8] sm:$0xf]  ;;  %v2617_v2 = vor.u32 %v2941_v60, %v2616_v59  ;;  %v2958_v59 = vld [vmem:[%s4321_s3 + $0x20] sm:$0xff] }
  0xa1   :  { %1556 = vmatpush.bf16.msra.mxu1 %v2005_v3  ;;  %v2914_v3 = vld [vmem:[%s4319_s1 + $0x4c0] sm:$0xf0] }
  0xa2   :  { %1569 = vmatpush.bf16.msra.mxu2 %v2101_v4  ;;  %v2604_v4 = vld [vmem:[%s4319_s1 + $0x578] sm:$0xf] }
  0xa3   :  { %1582 = vmatpush.bf16.msra.mxu3 %v2197_v6  ;;  %1544 = vmatmul.bf16.vlgmr.msra.gmra.mxu0 %v2980_v35  ;;  %v4187_v6 = vld [vmem:[%s4320_s2] sm:$0x7]  ;;  %v2605_v14 = vor.u32 %v2938_v38, %v2604_v4  ;;  %v2908_v35 = vld [vmem:[%s4319_s1 + $0x490] sm:$0xf0] }
  0xa4   :  { %1588 = vmatpush.bf16.msrb.mxu0 %v2377_v7  ;;  %1557 = vmatmul.bf16.vlgmr.msra.gmra.mxu1 %v3359_v26  ;;  %v2896_v26 = vld [vmem:[%s4319_s1 + $0x430] sm:$0xf0]  ;;  %v1337_v7 = vpop.f32.mrf.mxu0  ;;  %v2966_v38 = vld [vmem:[%s4321_s3 + $0x60] sm:$0xff] }
  0xa5   :  { %1601 = vmatpush.bf16.msrb.mxu1 %v2473_v8  ;;  %1570 = vmatmul.bf16.vlgmr.msra.gmra.mxu2 %v3346_v20  ;;  %v2947_v20 = vld [vmem:[%s4319_s1 + $0x5c8] sm:$0xf0]  ;;  %v2437_v50 = vor.u32 %v2896_v26, %v2436_v43  ;;  %v2413_v8 = vor.u32 %v2890_v32, %v2412_v1 }
  0xa6   :  { %1614 = vmatpush.bf16.msrb.mxu2 %v2569_v9  ;;  %1583 = vmatmul.bf16.vlgmr.msra.gmra.mxu3 %v2981_v36  ;;  %v2641_v44 = vor.u32 %v2947_v20, %v2640_v34  ;;  %v2509_v9 = vor.u32 %v2914_v3, %v2508_v33  ;;  %v2884_v34 = vld [vmem:[%s4319_s1 + $0x3d0] sm:$0xf0]  ;;  %v2484_v20 = vld [vmem:[%s4319_s1 + $0x488] sm:$0xf] }
  0xa7   :  { %1627 = vmatpush.bf16.msrb.mxu3 %v2665_v13  ;;  %v1350_v13 = vpop.f32.mrf.mxu1  ;;  %v2389_v43 = vor.u32 %v2884_v34, %v2388_v21  ;;  %v2967_v32 = vld [vmem:[%s4321_s3 + $0x68] sm:$0xff]  ;;  %v2956_v3 = vld [vmem:[%s4321_s3 + $0x10] sm:$0xff] }
  0xa8   :  { %1589 = vmatpush.bf16.msrb.mxu0 %v2365_v19  ;;  %v2935_v19 = vld [vmem:[%s4319_s1 + $0x568] sm:$0xf0] }
  0xa9   :  { %1602 = vmatpush.bf16.msrb.mxu1 %v2461_v23  ;;  %v280_v23 = vperm.slane %v4187_v6, 0  ;;  %v2593_v31 = vor.u32 %v2935_v19, %v2592_v18 }
  0xaa   :  { %1615 = vmatpush.bf16.msrb.mxu2 %v2557_v24  ;;  %v2305_v24 = vor.u32 %v2863_v11, %v2304_v10  ;;  %v1363_v22 = vpop.f32.mrf.mxu2 }
  0xab   :  { %1628 = vmatpush.bf16.msrb.mxu3 %v2653_v30  ;;  %v2860_v30 = vld [vmem:[%s4319_s1 + $0x310] sm:$0xf0]  ;;  %v1376_v36 = vpop.f32.mrf.mxu3 }
  0xac   :  { %1590 = vmatpush.bf16.msrb.mxu0 %v2353_v37  ;;  %v2580_v37 = vld [vmem:[%s4319_s1 + $0x548] sm:$0xf]  ;;  %v2293_v41 = vor.u32 %v2860_v30, %v2292_v28  ;;  %v1339_v42 = vpop.f32.mrf.mxu0  ;;  %v281_v28 = vperm.slane %v4187_v6, 1 }
  0xad   :  { %1603 = vmatpush.bf16.msrb.mxu1 %v2449_v39  ;;  %v2932_v39 = vld [vmem:[%s4319_s1 + $0x550] sm:$0xf0] }
  0xae   :  { %1616 = vmatpush.bf16.msrb.mxu2 %v2545_v40  ;;  %v1338_v40 = vadd.f32 %v1337_v7, %v280_v23  ;;  %v2581_v45 = vor.u32 %v2932_v39, %v2580_v37  ;;  %v2963_v23 = vld [vmem:[%s4321_s3 + $0x48] sm:$0xff] }
  0xaf   :  { %1629 = vmatpush.bf16.msrb.mxu3 %v2641_v44  ;;  %v2485_v44 = vor.u32 %v2908_v35, %v2484_v20  ;;  %v1352_v26 = vpop.f32.mrf.mxu1 }
  0xb0   :  { %1591 = vmatpush.bf16.msrb.mxu0 %v2341_v49  ;;  %v1351_v47 = vadd.f32 %v1350_v13, %v1338_v40  ;;  %v2969_v49 = vld [vmem:[%s4321_s3 + $0x78] sm:$0xff]  ;;  %v2954_v13 = vld [vmem:[%s4321_s3] sm:$0xff] }
  0xb1   :  { %1604 = vmatpush.bf16.msrb.mxu1 %v2437_v50  ;;  %v2960_v50 = vld [vmem:[%s4321_s3 + $0x30] sm:$0xff] }
  0xb2   :  { %1617 = vmatpush.bf16.msrb.mxu2 %v2533_v51  ;;  %v1365_v48 = vpop.f32.mrf.mxu2  ;;  %v1364_v53 = vadd.f32 %v1363_v22, %v1351_v47 }
  0xb3   :  { %1630 = vmatpush.bf16.msrb.mxu3 %v2629_v55  ;;  %v1378_v51 = vpop.f32.mrf.mxu3  ;;  %v2984_v55 = vld [vmem:[#allocation1 + $0x36] sm:$0xff] }
  0xb4   :  { %1592 = vmatpush.bf16.msrb.mxu0 %v2329_v61  ;;  %v1377_v58 = vadd.f32 %v1376_v36, %v1364_v53  ;;  %v2973_v53 = vld [vmem:[%s4321_s3 + $0x98] sm:$0xff] }
  0xb5   :  { %1605 = vmatpush.bf16.msrb.mxu1 %v2425_v62 }
  0xb6   :  { %1618 = vmatpush.bf16.msrb.mxu2 %v2521_v29  ;;  %v2968_v29 = vld [vmem:[%s4321_s3 + $0x70] sm:$0xff] }
  0xb7   :  { %1631 = vmatpush.bf16.msrb.mxu3 %v2617_v2 }
  0xb8   :  { %1593 = vmatpush.bf16.msrb.mxu0 %v2317_v5 }
  0xb9   :  { %1606 = vmatpush.bf16.msrb.mxu1 %v2413_v8  ;;  %v2955_v8 = vld [vmem:[%s4321_s3 + $0x8] sm:$0xff] }
  0xba   :  { %1619 = vmatpush.bf16.msrb.mxu2 %v2509_v9  ;;  %v2965_v9 = vld [vmem:[%s4321_s3 + $0x58] sm:$0xff] }
  0xbb   :  { %1632 = vmatpush.bf16.msrb.mxu3 %v2605_v14 }
  0xbc   :  { %1594 = vmatpush.bf16.msrb.mxu0 %v2305_v24 }
  0xbd   :  { %1607 = vmatpush.bf16.msrb.mxu1 %v2401_v25 }
  0xbe   :  { %1620 = vmatpush.bf16.msrb.mxu2 %v2497_v27  ;;  %v2962_v27 = vld [vmem:[%s4321_s3 + $0x40] sm:$0xff] }
  0xbf   :  { %1633 = vmatpush.bf16.msrb.mxu3 %v2593_v31 }
  0xc0   :  { %1595 = vmatpush.bf16.msrb.mxu0 %v2293_v41  ;;  %v1389_v60 = vpop.f32.mrf.mxu0 }
  0xc1   :  { %1608 = vmatpush.bf16.msrb.mxu1 %v2389_v43  ;;  %v1390_v61 = vadd.f32 %v1389_v60, %v1377_v58  ;;  %v1402_v62 = vpop.f32.mrf.mxu1  ;;  %v2977_v43 = vld [vmem:[%s4321_s3 + $0xb8] sm:$0xff] }
  0xc2   :  { %1621 = vmatpush.bf16.msrb.mxu2 %v2485_v44 }
  0xc3   :  { %1634 = vmatpush.bf16.msrb.mxu3 %v2581_v45  ;;  %1596 = vmatmul.bf16.vlgmr.msrb.gmra.mxu0 %v2982_v52  ;;  %v1403_v63 = vadd.f32 %v1402_v62, %v1390_v61  ;;  %v2976_v45 = vld [vmem:[%s4321_s3 + $0xb0] sm:$0xff]  ;;  %v2974_v52 = vld [vmem:[%s4321_s3 + $0xa0] sm:$0xff] }
  0xc4   :  { %1842 = vmatpush.bf16.msra.mxu0 %v2961_v46  ;;  %1609 = vmatmul.bf16.vlgmr.msrb.gmra.mxu1 %v2983_v54  ;;  %v2972_v54 = vld [vmem:[%s4321_s3 + $0x90] sm:$0xff]  ;;  %v2970_v61 = vld [vmem:[%s4321_s3 + $0x80] sm:$0xff] }
  0xc5   :  { %1855 = vmatpush.bf16.msra.mxu1 %v2969_v49  ;;  %1622 = vmatmul.bf16.vlgmr.msrb.gmra.mxu2 %v2984_v55  ;;  %v2975_v49 = vld [vmem:[%s4321_s3 + $0xa8] sm:$0xff] }
  0xc6   :  { %1635 = vmatmul.bf16.vlgmr.msrb.gmra.mxu3 %v2985_v56  ;;  %1868 = vmatpush.bf16.msra.mxu2 %v2977_v43 }
  0xc8   :  { %1843 = vmatpush.bf16.msra.mxu0 %v2960_v50  ;;  %v1415_v1 = vpop.f32.mrf.mxu2  ;;  %v1391_v4 = vpop.f32.mrf.mxu0 }
  0xc9   :  { %1856 = vmatpush.bf16.msra.mxu1 %v2968_v29  ;;  %v1428_v2 = vpop.f32.mrf.mxu3  ;;  %v1416_v33 = vadd.f32 %v1415_v1, %v1403_v63  ;;  %v1404_v5 = vpop.f32.mrf.mxu1  ;;  %v282_v29 = vperm.slane %v4187_v6, 2 }
  0xca   :  { %1869 = vmatpush.bf16.msra.mxu2 %v2976_v45 }
  0xcb   :  { %v1429_v7 = vadd.f32 %v1428_v2, %v1416_v33 }
  0xcc   :  { %1844 = vmatpush.bf16.msra.mxu0 %v2959_v57  ;;  %v2971_v57 = vld [vmem:[%s4321_s3 + $0x88] sm:$0xff] }
  0xcd   :  { %1857 = vmatpush.bf16.msra.mxu1 %v2967_v32  ;;  %v1640_v12 = vmax.f32 %v1429_v7, 0.0 }
  0xce   :  { %1870 = vmatpush.bf16.msra.mxu2 %v2975_v49 }
  0xcf   :  { %v1643_v14 = vpack.c.bf16 %v1640_v12, %v1640_v12 }
  0xd0   :  { %1845 = vmatpush.bf16.msra.mxu0 %v2958_v59  ;;  %v1417_v10 = vpop.f32.mrf.mxu2 }
  0xd1   :  { %1858 = vmatpush.bf16.msra.mxu1 %v2966_v38  ;;  %v1430_v11 = vpop.f32.mrf.mxu3 }
  0xd2   :  { %1871 = vmatpush.bf16.msra.mxu2 %v2974_v52 }
  0xd4   :  { %1846 = vmatpush.bf16.msra.mxu0 %v2957_v0 }
  0xd5   :  { %1859 = vmatpush.bf16.msra.mxu1 %v2965_v9 }
  0xd6   :  { %1872 = vmatpush.bf16.msra.mxu2 %v2973_v53 }
  0xd8   :  { %1847 = vmatpush.bf16.msra.mxu0 %v2956_v3 }
  0xd9   :  { %1860 = vmatpush.bf16.msra.mxu1 %v2964_v17 }
  0xda   :  { %1873 = vmatpush.bf16.msra.mxu2 %v2972_v54 }
  0xdc   :  { %1848 = vmatpush.bf16.msra.mxu0 %v2955_v8 }
  0xdd   :  { %1861 = vmatpush.bf16.msra.mxu1 %v2963_v23 }
  0xde   :  { %1874 = vmatpush.bf16.msra.mxu2 %v2971_v57 }
  0xe0   :  { %1849 = vmatpush.bf16.msra.mxu0 %v2954_v13  ;;  %v1441_v15 = vpop.f32.mrf.mxu0 }
  0xe1   :  { %v1454_v16 = vpop.f32.mrf.mxu1  ;;  %1862 = vmatpush.bf16.msra.mxu1 %v2962_v27  ;;  %v1442_v22 = vadd.f32 %v1441_v15, %v281_v28 }
  0xe2   :  { %1875 = vmatpush.bf16.msra.mxu2 %v2970_v61 }
  0xe3   :  { %1850 = vmatmul.bf16.vlgmr.msra.gmra.mxu0 %v1643_v14  ;;  %v1455_v31 = vadd.f32 %v1454_v16, %v1442_v22 }
  0xe8   :  { %v1467_v18 = vpop.f32.mrf.mxu2  ;;  %v1443_v24 = vpop.f32.mrf.mxu0 }
  0xe9   :  { %v1480_v19 = vpop.f32.mrf.mxu3  ;;  %v1456_v25 = vpop.f32.mrf.mxu1  ;;  %v1468_v34 = vadd.f32 %v1467_v18, %v1455_v31  ;;  %v2979_v18 = vld [vmem:[%s4322_s4] ss:$0 sm:$0xff] }
  0xeb   :  { %v1481_v20 = vadd.f32 %v1480_v19, %v1468_v34 }
  0xf0   :  { %v1469_v30 = vpop.f32.mrf.mxu2 }
  0xf1   :  { %v1482_v21 = vpop.f32.mrf.mxu3 }
 0x100   :  { %v1493_v35 = vpop.f32.mrf.mxu0 }
 0x101   :  { %v1494_v36 = vadd.f32 %v1493_v35, %v1481_v20  ;;  %v1506_v37 = vpop.f32.mrf.mxu1 }
 0x103   :  { %v1507_v39 = vadd.f32 %v1506_v37, %v1494_v36 }
 0x108   :  { %v1519_v40 = vpop.f32.mrf.mxu2  ;;  %v1495_v26 = vpop.f32.mrf.mxu0 }
 0x109   :  { %v1520_v41 = vadd.f32 %v1519_v40, %v1507_v39  ;;  %v1532_v42 = vpop.f32.mrf.mxu3  ;;  %v1508_v46 = vpop.f32.mrf.mxu1 }
 0x10b   :  { %v1533_v44 = vadd.f32 %v1532_v42, %v1520_v41 }
 0x10d   :  { %v1641_v47 = vmax.f32 %v1533_v44, 0.0 }
 0x10f   :  { %v1644_v48 = vpack.c.bf16 %v1641_v47, %v1641_v47 }
 0x110   :  { %v1521_v50 = vpop.f32.mrf.mxu2 }
 0x111   :  { %1863 = vmatmul.bf16.vlgmr.msra.gmra.mxu1 %v1644_v48  ;;  %v1534_v51 = vpop.f32.mrf.mxu3 }
 0x120   :  { %v1545_v55 = vpop.f32.mrf.mxu0 }
 0x121   :  { %v1558_v56 = vpop.f32.mrf.mxu1  ;;  %v1546_v1 = vadd.f32 %v1545_v55, %v282_v29 }
 0x123   :  { %v1559_v2 = vadd.f32 %v1558_v56, %v1546_v1 }
 0x128   :  { %v1571_v58 = vpop.f32.mrf.mxu2  ;;  %v1547_v60 = vpop.f32.mrf.mxu0 }
 0x129   :  { %v1584_v59 = vpop.f32.mrf.mxu3  ;;  %v1560_v62 = vpop.f32.mrf.mxu1  ;;  %v1572_v32 = vadd.f32 %v1571_v58, %v1559_v2 }
 0x12b   :  { %v1585_v33 = vadd.f32 %v1584_v59, %v1572_v32 }
 0x130   :  { %v1573_v63 = vpop.f32.mrf.mxu2 }
 0x131   :  { %v1586_v0 = vpop.f32.mrf.mxu3 }
 0x140   :  { %v1597_v3 = vpop.f32.mrf.mxu0 }
 0x141   :  { %v1610_v4 = vpop.f32.mrf.mxu1  ;;  %v1598_v38 = vadd.f32 %v1597_v3, %v1585_v33 }
 0x143   :  { %v1611_v5 = vadd.f32 %v1610_v4, %v1598_v38 }
 0x148   :  { %v1623_v7 = vpop.f32.mrf.mxu2  ;;  %v1599_v10 = vpop.f32.mrf.mxu0 }
 0x149   :  { %v1624_v8 = vadd.f32 %v1623_v7, %v1611_v5  ;;  %v1636_v9 = vpop.f32.mrf.mxu3  ;;  %v1612_v11 = vpop.f32.mrf.mxu1 }
 0x14b   :  { %v1637_v12 = vadd.f32 %v1636_v9, %v1624_v8 }
 0x14d   :  { %v1642_v13 = vmax.f32 %v1637_v12, 0.0 }
 0x14f   :  { %v1645_v14 = vpack.c.bf16 %v1642_v13, %v1642_v13 }
 0x150   :  { %v1625_v15 = vpop.f32.mrf.mxu2 }
 0x151   :  { %v1638_v6 = vpop.f32.mrf.mxu3  ;;  %1876 = vmatmul.bf16.vlgmr.msra.gmra.mxu2 %v1645_v14 }
 0x160   :  { %v1851_v16 = vpop.f32.mrf.mxu0 }
 0x161   :  { %v1852_v19 = vadd.f32 %v2979_v18, %v1851_v16 }
 0x168   :  { %v1853_v17 = vpop.f32.mrf.mxu0 }
 0x18e   :  { %v1864_v23 = vpop.f32.mrf.mxu1 }
 0x18f   :  { %v1865_v24 = vadd.f32 %v1864_v23, %v1852_v19 }
 0x196   :  { %v1866_v25 = vpop.f32.mrf.mxu1 }
 0x1d4   :  { %v1877_v27 = vpop.f32.mrf.mxu2 }
 0x1d5   :  { %v1878_v28 = vadd.f32 %v1877_v27, %v1865_v24 }
 0x1d7   :  { %1881 = vst [vmem:[#allocation2] sm:$0x3] %v1878_v28 }
 0x1d8   :  { %1892 = dma.vmem_to_hbm [thread:$0]  %s1888_s10, 32, %s1890_s13, [#allocation3]  }
 0x1dc   :  { %v1879_v30 = vpop.f32.mrf.mxu2 }
 0x1dd   :  { %3010 = dma.done.wait [#allocation3], 32  }
 0x1de   :  { %3011 = vsyncadd [#allocation3], 4294967264 }
 0x1df   :  { %1897 = vsyncpa [#allocation3], 1 }

</bundles_post_ra>
